<compile_context>
chip_gen: v7x
topology: tpu7x:2x2x1
jax: 0.10.0
libtpu: 0.0.40
codegen_flags: <defaults>
</compile_context>

<pallas_src>
import functools

import jax
import jax.numpy as jnp
from jax.experimental import pallas as pl
from jax.experimental.pallas import tpu as pltpu  # noqa: F401

BN_EPS = 1e-5
N_CLASSES = 10
MNIST_PAD = 128                   # lane-padded classifier width
HEAD_DIMS = (19, 19, 82, 57)      # sum, min, mult, div (in this order)
HEAD_PAD = 128                    # each head output padded to a full lane tile
NUM_HEADS = len(HEAD_DIMS)
H1_DIM = 512                      # per-head hidden 1
H2_DIM = 128                      # per-head hidden 2 (== HEAD_PAD)
NEG_BIG = -1e30                   # bias for padded softmax lanes -> exp == 0


# ----------------------------------------------------------------------------
# Fused kernel: classifier + softmax + 4x (Linear->BN->ReLU)x3
# ----------------------------------------------------------------------------
def fused_forward_kernel(
    x_ref, mw_ref, mb_ref,
    w1a_ref, w1b_ref, b1_ref, g1_ref, be1_ref,
    w2_ref, b2_ref, g2_ref, be2_ref,
    w3_ref, b3_ref, g3_ref, be3_ref,
    o_ref,
):
    n = x_ref.shape[0] // 2

    # ---- mnist classifier + softmax: both images in one (2N,D)@(D,128) push.
    logits = (
        jnp.dot(x_ref[...], mw_ref[...], preferred_element_type=jnp.float32)
        + mb_ref[...]
    )
    m = jnp.max(logits, axis=-1, keepdims=True)
    e = jnp.exp(logits - m)                       # padded lanes -> exactly 0
    sm = e * pl.reciprocal(jnp.sum(e, axis=-1, keepdims=True), approx=False)
    emb1 = sm[:n, :]                              # softmax(mnist(image1)), (N,128)
    emb2 = sm[n:, :]                              # softmax(mnist(image2)), (N,128)

    def bn_relu(y, g, be):
        mu = jnp.mean(y, axis=0, keepdims=True)
        var = jnp.mean((y - mu) ** 2, axis=0, keepdims=True)  # biased (BN train mode)
        return jnp.maximum((y - mu) * jax.lax.rsqrt(var + BN_EPS) * g + be, 0.0)

    # ---- layer 1 of all four heads packed along lanes: emb(N,20) @ W(20,2048)
    # written as emb1 @ W[:10] + emb2 @ W[10:] (no in-kernel lane concat).
    z1 = (
        jnp.dot(emb1, w1a_ref[...], preferred_element_type=jnp.float32)
        + jnp.dot(emb2, w1b_ref[...], preferred_element_type=jnp.float32)
        + b1_ref[...]
    )
    h1 = bn_relu(z1, g1_ref[...], be1_ref[...])   # (N, 4*512)

    # ---- layers 2 & 3 per head on 128-aligned lane slices; results go
    # straight into the lane-dense (N, 4*128) output slab.
    for h in range(NUM_HEADS):
        lo2, hi2 = h * H1_DIM, (h + 1) * H1_DIM
        lo3, hi3 = h * HEAD_PAD, (h + 1) * HEAD_PAD
        z2 = (
            jnp.dot(h1[:, lo2:hi2], w2_ref[h], preferred_element_type=jnp.float32)
            + b2_ref[:, lo3:hi3]
        )
        h2 = bn_relu(z2, g2_ref[:, lo3:hi3], be2_ref[:, lo3:hi3])     # (N, 128)
        z3 = (
            jnp.dot(h2, w3_ref[h], preferred_element_type=jnp.float32)
            + b3_ref[:, lo3:hi3]
        )
        # Padded columns have zero weight/bias/gamma/beta -> stay exactly 0.
        o_ref[:, lo3:hi3] = bn_relu(z3, g3_ref[:, lo3:hi3], be3_ref[:, lo3:hi3])


# ----------------------------------------------------------------------------
# Wrapper
# ----------------------------------------------------------------------------
def _full_spec(shape):
    # Whole-array VMEM block (single grid step).
    return pl.BlockSpec(shape, lambda i: (0,) * len(shape))


def fused_forward(x, p):
    n = x.shape[0] // 2
    args = (
        x, p["mw"], p["mb"],
        p["w1a"], p["w1b"], p["b1"], p["g1"], p["be1"],
        p["w2"], p["b2"], p["g2"], p["be2"],
        p["w3"], p["b3"], p["g3"], p["be3"],
    )
    out_dim = NUM_HEADS * HEAD_PAD
    return pl.pallas_call(
        fused_forward_kernel,
        grid=(1,),
        in_specs=[_full_spec(a.shape) for a in args],
        out_specs=_full_spec((n, out_dim)),
        out_shape=jax.ShapeDtypeStruct((n, out_dim), jnp.float32),
    )(*args)


def digit_calculator_forward(image1, image2, packed):
    n = image1.shape[0]
    x1 = image1.reshape(n, -1).astype(jnp.float32)
    x2 = image2.reshape(n, -1).astype(jnp.float32)
    x = jnp.concatenate([x1, x2], axis=0)     # (2N, C*H*W): one batched classifier
    slab = fused_forward(x, packed)           # (N, 4*128), lane-dense
    return tuple(
        slab[:, h * HEAD_PAD: h * HEAD_PAD + d] for h, d in enumerate(HEAD_DIMS)
    )


# ----------------------------------------------------------------------------
# Deterministic parameter construction (PyTorch-default-style init) + packing
# ----------------------------------------------------------------------------
def make_linear(key, fan_in, fan_out):
    k1, k2 = jax.random.split(key)
    bound = 1.0 / (fan_in ** 0.5)
    w = jax.random.uniform(k1, (fan_in, fan_out), jnp.float32, -bound, bound)
    b = jax.random.uniform(k2, (1, fan_out), jnp.float32, -bound, bound)
    return w, b


def make_block(key, fan_in, fan_out):
    w, b = make_linear(key, fan_in, fan_out)
    gamma = jnp.ones((1, fan_out), jnp.float32)   # BatchNorm1d default weight
    beta = jnp.zeros((1, fan_out), jnp.float32)   # BatchNorm1d default bias
    return (w, b, gamma, beta)


def make_head(key, out_dim):
    k1, k2, k3 = jax.random.split(key, 3)
    return [make_block(k1, 2 * N_CLASSES, H1_DIM),
            make_block(k2, H1_DIM, H2_DIM),
            make_block(k3, H2_DIM, out_dim)]


def pack_params(mnist_params, heads):
    """heads: list of 4 heads in (sum, min, mult, div) order."""
    mw, mb = mnist_params                     # (D, 10), (1, 10)
    d_in = mw.shape[0]
    mw_pad = jnp.zeros((d_in, MNIST_PAD), jnp.float32).at[:, :N_CLASSES].set(mw)
    mb_pad = jnp.full((1, MNIST_PAD), NEG_BIG, jnp.float32).at[:, :N_CLASSES].set(mb)

    def pad_lane(a, width):
        return jnp.zeros((a.shape[0], width), jnp.float32).at[:, :a.shape[1]].set(a)

    # Layer 1: (20, 512) per head -> split rows (image1/image2 halves), pack
    # heads along lanes, zero-pad rows up to MNIST_PAD.
    w1a = jnp.concatenate([h[0][0][:N_CLASSES] for h in heads], axis=1)  # (10, 2048)
    w1b = jnp.concatenate([h[0][0][N_CLASSES:] for h in heads], axis=1)  # (10, 2048)
    pad_rows = jnp.zeros((MNIST_PAD - N_CLASSES, w1a.shape[1]), jnp.float32)
    w1a = jnp.concatenate([w1a, pad_rows], axis=0)                       # (128, 2048)
    w1b = jnp.concatenate([w1b, pad_rows], axis=0)                       # (128, 2048)
    b1 = jnp.concatenate([h[0][1] for h in heads], axis=1)
    g1 = jnp.concatenate([h[0][2] for h in heads], axis=1)
    be1 = jnp.concatenate([h[0][3] for h in heads], axis=1)

    # Layer 2: stack per-head (512, 128).
    w2 = jnp.stack([h[1][0] for h in heads], axis=0)                     # (4, 512, 128)
    b2 = jnp.concatenate([h[1][1] for h in heads], axis=1)               # (1, 512)
    g2 = jnp.concatenate([h[1][2] for h in heads], axis=1)
    be2 = jnp.concatenate([h[1][3] for h in heads], axis=1)

    # Layer 3: pad each head's (128, out_dim) to (128, 128) with zeros, stack.
    w3 = jnp.stack([pad_lane(h[2][0], HEAD_PAD) for h in heads], axis=0)  # (4, 128, 128)
    b3 = jnp.concatenate([pad_lane(h[2][1], HEAD_PAD) for h in heads], axis=1)
    g3 = jnp.concatenate([pad_lane(h[2][2], HEAD_PAD) for h in heads], axis=1)
    be3 = jnp.concatenate([pad_lane(h[2][3], HEAD_PAD) for h in heads], axis=1)

    return dict(mw=mw_pad, mb=mb_pad, w1a=w1a, w1b=w1b, b1=b1, g1=g1, be1=be1,
                w2=w2, b2=b2, g2=g2, be2=be2, w3=w3, b3=b3, g3=g3, be3=be3)


# ----------------------------------------------------------------------------
# Pure-JAX reference (unpacked params) for correctness validation
# ----------------------------------------------------------------------------
def reference_forward(image1, image2, mnist_params, heads):
    n = image1.shape[0]
    x1 = image1.reshape(n, -1).astype(jnp.float32)
    x2 = image2.reshape(n, -1).astype(jnp.float32)
    mw, mb = mnist_params

    def softmax(z):
        z = z - jnp.max(z, axis=1, keepdims=True)
        e = jnp.exp(z)
        return e / jnp.sum(e, axis=1, keepdims=True)

    emb = jnp.concatenate([softmax(x1 @ mw + mb), softmax(x2 @ mw + mb)], axis=1)

    def run_head(x, head):
        for (w, b, g, be) in head:
            y = x @ w + b
            mu = jnp.mean(y, axis=0, keepdims=True)
            var = jnp.mean((y - mu) ** 2, axis=0, keepdims=True)
            x = jnp.maximum((y - mu) * jax.lax.rsqrt(var + BN_EPS) * g + be, 0.0)
        return x

    return tuple(run_head(emb, h) for h in heads)


# ----------------------------------------------------------------------------
if __name__ == "__main__":
    key = jax.random.PRNGKey(0)
    k_img1, k_img2, k_mnist, k_sum, k_min, k_mult, k_div = jax.random.split(key, 7)

    N, C, H, W = 8, 1, 16, 16
    image1 = jax.random.normal(k_img1, (N, C, H, W), jnp.float32)
    image2 = jax.random.normal(k_img2, (N, C, H, W), jnp.float32)

    # Synthetic mnist_model: flatten -> Linear(C*H*W, 10).
    mnist_params = make_linear(k_mnist, C * H * W, N_CLASSES)
    heads = [make_head(k_sum, 19), make_head(k_min, 19),
             make_head(k_mult, 82), make_head(k_div, 57)]
    packed = pack_params(mnist_params, heads)

    fwd = jax.jit(functools.partial(digit_calculator_forward, packed=packed))
    outs = jax.block_until_ready(fwd(image1, image2))

    expected = [(N, d) for d in HEAD_DIMS]
    assert [tuple(o.shape) for o in outs] == expected, [o.shape for o in outs]
    assert all(bool(jnp.isfinite(o).all()) for o in outs)

    # Validate the fused/packed kernel against a plain-JAX reference.
    refs = reference_forward(image1, image2, mnist_params, heads)
    for o, r in zip(outs, refs):
        assert jnp.allclose(o, r, atol=2e-2, rtol=2e-2), float(jnp.abs(o - r).max())

    print("KERNEL_OK")
</pallas_src>

<mosaic_0001>
module attributes {stable_mosaic.version = 11 : i64} {
  func.func @fused_forward_kernel(%arg0: i32, %arg1: memref<16x256xf32, #tpu.memory_space<vmem>>, %arg2: memref<256x128xf32, #tpu.memory_space<vmem>>, %arg3: memref<1x128xf32, #tpu.memory_space<vmem>>, %arg4: memref<128x2048xf32, #tpu.memory_space<vmem>>, %arg5: memref<128x2048xf32, #tpu.memory_space<vmem>>, %arg6: memref<1x2048xf32, #tpu.memory_space<vmem>>, %arg7: memref<1x2048xf32, #tpu.memory_space<vmem>>, %arg8: memref<1x2048xf32, #tpu.memory_space<vmem>>, %arg9: memref<4x512x128xf32, #tpu.memory_space<vmem>>, %arg10: memref<1x512xf32, #tpu.memory_space<vmem>>, %arg11: memref<1x512xf32, #tpu.memory_space<vmem>>, %arg12: memref<1x512xf32, #tpu.memory_space<vmem>>, %arg13: memref<4x128x128xf32, #tpu.memory_space<vmem>>, %arg14: memref<1x512xf32, #tpu.memory_space<vmem>>, %arg15: memref<1x512xf32, #tpu.memory_space<vmem>>, %arg16: memref<1x512xf32, #tpu.memory_space<vmem>>, %arg17: memref<8x512xf32, #tpu.memory_space<vmem>>) attributes {dimension_semantics = [#tpu.dimension_semantics<arbitrary>], iteration_bounds = array<i64: 1>, scalar_prefetch = 0 : i64, scratch_operands = 0 : i64, tpu.core_type = #tpu.core_type<tc>, window_params = [{pipeline_mode = #tpu.pipeline_mode<synchronous>, transform_indices = @transform_0, window_bounds = array<i64: 16, 256>}, {pipeline_mode = #tpu.pipeline_mode<synchronous>, transform_indices = @transform_1, window_bounds = array<i64: 256, 128>}, {pipeline_mode = #tpu.pipeline_mode<synchronous>, transform_indices = @transform_2, window_bounds = array<i64: 1, 128>}, {pipeline_mode = #tpu.pipeline_mode<synchronous>, transform_indices = @transform_3, window_bounds = array<i64: 128, 2048>}, {pipeline_mode = #tpu.pipeline_mode<synchronous>, transform_indices = @transform_4, window_bounds = array<i64: 128, 2048>}, {pipeline_mode = #tpu.pipeline_mode<synchronous>, transform_indices = @transform_5, window_bounds = array<i64: 1, 2048>}, {pipeline_mode = #tpu.pipeline_mode<synchronous>, transform_indices = @transform_6, window_bounds = array<i64: 1, 2048>}, {pipeline_mode = #tpu.pipeline_mode<synchronous>, transform_indices = @transform_7, window_bounds = array<i64: 1, 2048>}, {pipeline_mode = #tpu.pipeline_mode<synchronous>, transform_indices = @transform_8, window_bounds = array<i64: 4, 512, 128>}, {pipeline_mode = #tpu.pipeline_mode<synchronous>, transform_indices = @transform_9, window_bounds = array<i64: 1, 512>}, {pipeline_mode = #tpu.pipeline_mode<synchronous>, transform_indices = @transform_10, window_bounds = array<i64: 1, 512>}, {pipeline_mode = #tpu.pipeline_mode<synchronous>, transform_indices = @transform_11, window_bounds = array<i64: 1, 512>}, {pipeline_mode = #tpu.pipeline_mode<synchronous>, transform_indices = @transform_12, window_bounds = array<i64: 4, 128, 128>}, {pipeline_mode = #tpu.pipeline_mode<synchronous>, transform_indices = @transform_13, window_bounds = array<i64: 1, 512>}, {pipeline_mode = #tpu.pipeline_mode<synchronous>, transform_indices = @transform_14, window_bounds = array<i64: 1, 512>}, {pipeline_mode = #tpu.pipeline_mode<synchronous>, transform_indices = @transform_15, window_bounds = array<i64: 1, 512>}, {pipeline_mode = #tpu.pipeline_mode<synchronous>, transform_indices = @transform_16, window_bounds = array<i64: 8, 512>}]} {
    %c0 = arith.constant 0 : index
    %c0_0 = arith.constant 0 : index
    %0 = vector.load %arg1[%c0, %c0_0] : memref<16x256xf32, #tpu.memory_space<vmem>>, vector<16x256xf32>
    %c0_1 = arith.constant 0 : index
    %c0_2 = arith.constant 0 : index
    %1 = vector.load %arg2[%c0_1, %c0_2] : memref<256x128xf32, #tpu.memory_space<vmem>>, vector<256x128xf32>
    %cst = arith.constant dense<0.000000e+00> : vector<16x128xf32>
    %2 = tpu.matmul %0, %1, %cst {dimension_numbers = #tpu.dot_dimension_numbers<[1], [0], [0], [1], [0, 0, 1, 1], [], []>} : vector<16x256xf32>, vector<256x128xf32>, vector<16x128xf32> -> vector<16x128xf32>
    %c0_3 = arith.constant 0 : index
    %c0_4 = arith.constant 0 : index
    %3 = vector.load %arg3[%c0_3, %c0_4] : memref<1x128xf32, #tpu.memory_space<vmem>>, vector<1x128xf32>
    %4 = vector.broadcast %3 : vector<1x128xf32> to vector<16x128xf32>
    %5 = arith.addf %2, %4 : vector<16x128xf32>
    %cst_5 = arith.constant dense<0xFF800000> : vector<16xf32>
    %6 = vector.multi_reduction <maximumf>, %5, %cst_5 [1] : vector<16x128xf32> to vector<16xf32>
    %7 = vector.shape_cast %6 : vector<16xf32> to vector<16x1xf32>
    %8 = vector.broadcast %7 : vector<16x1xf32> to vector<16x128xf32>
    %9 = arith.subf %5, %8 : vector<16x128xf32>
    %10 = math.exp %9 : vector<16x128xf32>
    %cst_6 = arith.constant dense<0.000000e+00> : vector<16xf32>
    %11 = vector.multi_reduction <add>, %10, %cst_6 [1] : vector<16x128xf32> to vector<16xf32>
    %12 = vector.shape_cast %11 : vector<16xf32> to vector<16x1xf32>
    %13 = tpu.reciprocal %12 : vector<16x1xf32> -> vector<16x1xf32>
    %14 = vector.broadcast %13 : vector<16x1xf32> to vector<16x128xf32>
    %15 = arith.mulf %10, %14 : vector<16x128xf32>
    %16 = vector.extract_strided_slice %15 {offsets = [0, 0], sizes = [8, 128], strides = [1, 1]} : vector<16x128xf32> to vector<8x128xf32>
    %17 = vector.extract_strided_slice %15 {offsets = [8, 0], sizes = [8, 128], strides = [1, 1]} : vector<16x128xf32> to vector<8x128xf32>
    %c0_7 = arith.constant 0 : index
    %c0_8 = arith.constant 0 : index
    %18 = vector.load %arg4[%c0_7, %c0_8] : memref<128x2048xf32, #tpu.memory_space<vmem>>, vector<128x2048xf32>
    %cst_9 = arith.constant dense<0.000000e+00> : vector<8x2048xf32>
    %19 = tpu.matmul %16, %18, %cst_9 {dimension_numbers = #tpu.dot_dimension_numbers<[1], [0], [0], [1], [0, 0, 1, 1], [], []>} : vector<8x128xf32>, vector<128x2048xf32>, vector<8x2048xf32> -> vector<8x2048xf32>
    %c0_10 = arith.constant 0 : index
    %c0_11 = arith.constant 0 : index
    %20 = vector.load %arg5[%c0_10, %c0_11] : memref<128x2048xf32, #tpu.memory_space<vmem>>, vector<128x2048xf32>
    %cst_12 = arith.constant dense<0.000000e+00> : vector<8x2048xf32>
    %21 = tpu.matmul %17, %20, %cst_12 {dimension_numbers = #tpu.dot_dimension_numbers<[1], [0], [0], [1], [0, 0, 1, 1], [], []>} : vector<8x128xf32>, vector<128x2048xf32>, vector<8x2048xf32> -> vector<8x2048xf32>
    %22 = arith.addf %19, %21 : vector<8x2048xf32>
    %c0_13 = arith.constant 0 : index
    %c0_14 = arith.constant 0 : index
    %23 = vector.load %arg6[%c0_13, %c0_14] : memref<1x2048xf32, #tpu.memory_space<vmem>>, vector<1x2048xf32>
    %24 = vector.broadcast %23 : vector<1x2048xf32> to vector<8x2048xf32>
    %25 = arith.addf %22, %24 : vector<8x2048xf32>
    %c0_15 = arith.constant 0 : index
    %c0_16 = arith.constant 0 : index
    %26 = vector.load %arg7[%c0_15, %c0_16] : memref<1x2048xf32, #tpu.memory_space<vmem>>, vector<1x2048xf32>
    %c0_17 = arith.constant 0 : index
    %c0_18 = arith.constant 0 : index
    %27 = vector.load %arg8[%c0_17, %c0_18] : memref<1x2048xf32, #tpu.memory_space<vmem>>, vector<1x2048xf32>
    %cst_19 = arith.constant dense<0.000000e+00> : vector<2048xf32>
    %28 = vector.multi_reduction <add>, %25, %cst_19 [0] : vector<8x2048xf32> to vector<2048xf32>
    %29 = vector.shape_cast %28 : vector<2048xf32> to vector<1x2048xf32>
    %cst_20 = arith.constant 8.000000e+00 : f32
    %30 = vector.broadcast %cst_20 : f32 to vector<1x2048xf32>
    %31 = arith.divf %29, %30 : vector<1x2048xf32>
    %32 = vector.broadcast %31 : vector<1x2048xf32> to vector<8x2048xf32>
    %33 = arith.subf %25, %32 : vector<8x2048xf32>
    %34 = arith.mulf %33, %33 : vector<8x2048xf32>
    %cst_21 = arith.constant dense<0.000000e+00> : vector<2048xf32>
    %35 = vector.multi_reduction <add>, %34, %cst_21 [0] : vector<8x2048xf32> to vector<2048xf32>
    %36 = vector.shape_cast %35 : vector<2048xf32> to vector<1x2048xf32>
    %cst_22 = arith.constant 8.000000e+00 : f32
    %37 = vector.broadcast %cst_22 : f32 to vector<1x2048xf32>
    %38 = arith.divf %36, %37 : vector<1x2048xf32>
    %39 = vector.broadcast %31 : vector<1x2048xf32> to vector<8x2048xf32>
    %40 = arith.subf %25, %39 : vector<8x2048xf32>
    %cst_23 = arith.constant 9.99999974E-6 : f32
    %41 = vector.broadcast %cst_23 : f32 to vector<1x2048xf32>
    %42 = arith.addf %38, %41 : vector<1x2048xf32>
    %43 = math.rsqrt %42 : vector<1x2048xf32>
    %44 = vector.broadcast %43 : vector<1x2048xf32> to vector<8x2048xf32>
    %45 = arith.mulf %40, %44 : vector<8x2048xf32>
    %46 = vector.broadcast %26 : vector<1x2048xf32> to vector<8x2048xf32>
    %47 = arith.mulf %45, %46 : vector<8x2048xf32>
    %48 = vector.broadcast %27 : vector<1x2048xf32> to vector<8x2048xf32>
    %49 = arith.addf %47, %48 : vector<8x2048xf32>
    %cst_24 = arith.constant 0.000000e+00 : f32
    %50 = vector.broadcast %cst_24 : f32 to vector<8x2048xf32>
    %51 = arith.maximumf %49, %50 : vector<8x2048xf32>
    %52 = vector.extract_strided_slice %51 {offsets = [0, 0], sizes = [8, 512], strides = [1, 1]} : vector<8x2048xf32> to vector<8x512xf32>
    %c0_25 = arith.constant 0 : index
    %c0_26 = arith.constant 0 : index
    %c0_27 = arith.constant 0 : index
    %53 = vector.load %arg9[%c0_25, %c0_26, %c0_27] : memref<4x512x128xf32, #tpu.memory_space<vmem>>, vector<1x512x128xf32>
    %54 = vector.shape_cast %53 : vector<1x512x128xf32> to vector<512x128xf32>
    %cst_28 = arith.constant dense<0.000000e+00> : vector<8x128xf32>
    %55 = tpu.matmul %52, %54, %cst_28 {dimension_numbers = #tpu.dot_dimension_numbers<[1], [0], [0], [1], [0, 0, 1, 1], [], []>} : vector<8x512xf32>, vector<512x128xf32>, vector<8x128xf32> -> vector<8x128xf32>
    %c0_29 = arith.constant 0 : index
    %c0_30 = arith.constant 0 : index
    %56 = vector.load %arg10[%c0_29, %c0_30] : memref<1x512xf32, #tpu.memory_space<vmem>>, vector<1x128xf32>
    %57 = vector.broadcast %56 : vector<1x128xf32> to vector<8x128xf32>
    %58 = arith.addf %55, %57 : vector<8x128xf32>
    %c0_31 = arith.constant 0 : index
    %c0_32 = arith.constant 0 : index
    %59 = vector.load %arg11[%c0_31, %c0_32] : memref<1x512xf32, #tpu.memory_space<vmem>>, vector<1x128xf32>
    %c0_33 = arith.constant 0 : index
    %c0_34 = arith.constant 0 : index
    %60 = vector.load %arg12[%c0_33, %c0_34] : memref<1x512xf32, #tpu.memory_space<vmem>>, vector<1x128xf32>
    %cst_35 = arith.constant dense<0.000000e+00> : vector<128xf32>
    %61 = vector.multi_reduction <add>, %58, %cst_35 [0] : vector<8x128xf32> to vector<128xf32>
    %62 = vector.shape_cast %61 : vector<128xf32> to vector<1x128xf32>
    %cst_36 = arith.constant 8.000000e+00 : f32
    %63 = vector.broadcast %cst_36 : f32 to vector<1x128xf32>
    %64 = arith.divf %62, %63 : vector<1x128xf32>
    %65 = vector.broadcast %64 : vector<1x128xf32> to vector<8x128xf32>
    %66 = arith.subf %58, %65 : vector<8x128xf32>
    %67 = arith.mulf %66, %66 : vector<8x128xf32>
    %cst_37 = arith.constant dense<0.000000e+00> : vector<128xf32>
    %68 = vector.multi_reduction <add>, %67, %cst_37 [0] : vector<8x128xf32> to vector<128xf32>
    %69 = vector.shape_cast %68 : vector<128xf32> to vector<1x128xf32>
    %cst_38 = arith.constant 8.000000e+00 : f32
    %70 = vector.broadcast %cst_38 : f32 to vector<1x128xf32>
    %71 = arith.divf %69, %70 : vector<1x128xf32>
    %72 = vector.broadcast %64 : vector<1x128xf32> to vector<8x128xf32>
    %73 = arith.subf %58, %72 : vector<8x128xf32>
    %cst_39 = arith.constant 9.99999974E-6 : f32
    %74 = vector.broadcast %cst_39 : f32 to vector<1x128xf32>
    %75 = arith.addf %71, %74 : vector<1x128xf32>
    %76 = math.rsqrt %75 : vector<1x128xf32>
    %77 = vector.broadcast %76 : vector<1x128xf32> to vector<8x128xf32>
    %78 = arith.mulf %73, %77 : vector<8x128xf32>
    %79 = vector.broadcast %59 : vector<1x128xf32> to vector<8x128xf32>
    %80 = arith.mulf %78, %79 : vector<8x128xf32>
    %81 = vector.broadcast %60 : vector<1x128xf32> to vector<8x128xf32>
    %82 = arith.addf %80, %81 : vector<8x128xf32>
    %cst_40 = arith.constant 0.000000e+00 : f32
    %83 = vector.broadcast %cst_40 : f32 to vector<8x128xf32>
    %84 = arith.maximumf %82, %83 : vector<8x128xf32>
    %c0_41 = arith.constant 0 : index
    %c0_42 = arith.constant 0 : index
    %c0_43 = arith.constant 0 : index
    %85 = vector.load %arg13[%c0_41, %c0_42, %c0_43] : memref<4x128x128xf32, #tpu.memory_space<vmem>>, vector<1x128x128xf32>
    %86 = vector.shape_cast %85 : vector<1x128x128xf32> to vector<128x128xf32>
    %cst_44 = arith.constant dense<0.000000e+00> : vector<8x128xf32>
    %87 = tpu.matmul %84, %86, %cst_44 {dimension_numbers = #tpu.dot_dimension_numbers<[1], [0], [0], [1], [0, 0, 1, 1], [], []>} : vector<8x128xf32>, vector<128x128xf32>, vector<8x128xf32> -> vector<8x128xf32>
    %c0_45 = arith.constant 0 : index
    %c0_46 = arith.constant 0 : index
    %88 = vector.load %arg14[%c0_45, %c0_46] : memref<1x512xf32, #tpu.memory_space<vmem>>, vector<1x128xf32>
    %89 = vector.broadcast %88 : vector<1x128xf32> to vector<8x128xf32>
    %90 = arith.addf %87, %89 : vector<8x128xf32>
    %c0_47 = arith.constant 0 : index
    %c0_48 = arith.constant 0 : index
    %91 = vector.load %arg15[%c0_47, %c0_48] : memref<1x512xf32, #tpu.memory_space<vmem>>, vector<1x128xf32>
    %c0_49 = arith.constant 0 : index
    %c0_50 = arith.constant 0 : index
    %92 = vector.load %arg16[%c0_49, %c0_50] : memref<1x512xf32, #tpu.memory_space<vmem>>, vector<1x128xf32>
    %cst_51 = arith.constant dense<0.000000e+00> : vector<128xf32>
    %93 = vector.multi_reduction <add>, %90, %cst_51 [0] : vector<8x128xf32> to vector<128xf32>
    %94 = vector.shape_cast %93 : vector<128xf32> to vector<1x128xf32>
    %cst_52 = arith.constant 8.000000e+00 : f32
    %95 = vector.broadcast %cst_52 : f32 to vector<1x128xf32>
    %96 = arith.divf %94, %95 : vector<1x128xf32>
    %97 = vector.broadcast %96 : vector<1x128xf32> to vector<8x128xf32>
    %98 = arith.subf %90, %97 : vector<8x128xf32>
    %99 = arith.mulf %98, %98 : vector<8x128xf32>
    %cst_53 = arith.constant dense<0.000000e+00> : vector<128xf32>
    %100 = vector.multi_reduction <add>, %99, %cst_53 [0] : vector<8x128xf32> to vector<128xf32>
    %101 = vector.shape_cast %100 : vector<128xf32> to vector<1x128xf32>
    %cst_54 = arith.constant 8.000000e+00 : f32
    %102 = vector.broadcast %cst_54 : f32 to vector<1x128xf32>
    %103 = arith.divf %101, %102 : vector<1x128xf32>
    %104 = vector.broadcast %96 : vector<1x128xf32> to vector<8x128xf32>
    %105 = arith.subf %90, %104 : vector<8x128xf32>
    %cst_55 = arith.constant 9.99999974E-6 : f32
    %106 = vector.broadcast %cst_55 : f32 to vector<1x128xf32>
    %107 = arith.addf %103, %106 : vector<1x128xf32>
    %108 = math.rsqrt %107 : vector<1x128xf32>
    %109 = vector.broadcast %108 : vector<1x128xf32> to vector<8x128xf32>
    %110 = arith.mulf %105, %109 : vector<8x128xf32>
    %111 = vector.broadcast %91 : vector<1x128xf32> to vector<8x128xf32>
    %112 = arith.mulf %110, %111 : vector<8x128xf32>
    %113 = vector.broadcast %92 : vector<1x128xf32> to vector<8x128xf32>
    %114 = arith.addf %112, %113 : vector<8x128xf32>
    %cst_56 = arith.constant 0.000000e+00 : f32
    %115 = vector.broadcast %cst_56 : f32 to vector<8x128xf32>
    %116 = arith.maximumf %114, %115 : vector<8x128xf32>
    %c0_57 = arith.constant 0 : index
    %c0_58 = arith.constant 0 : index
    %117 = vector.load %arg17[%c0_57, %c0_58] : memref<8x512xf32, #tpu.memory_space<vmem>>, vector<8x128xf32>
    tpu.vector_store %arg17[%c0_57, %c0_58], %116 {strides = array<i32>} : memref<8x512xf32, #tpu.memory_space<vmem>>, vector<8x128xf32>,
    %118 = vector.extract_strided_slice %51 {offsets = [0, 512], sizes = [8, 512], strides = [1, 1]} : vector<8x2048xf32> to vector<8x512xf32>
    %c1 = arith.constant 1 : index
    %c0_59 = arith.constant 0 : index
    %c0_60 = arith.constant 0 : index
    %119 = vector.load %arg9[%c1, %c0_59, %c0_60] : memref<4x512x128xf32, #tpu.memory_space<vmem>>, vector<1x512x128xf32>
    %120 = vector.shape_cast %119 : vector<1x512x128xf32> to vector<512x128xf32>
    %cst_61 = arith.constant dense<0.000000e+00> : vector<8x128xf32>
    %121 = tpu.matmul %118, %120, %cst_61 {dimension_numbers = #tpu.dot_dimension_numbers<[1], [0], [0], [1], [0, 0, 1, 1], [], []>} : vector<8x512xf32>, vector<512x128xf32>, vector<8x128xf32> -> vector<8x128xf32>
    %c0_62 = arith.constant 0 : index
    %c128 = arith.constant 128 : index
    %122 = vector.load %arg10[%c0_62, %c128] : memref<1x512xf32, #tpu.memory_space<vmem>>, vector<1x128xf32>
    %123 = vector.broadcast %122 : vector<1x128xf32> to vector<8x128xf32>
    %124 = arith.addf %121, %123 : vector<8x128xf32>
    %c0_63 = arith.constant 0 : index
    %c128_64 = arith.constant 128 : index
    %125 = vector.load %arg11[%c0_63, %c128_64] : memref<1x512xf32, #tpu.memory_space<vmem>>, vector<1x128xf32>
    %c0_65 = arith.constant 0 : index
    %c128_66 = arith.constant 128 : index
    %126 = vector.load %arg12[%c0_65, %c128_66] : memref<1x512xf32, #tpu.memory_space<vmem>>, vector<1x128xf32>
    %cst_67 = arith.constant dense<0.000000e+00> : vector<128xf32>
    %127 = vector.multi_reduction <add>, %124, %cst_67 [0] : vector<8x128xf32> to vector<128xf32>
    %128 = vector.shape_cast %127 : vector<128xf32> to vector<1x128xf32>
    %cst_68 = arith.constant 8.000000e+00 : f32
    %129 = vector.broadcast %cst_68 : f32 to vector<1x128xf32>
    %130 = arith.divf %128, %129 : vector<1x128xf32>
    %131 = vector.broadcast %130 : vector<1x128xf32> to vector<8x128xf32>
    %132 = arith.subf %124, %131 : vector<8x128xf32>
    %133 = arith.mulf %132, %132 : vector<8x128xf32>
    %cst_69 = arith.constant dense<0.000000e+00> : vector<128xf32>
    %134 = vector.multi_reduction <add>, %133, %cst_69 [0] : vector<8x128xf32> to vector<128xf32>
    %135 = vector.shape_cast %134 : vector<128xf32> to vector<1x128xf32>
    %cst_70 = arith.constant 8.000000e+00 : f32
    %136 = vector.broadcast %cst_70 : f32 to vector<1x128xf32>
    %137 = arith.divf %135, %136 : vector<1x128xf32>
    %138 = vector.broadcast %130 : vector<1x128xf32> to vector<8x128xf32>
    %139 = arith.subf %124, %138 : vector<8x128xf32>
    %cst_71 = arith.constant 9.99999974E-6 : f32
    %140 = vector.broadcast %cst_71 : f32 to vector<1x128xf32>
    %141 = arith.addf %137, %140 : vector<1x128xf32>
    %142 = math.rsqrt %141 : vector<1x128xf32>
    %143 = vector.broadcast %142 : vector<1x128xf32> to vector<8x128xf32>
    %144 = arith.mulf %139, %143 : vector<8x128xf32>
    %145 = vector.broadcast %125 : vector<1x128xf32> to vector<8x128xf32>
    %146 = arith.mulf %144, %145 : vector<8x128xf32>
    %147 = vector.broadcast %126 : vector<1x128xf32> to vector<8x128xf32>
    %148 = arith.addf %146, %147 : vector<8x128xf32>
    %cst_72 = arith.constant 0.000000e+00 : f32
    %149 = vector.broadcast %cst_72 : f32 to vector<8x128xf32>
    %150 = arith.maximumf %148, %149 : vector<8x128xf32>
    %c1_73 = arith.constant 1 : index
    %c0_74 = arith.constant 0 : index
    %c0_75 = arith.constant 0 : index
    %151 = vector.load %arg13[%c1_73, %c0_74, %c0_75] : memref<4x128x128xf32, #tpu.memory_space<vmem>>, vector<1x128x128xf32>
    %152 = vector.shape_cast %151 : vector<1x128x128xf32> to vector<128x128xf32>
    %cst_76 = arith.constant dense<0.000000e+00> : vector<8x128xf32>
    %153 = tpu.matmul %150, %152, %cst_76 {dimension_numbers = #tpu.dot_dimension_numbers<[1], [0], [0], [1], [0, 0, 1, 1], [], []>} : vector<8x128xf32>, vector<128x128xf32>, vector<8x128xf32> -> vector<8x128xf32>
    %c0_77 = arith.constant 0 : index
    %c128_78 = arith.constant 128 : index
    %154 = vector.load %arg14[%c0_77, %c128_78] : memref<1x512xf32, #tpu.memory_space<vmem>>, vector<1x128xf32>
    %155 = vector.broadcast %154 : vector<1x128xf32> to vector<8x128xf32>
    %156 = arith.addf %153, %155 : vector<8x128xf32>
    %c0_79 = arith.constant 0 : index
    %c128_80 = arith.constant 128 : index
    %157 = vector.load %arg15[%c0_79, %c128_80] : memref<1x512xf32, #tpu.memory_space<vmem>>, vector<1x128xf32>
    %c0_81 = arith.constant 0 : index
    %c128_82 = arith.constant 128 : index
    %158 = vector.load %arg16[%c0_81, %c128_82] : memref<1x512xf32, #tpu.memory_space<vmem>>, vector<1x128xf32>
    %cst_83 = arith.constant dense<0.000000e+00> : vector<128xf32>
    %159 = vector.multi_reduction <add>, %156, %cst_83 [0] : vector<8x128xf32> to vector<128xf32>
    %160 = vector.shape_cast %159 : vector<128xf32> to vector<1x128xf32>
    %cst_84 = arith.constant 8.000000e+00 : f32
    %161 = vector.broadcast %cst_84 : f32 to vector<1x128xf32>
    %162 = arith.divf %160, %161 : vector<1x128xf32>
    %163 = vector.broadcast %162 : vector<1x128xf32> to vector<8x128xf32>
    %164 = arith.subf %156, %163 : vector<8x128xf32>
    %165 = arith.mulf %164, %164 : vector<8x128xf32>
    %cst_85 = arith.constant dense<0.000000e+00> : vector<128xf32>
    %166 = vector.multi_reduction <add>, %165, %cst_85 [0] : vector<8x128xf32> to vector<128xf32>
    %167 = vector.shape_cast %166 : vector<128xf32> to vector<1x128xf32>
    %cst_86 = arith.constant 8.000000e+00 : f32
    %168 = vector.broadcast %cst_86 : f32 to vector<1x128xf32>
    %169 = arith.divf %167, %168 : vector<1x128xf32>
    %170 = vector.broadcast %162 : vector<1x128xf32> to vector<8x128xf32>
    %171 = arith.subf %156, %170 : vector<8x128xf32>
    %cst_87 = arith.constant 9.99999974E-6 : f32
    %172 = vector.broadcast %cst_87 : f32 to vector<1x128xf32>
    %173 = arith.addf %169, %172 : vector<1x128xf32>
    %174 = math.rsqrt %173 : vector<1x128xf32>
    %175 = vector.broadcast %174 : vector<1x128xf32> to vector<8x128xf32>
    %176 = arith.mulf %171, %175 : vector<8x128xf32>
    %177 = vector.broadcast %157 : vector<1x128xf32> to vector<8x128xf32>
    %178 = arith.mulf %176, %177 : vector<8x128xf32>
    %179 = vector.broadcast %158 : vector<1x128xf32> to vector<8x128xf32>
    %180 = arith.addf %178, %179 : vector<8x128xf32>
    %cst_88 = arith.constant 0.000000e+00 : f32
    %181 = vector.broadcast %cst_88 : f32 to vector<8x128xf32>
    %182 = arith.maximumf %180, %181 : vector<8x128xf32>
    %c0_89 = arith.constant 0 : index
    %c128_90 = arith.constant 128 : index
    %183 = vector.load %arg17[%c0_89, %c128_90] : memref<8x512xf32, #tpu.memory_space<vmem>>, vector<8x128xf32>
    tpu.vector_store %arg17[%c0_89, %c128_90], %182 {strides = array<i32>} : memref<8x512xf32, #tpu.memory_space<vmem>>, vector<8x128xf32>,
    %184 = vector.extract_strided_slice %51 {offsets = [0, 1024], sizes = [8, 512], strides = [1, 1]} : vector<8x2048xf32> to vector<8x512xf32>
    %c2 = arith.constant 2 : index
    %c0_91 = arith.constant 0 : index
    %c0_92 = arith.constant 0 : index
    %185 = vector.load %arg9[%c2, %c0_91, %c0_92] : memref<4x512x128xf32, #tpu.memory_space<vmem>>, vector<1x512x128xf32>
    %186 = vector.shape_cast %185 : vector<1x512x128xf32> to vector<512x128xf32>
    %cst_93 = arith.constant dense<0.000000e+00> : vector<8x128xf32>
    %187 = tpu.matmul %184, %186, %cst_93 {dimension_numbers = #tpu.dot_dimension_numbers<[1], [0], [0], [1], [0, 0, 1, 1], [], []>} : vector<8x512xf32>, vector<512x128xf32>, vector<8x128xf32> -> vector<8x128xf32>
    %c0_94 = arith.constant 0 : index
    %c256 = arith.constant 256 : index
    %188 = vector.load %arg10[%c0_94, %c256] : memref<1x512xf32, #tpu.memory_space<vmem>>, vector<1x128xf32>
    %189 = vector.broadcast %188 : vector<1x128xf32> to vector<8x128xf32>
    %190 = arith.addf %187, %189 : vector<8x128xf32>
    %c0_95 = arith.constant 0 : index
    %c256_96 = arith.constant 256 : index
    %191 = vector.load %arg11[%c0_95, %c256_96] : memref<1x512xf32, #tpu.memory_space<vmem>>, vector<1x128xf32>
    %c0_97 = arith.constant 0 : index
    %c256_98 = arith.constant 256 : index
    %192 = vector.load %arg12[%c0_97, %c256_98] : memref<1x512xf32, #tpu.memory_space<vmem>>, vector<1x128xf32>
    %cst_99 = arith.constant dense<0.000000e+00> : vector<128xf32>
    %193 = vector.multi_reduction <add>, %190, %cst_99 [0] : vector<8x128xf32> to vector<128xf32>
    %194 = vector.shape_cast %193 : vector<128xf32> to vector<1x128xf32>
    %cst_100 = arith.constant 8.000000e+00 : f32
    %195 = vector.broadcast %cst_100 : f32 to vector<1x128xf32>
    %196 = arith.divf %194, %195 : vector<1x128xf32>
    %197 = vector.broadcast %196 : vector<1x128xf32> to vector<8x128xf32>
    %198 = arith.subf %190, %197 : vector<8x128xf32>
    %199 = arith.mulf %198, %198 : vector<8x128xf32>
    %cst_101 = arith.constant dense<0.000000e+00> : vector<128xf32>
    %200 = vector.multi_reduction <add>, %199, %cst_101 [0] : vector<8x128xf32> to vector<128xf32>
    %201 = vector.shape_cast %200 : vector<128xf32> to vector<1x128xf32>
    %cst_102 = arith.constant 8.000000e+00 : f32
    %202 = vector.broadcast %cst_102 : f32 to vector<1x128xf32>
    %203 = arith.divf %201, %202 : vector<1x128xf32>
    %204 = vector.broadcast %196 : vector<1x128xf32> to vector<8x128xf32>
    %205 = arith.subf %190, %204 : vector<8x128xf32>
    %cst_103 = arith.constant 9.99999974E-6 : f32
    %206 = vector.broadcast %cst_103 : f32 to vector<1x128xf32>
    %207 = arith.addf %203, %206 : vector<1x128xf32>
    %208 = math.rsqrt %207 : vector<1x128xf32>
    %209 = vector.broadcast %208 : vector<1x128xf32> to vector<8x128xf32>
    %210 = arith.mulf %205, %209 : vector<8x128xf32>
    %211 = vector.broadcast %191 : vector<1x128xf32> to vector<8x128xf32>
    %212 = arith.mulf %210, %211 : vector<8x128xf32>
    %213 = vector.broadcast %192 : vector<1x128xf32> to vector<8x128xf32>
    %214 = arith.addf %212, %213 : vector<8x128xf32>
    %cst_104 = arith.constant 0.000000e+00 : f32
    %215 = vector.broadcast %cst_104 : f32 to vector<8x128xf32>
    %216 = arith.maximumf %214, %215 : vector<8x128xf32>
    %c2_105 = arith.constant 2 : index
    %c0_106 = arith.constant 0 : index
    %c0_107 = arith.constant 0 : index
    %217 = vector.load %arg13[%c2_105, %c0_106, %c0_107] : memref<4x128x128xf32, #tpu.memory_space<vmem>>, vector<1x128x128xf32>
    %218 = vector.shape_cast %217 : vector<1x128x128xf32> to vector<128x128xf32>
    %cst_108 = arith.constant dense<0.000000e+00> : vector<8x128xf32>
    %219 = tpu.matmul %216, %218, %cst_108 {dimension_numbers = #tpu.dot_dimension_numbers<[1], [0], [0], [1], [0, 0, 1, 1], [], []>} : vector<8x128xf32>, vector<128x128xf32>, vector<8x128xf32> -> vector<8x128xf32>
    %c0_109 = arith.constant 0 : index
    %c256_110 = arith.constant 256 : index
    %220 = vector.load %arg14[%c0_109, %c256_110] : memref<1x512xf32, #tpu.memory_space<vmem>>, vector<1x128xf32>
    %221 = vector.broadcast %220 : vector<1x128xf32> to vector<8x128xf32>
    %222 = arith.addf %219, %221 : vector<8x128xf32>
    %c0_111 = arith.constant 0 : index
    %c256_112 = arith.constant 256 : index
    %223 = vector.load %arg15[%c0_111, %c256_112] : memref<1x512xf32, #tpu.memory_space<vmem>>, vector<1x128xf32>
    %c0_113 = arith.constant 0 : index
    %c256_114 = arith.constant 256 : index
    %224 = vector.load %arg16[%c0_113, %c256_114] : memref<1x512xf32, #tpu.memory_space<vmem>>, vector<1x128xf32>
    %cst_115 = arith.constant dense<0.000000e+00> : vector<128xf32>
    %225 = vector.multi_reduction <add>, %222, %cst_115 [0] : vector<8x128xf32> to vector<128xf32>
    %226 = vector.shape_cast %225 : vector<128xf32> to vector<1x128xf32>
    %cst_116 = arith.constant 8.000000e+00 : f32
    %227 = vector.broadcast %cst_116 : f32 to vector<1x128xf32>
    %228 = arith.divf %226, %227 : vector<1x128xf32>
    %229 = vector.broadcast %228 : vector<1x128xf32> to vector<8x128xf32>
    %230 = arith.subf %222, %229 : vector<8x128xf32>
    %231 = arith.mulf %230, %230 : vector<8x128xf32>
    %cst_117 = arith.constant dense<0.000000e+00> : vector<128xf32>
    %232 = vector.multi_reduction <add>, %231, %cst_117 [0] : vector<8x128xf32> to vector<128xf32>
    %233 = vector.shape_cast %232 : vector<128xf32> to vector<1x128xf32>
    %cst_118 = arith.constant 8.000000e+00 : f32
    %234 = vector.broadcast %cst_118 : f32 to vector<1x128xf32>
    %235 = arith.divf %233, %234 : vector<1x128xf32>
    %236 = vector.broadcast %228 : vector<1x128xf32> to vector<8x128xf32>
    %237 = arith.subf %222, %236 : vector<8x128xf32>
    %cst_119 = arith.constant 9.99999974E-6 : f32
    %238 = vector.broadcast %cst_119 : f32 to vector<1x128xf32>
    %239 = arith.addf %235, %238 : vector<1x128xf32>
    %240 = math.rsqrt %239 : vector<1x128xf32>
    %241 = vector.broadcast %240 : vector<1x128xf32> to vector<8x128xf32>
    %242 = arith.mulf %237, %241 : vector<8x128xf32>
    %243 = vector.broadcast %223 : vector<1x128xf32> to vector<8x128xf32>
    %244 = arith.mulf %242, %243 : vector<8x128xf32>
    %245 = vector.broadcast %224 : vector<1x128xf32> to vector<8x128xf32>
    %246 = arith.addf %244, %245 : vector<8x128xf32>
    %cst_120 = arith.constant 0.000000e+00 : f32
    %247 = vector.broadcast %cst_120 : f32 to vector<8x128xf32>
    %248 = arith.maximumf %246, %247 : vector<8x128xf32>
    %c0_121 = arith.constant 0 : index
    %c256_122 = arith.constant 256 : index
    %249 = vector.load %arg17[%c0_121, %c256_122] : memref<8x512xf32, #tpu.memory_space<vmem>>, vector<8x128xf32>
    tpu.vector_store %arg17[%c0_121, %c256_122], %248 {strides = array<i32>} : memref<8x512xf32, #tpu.memory_space<vmem>>, vector<8x128xf32>,
    %250 = vector.extract_strided_slice %51 {offsets = [0, 1536], sizes = [8, 512], strides = [1, 1]} : vector<8x2048xf32> to vector<8x512xf32>
    %c3 = arith.constant 3 : index
    %c0_123 = arith.constant 0 : index
    %c0_124 = arith.constant 0 : index
    %251 = vector.load %arg9[%c3, %c0_123, %c0_124] : memref<4x512x128xf32, #tpu.memory_space<vmem>>, vector<1x512x128xf32>
    %252 = vector.shape_cast %251 : vector<1x512x128xf32> to vector<512x128xf32>
    %cst_125 = arith.constant dense<0.000000e+00> : vector<8x128xf32>
    %253 = tpu.matmul %250, %252, %cst_125 {dimension_numbers = #tpu.dot_dimension_numbers<[1], [0], [0], [1], [0, 0, 1, 1], [], []>} : vector<8x512xf32>, vector<512x128xf32>, vector<8x128xf32> -> vector<8x128xf32>
    %c0_126 = arith.constant 0 : index
    %c384 = arith.constant 384 : index
    %254 = vector.load %arg10[%c0_126, %c384] : memref<1x512xf32, #tpu.memory_space<vmem>>, vector<1x128xf32>
    %255 = vector.broadcast %254 : vector<1x128xf32> to vector<8x128xf32>
    %256 = arith.addf %253, %255 : vector<8x128xf32>
    %c0_127 = arith.constant 0 : index
    %c384_128 = arith.constant 384 : index
    %257 = vector.load %arg11[%c0_127, %c384_128] : memref<1x512xf32, #tpu.memory_space<vmem>>, vector<1x128xf32>
    %c0_129 = arith.constant 0 : index
    %c384_130 = arith.constant 384 : index
    %258 = vector.load %arg12[%c0_129, %c384_130] : memref<1x512xf32, #tpu.memory_space<vmem>>, vector<1x128xf32>
    %cst_131 = arith.constant dense<0.000000e+00> : vector<128xf32>
    %259 = vector.multi_reduction <add>, %256, %cst_131 [0] : vector<8x128xf32> to vector<128xf32>
    %260 = vector.shape_cast %259 : vector<128xf32> to vector<1x128xf32>
    %cst_132 = arith.constant 8.000000e+00 : f32
    %261 = vector.broadcast %cst_132 : f32 to vector<1x128xf32>
    %262 = arith.divf %260, %261 : vector<1x128xf32>
    %263 = vector.broadcast %262 : vector<1x128xf32> to vector<8x128xf32>
    %264 = arith.subf %256, %263 : vector<8x128xf32>
    %265 = arith.mulf %264, %264 : vector<8x128xf32>
    %cst_133 = arith.constant dense<0.000000e+00> : vector<128xf32>
    %266 = vector.multi_reduction <add>, %265, %cst_133 [0] : vector<8x128xf32> to vector<128xf32>
    %267 = vector.shape_cast %266 : vector<128xf32> to vector<1x128xf32>
    %cst_134 = arith.constant 8.000000e+00 : f32
    %268 = vector.broadcast %cst_134 : f32 to vector<1x128xf32>
    %269 = arith.divf %267, %268 : vector<1x128xf32>
    %270 = vector.broadcast %262 : vector<1x128xf32> to vector<8x128xf32>
    %271 = arith.subf %256, %270 : vector<8x128xf32>
    %cst_135 = arith.constant 9.99999974E-6 : f32
    %272 = vector.broadcast %cst_135 : f32 to vector<1x128xf32>
    %273 = arith.addf %269, %272 : vector<1x128xf32>
    %274 = math.rsqrt %273 : vector<1x128xf32>
    %275 = vector.broadcast %274 : vector<1x128xf32> to vector<8x128xf32>
    %276 = arith.mulf %271, %275 : vector<8x128xf32>
    %277 = vector.broadcast %257 : vector<1x128xf32> to vector<8x128xf32>
    %278 = arith.mulf %276, %277 : vector<8x128xf32>
    %279 = vector.broadcast %258 : vector<1x128xf32> to vector<8x128xf32>
    %280 = arith.addf %278, %279 : vector<8x128xf32>
    %cst_136 = arith.constant 0.000000e+00 : f32
    %281 = vector.broadcast %cst_136 : f32 to vector<8x128xf32>
    %282 = arith.maximumf %280, %281 : vector<8x128xf32>
    %c3_137 = arith.constant 3 : index
    %c0_138 = arith.constant 0 : index
    %c0_139 = arith.constant 0 : index
    %283 = vector.load %arg13[%c3_137, %c0_138, %c0_139] : memref<4x128x128xf32, #tpu.memory_space<vmem>>, vector<1x128x128xf32>
    %284 = vector.shape_cast %283 : vector<1x128x128xf32> to vector<128x128xf32>
    %cst_140 = arith.constant dense<0.000000e+00> : vector<8x128xf32>
    %285 = tpu.matmul %282, %284, %cst_140 {dimension_numbers = #tpu.dot_dimension_numbers<[1], [0], [0], [1], [0, 0, 1, 1], [], []>} : vector<8x128xf32>, vector<128x128xf32>, vector<8x128xf32> -> vector<8x128xf32>
    %c0_141 = arith.constant 0 : index
    %c384_142 = arith.constant 384 : index
    %286 = vector.load %arg14[%c0_141, %c384_142] : memref<1x512xf32, #tpu.memory_space<vmem>>, vector<1x128xf32>
    %287 = vector.broadcast %286 : vector<1x128xf32> to vector<8x128xf32>
    %288 = arith.addf %285, %287 : vector<8x128xf32>
    %c0_143 = arith.constant 0 : index
    %c384_144 = arith.constant 384 : index
    %289 = vector.load %arg15[%c0_143, %c384_144] : memref<1x512xf32, #tpu.memory_space<vmem>>, vector<1x128xf32>
    %c0_145 = arith.constant 0 : index
    %c384_146 = arith.constant 384 : index
    %290 = vector.load %arg16[%c0_145, %c384_146] : memref<1x512xf32, #tpu.memory_space<vmem>>, vector<1x128xf32>
    %cst_147 = arith.constant dense<0.000000e+00> : vector<128xf32>
    %291 = vector.multi_reduction <add>, %288, %cst_147 [0] : vector<8x128xf32> to vector<128xf32>
    %292 = vector.shape_cast %291 : vector<128xf32> to vector<1x128xf32>
    %cst_148 = arith.constant 8.000000e+00 : f32
    %293 = vector.broadcast %cst_148 : f32 to vector<1x128xf32>
    %294 = arith.divf %292, %293 : vector<1x128xf32>
    %295 = vector.broadcast %294 : vector<1x128xf32> to vector<8x128xf32>
    %296 = arith.subf %288, %295 : vector<8x128xf32>
    %297 = arith.mulf %296, %296 : vector<8x128xf32>
    %cst_149 = arith.constant dense<0.000000e+00> : vector<128xf32>
    %298 = vector.multi_reduction <add>, %297, %cst_149 [0] : vector<8x128xf32> to vector<128xf32>
    %299 = vector.shape_cast %298 : vector<128xf32> to vector<1x128xf32>
    %cst_150 = arith.constant 8.000000e+00 : f32
    %300 = vector.broadcast %cst_150 : f32 to vector<1x128xf32>
    %301 = arith.divf %299, %300 : vector<1x128xf32>
    %302 = vector.broadcast %294 : vector<1x128xf32> to vector<8x128xf32>
    %303 = arith.subf %288, %302 : vector<8x128xf32>
    %cst_151 = arith.constant 9.99999974E-6 : f32
    %304 = vector.broadcast %cst_151 : f32 to vector<1x128xf32>
    %305 = arith.addf %301, %304 : vector<1x128xf32>
    %306 = math.rsqrt %305 : vector<1x128xf32>
    %307 = vector.broadcast %306 : vector<1x128xf32> to vector<8x128xf32>
    %308 = arith.mulf %303, %307 : vector<8x128xf32>
    %309 = vector.broadcast %289 : vector<1x128xf32> to vector<8x128xf32>
    %310 = arith.mulf %308, %309 : vector<8x128xf32>
    %311 = vector.broadcast %290 : vector<1x128xf32> to vector<8x128xf32>
    %312 = arith.addf %310, %311 : vector<8x128xf32>
    %cst_152 = arith.constant 0.000000e+00 : f32
    %313 = vector.broadcast %cst_152 : f32 to vector<8x128xf32>
    %314 = arith.maximumf %312, %313 : vector<8x128xf32>
    %c0_153 = arith.constant 0 : index
    %c384_154 = arith.constant 384 : index
    %315 = vector.load %arg17[%c0_153, %c384_154] : memref<8x512xf32, #tpu.memory_space<vmem>>, vector<8x128xf32>
    tpu.vector_store %arg17[%c0_153, %c384_154], %314 {strides = array<i32>} : memref<8x512xf32, #tpu.memory_space<vmem>>, vector<8x128xf32>,
    return
  }
  func.func @transform_0(%arg0: i32) -> (i32, i32) {
    %c0_i32 = arith.constant 0 : i32
    %c0_i32_0 = arith.constant 0 : i32
    %c0_i32_1 = arith.constant 0 : i32
    return %c0_i32, %c0_i32_0 : i32, i32
  }
  func.func @transform_1(%arg0: i32) -> (i32, i32) {
    %c0_i32 = arith.constant 0 : i32
    %c0_i32_0 = arith.constant 0 : i32
    %c0_i32_1 = arith.constant 0 : i32
    return %c0_i32, %c0_i32_0 : i32, i32
  }
  func.func @transform_2(%arg0: i32) -> (i32, i32) {
    %c0_i32 = arith.constant 0 : i32
    %c0_i32_0 = arith.constant 0 : i32
    %c0_i32_1 = arith.constant 0 : i32
    return %c0_i32, %c0_i32_0 : i32, i32
  }
  func.func @transform_3(%arg0: i32) -> (i32, i32) {
    %c0_i32 = arith.constant 0 : i32
    %c0_i32_0 = arith.constant 0 : i32
    %c0_i32_1 = arith.constant 0 : i32
    return %c0_i32, %c0_i32_0 : i32, i32
  }
  func.func @transform_4(%arg0: i32) -> (i32, i32) {
    %c0_i32 = arith.constant 0 : i32
    %c0_i32_0 = arith.constant 0 : i32
    %c0_i32_1 = arith.constant 0 : i32
    return %c0_i32, %c0_i32_0 : i32, i32
  }
  func.func @transform_5(%arg0: i32) -> (i32, i32) {
    %c0_i32 = arith.constant 0 : i32
    %c0_i32_0 = arith.constant 0 : i32
    %c0_i32_1 = arith.constant 0 : i32
    return %c0_i32, %c0_i32_0 : i32, i32
  }
  func.func @transform_6(%arg0: i32) -> (i32, i32) {
    %c0_i32 = arith.constant 0 : i32
    %c0_i32_0 = arith.constant 0 : i32
    %c0_i32_1 = arith.constant 0 : i32
    return %c0_i32, %c0_i32_0 : i32, i32
  }
  func.func @transform_7(%arg0: i32) -> (i32, i32) {
    %c0_i32 = arith.constant 0 : i32
    %c0_i32_0 = arith.constant 0 : i32
    %c0_i32_1 = arith.constant 0 : i32
    return %c0_i32, %c0_i32_0 : i32, i32
  }
  func.func @transform_8(%arg0: i32) -> (i32, i32, i32) {
    %c0_i32 = arith.constant 0 : i32
    %c0_i32_0 = arith.constant 0 : i32
    %c0_i32_1 = arith.constant 0 : i32
    %c0_i32_2 = arith.constant 0 : i32
    return %c0_i32, %c0_i32_0, %c0_i32_1 : i32, i32, i32
  }
  func.func @transform_9(%arg0: i32) -> (i32, i32) {
    %c0_i32 = arith.constant 0 : i32
    %c0_i32_0 = arith.constant 0 : i32
    %c0_i32_1 = arith.constant 0 : i32
    return %c0_i32, %c0_i32_0 : i32, i32
  }
  func.func @transform_10(%arg0: i32) -> (i32, i32) {
    %c0_i32 = arith.constant 0 : i32
    %c0_i32_0 = arith.constant 0 : i32
    %c0_i32_1 = arith.constant 0 : i32
    return %c0_i32, %c0_i32_0 : i32, i32
  }
  func.func @transform_11(%arg0: i32) -> (i32, i32) {
    %c0_i32 = arith.constant 0 : i32
    %c0_i32_0 = arith.constant 0 : i32
    %c0_i32_1 = arith.constant 0 : i32
    return %c0_i32, %c0_i32_0 : i32, i32
  }
  func.func @transform_12(%arg0: i32) -> (i32, i32, i32) {
    %c0_i32 = arith.constant 0 : i32
    %c0_i32_0 = arith.constant 0 : i32
    %c0_i32_1 = arith.constant 0 : i32
    %c0_i32_2 = arith.constant 0 : i32
    return %c0_i32, %c0_i32_0, %c0_i32_1 : i32, i32, i32
  }
  func.func @transform_13(%arg0: i32) -> (i32, i32) {
    %c0_i32 = arith.constant 0 : i32
    %c0_i32_0 = arith.constant 0 : i32
    %c0_i32_1 = arith.constant 0 : i32
    return %c0_i32, %c0_i32_0 : i32, i32
  }
  func.func @transform_14(%arg0: i32) -> (i32, i32) {
    %c0_i32 = arith.constant 0 : i32
    %c0_i32_0 = arith.constant 0 : i32
    %c0_i32_1 = arith.constant 0 : i32
    return %c0_i32, %c0_i32_0 : i32, i32
  }
  func.func @transform_15(%arg0: i32) -> (i32, i32) {
    %c0_i32 = arith.constant 0 : i32
    %c0_i32_0 = arith.constant 0 : i32
    %c0_i32_1 = arith.constant 0 : i32
    return %c0_i32, %c0_i32_0 : i32, i32
  }
  func.func @transform_16(%arg0: i32) -> (i32, i32) {
    %c0_i32 = arith.constant 0 : i32
    %c0_i32_0 = arith.constant 0 : i32
    %c0_i32_1 = arith.constant 0 : i32
    return %c0_i32, %c0_i32_0 : i32, i32
  }
}

</mosaic_0001>

<bundles_post_ra>
// kernel: digit_calculator_forward.1
= control target key start
LH: loop header
LB: loop body
LE: loop exit
PB: predicated region body
PF: predicated region fallthrough
CT: control target
= control target key end

     0   :  { %s6366_s0 = inlined_call_operand.vmem [shape: f32[16,256], index: 0, kind: input, shape index: {}]   ;;  %s6367_s1 = inlined_call_operand.vmem [shape: f32[256,128], index: 1, kind: input, shape index: {}]   ;;  %s6368_s2 = inlined_call_operand.vmem [shape: f32[1,128], index: 2, kind: input, shape index: {}]   ;;  %s6369_s3 = inlined_call_operand.hbm [shape: f32[128,2048], index: 3, kind: input, shape index: {}]   ;;  %s6370_s4 = inlined_call_operand.hbm [shape: f32[128,2048], index: 4, kind: input, shape index: {}]   ;;  %s6371_s5 = inlined_call_operand.vmem [shape: f32[1,2048], index: 5, kind: input, shape index: {}]   ;;  %s6372_s6 = inlined_call_operand.vmem [shape: f32[1,2048], index: 6, kind: input, shape index: {}]   ;;  %s6373_s7 = inlined_call_operand.vmem [shape: f32[1,2048], index: 7, kind: input, shape index: {}]   ;;  %s6374_s8 = inlined_call_operand.hbm [shape: f32[4,512,128], index: 8, kind: input, shape index: {}]   ;;  %s6375_s9 = inlined_call_operand.vmem [shape: f32[1,512], index: 9, kind: input, shape index: {}]   ;;  %s6376_s10 = inlined_call_operand.vmem [shape: f32[1,512], index: 10, kind: input, shape index: {}]   ;;  %s6377_s11 = inlined_call_operand.vmem [shape: f32[1,512], index: 11, kind: input, shape index: {}, may-alias: {11,15}]   ;;  %s6378_s12 = inlined_call_operand.hbm [shape: f32[4,128,128], index: 12, kind: input, shape index: {}]   ;;  %s6379_s13 = inlined_call_operand.vmem [shape: f32[1,512], index: 13, kind: input, shape index: {}]   ;;  %s6380_s14 = inlined_call_operand.vmem [shape: f32[1,512], index: 14, kind: input, shape index: {}]   ;;  %s6381_s15 = inlined_call_operand.vmem [shape: f32[1,512], index: 15, kind: input, shape index: {}, may-alias: {11,15}]   ;;  %s6382_s16 = inlined_call_operand.vmem [shape: f32[8,512], index: 16, kind: output, shape index: {}]  }
   0x1   :  { %6384 = sst [smem:[#allocation12_spill]] %s6366_s0 }
   0x2   :  { %21 = vsyncpa [#allocation3], 0 }
   0x3   :  { %22 = vsyncpa [#allocation5], 0 }
   0x4   :  { %23 = vsyncpa [#allocation8], 0  ;;  %s5657_s21 = smov [#allocation4]   ;;  %s5658_s23 = smov [#allocation2]  }
   0x5   :  { %s47_s22 = sshll.u32 %s5657_s21, 4  ;;  %s35_s24 = sshll.u32 %s5658_s23, 4  ;;  %s48_s22 = int_to_ptr.vmem [resolvable:$true] %s47_s22  ;;  %s5752_s24 = int_to_ptr.vmem [resolvable:$true] %s35_s24 }
   0x6   :  { %s5563_s27 = scalar_lea.hbm %s6370_s4, 32768 }
   0x7   :  { %p5564_p0 = scmp.ne.s32.totalorder %s6370_s4, %s5563_s27  ;;  %p5567_p1 = scmp.lt.u32.totalorder %s5563_s27, %s6370_s4 }
   0x9   :  { %p5569_p2 = pnand %p5567_p1, %p5564_p0 }
   0xb   :  { %5572 = shalt.err (!%p5569_p2)
}
   0xc   :  { %s5573_s17 = scalar_lea.vmem %s48_s22, 32768  ;;  %p5578_p4 = scmp.lt.s32.totalorder %s48_s22, %s48_s22 }
   0xd   :  { %p5574_p3 = scmp.ne.s32.totalorder %s48_s22, %s5573_s17  ;;  %p5579_p5 = scmp.lt.s32.totalorder %s5573_s17, %s5573_s17 }
   0xf   :  { %p5580_p6 = por %p5579_p5, %p5578_p4 }
  0x11   :  { %p5581_p7 = pnand %p5580_p6, %p5574_p3 }
  0x13   :  { %5584 = shalt.err (!%p5581_p7)
}
  0x14   :  { %s5659_s18 = smov 2048   ;;  %s5660_s19 = smov 128  }
  0x15   :  { %53 = dma.hbm_to_vmem [thread:$0]  %s6370_s4, 32768, %s48_s22, [#allocation5], %s5659_s18, %s5659_s18, %s5660_s19  }
  0x16   :  { %s5585_s26 = scalar_lea.hbm %s6369_s3, 32768 }
  0x17   :  { %p5586_p8 = scmp.ne.s32.totalorder %s6369_s3, %s5585_s26  ;;  %p5589_p9 = scmp.lt.u32.totalorder %s5585_s26, %s6369_s3 }
  0x19   :  { %p5591_p10 = pnand %p5589_p9, %p5586_p8 }
  0x1b   :  { %5594 = shalt.err (!%p5591_p10)
}
  0x1c   :  { %s5595_s0 = scalar_lea.vmem %s5752_s24, 32768  ;;  %p5600_p12 = scmp.lt.s32.totalorder %s5752_s24, %s5752_s24 }
  0x1d   :  { %p5596_p11 = scmp.ne.s32.totalorder %s5752_s24, %s5595_s0  ;;  %p5601_p13 = scmp.lt.s32.totalorder %s5595_s0, %s5595_s0 }
  0x1f   :  { %p5602_p0 = por %p5601_p13, %p5600_p12 }
  0x21   :  { %p5603_p1 = pnand %p5602_p0, %p5596_p11 }
  0x23   :  { %5606 = shalt.err (!%p5603_p1)
}
  0x24   :  { %41 = dma.hbm_to_vmem [thread:$0]  %s6369_s3, 32768, %s5752_s24, [#allocation3], %s5659_s18, %s5659_s18, %s5660_s19  }
  0x25   :  { %s5661_s17 = smov [#allocation6]   ;;  %s5662_s21 = smov [#allocation7]  }
  0x26   :  { %s65_s20 = sshll.u32 %s5661_s17, 4  ;;  %s83_s23 = sshll.u32 %s5662_s21, 4  ;;  %s66_s20 = int_to_ptr.vmem [resolvable:$true] %s65_s20  ;;  %s84_s23 = int_to_ptr.vmem [resolvable:$true] %s83_s23 }
  0x27   :  { %s5607_s27 = scalar_lea.hbm %s6374_s8, 32768 }
  0x28   :  { %p5608_p2 = scmp.ne.s32.totalorder %s6374_s8, %s5607_s27  ;;  %p5611_p3 = scmp.lt.u32.totalorder %s5607_s27, %s6374_s8 }
  0x2a   :  { %p5613_p4 = pnand %p5611_p3, %p5608_p2 }
  0x2c   :  { %5616 = shalt.err (!%p5613_p4)
}
  0x2d   :  { %s5617_s3 = scalar_lea.vmem %s66_s20, 32768  ;;  %p5622_p6 = scmp.lt.s32.totalorder %s66_s20, %s66_s20 }
  0x2e   :  { %p5618_p5 = scmp.ne.s32.totalorder %s66_s20, %s5617_s3  ;;  %p5623_p7 = scmp.lt.s32.totalorder %s5617_s3, %s5617_s3 }
  0x30   :  { %p5624_p8 = por %p5623_p7, %p5622_p6 }
  0x32   :  { %p5625_p9 = pnand %p5624_p8, %p5618_p5 }
  0x34   :  { %5628 = shalt.err (!%p5625_p9)
}
  0x35   :  { %s5663_s24 = smov 8   ;;  %s5629_s21 = scalar_lea.hbm %s6378_s12, 8192 }
  0x36   :  { %71 = dma.hbm_to_vmem [thread:$0]  %s6374_s8, 32768, %s66_s20, [#allocation5], %s5660_s19, %s5660_s19, %s5663_s24  }
  0x37   :  { %p5630_p10 = scmp.ne.s32.totalorder %s6378_s12, %s5629_s21  ;;  %p5633_p11 = scmp.lt.u32.totalorder %s5629_s21, %s6378_s12 }
  0x39   :  { %p5635_p12 = pnand %p5633_p11, %p5630_p10 }
  0x3b   :  { %5638 = shalt.err (!%p5635_p12)
}
  0x3c   :  { %s5639_s29 = scalar_lea.vmem %s84_s23, 8192  ;;  %p5644_p0 = scmp.lt.s32.totalorder %s84_s23, %s84_s23 }
  0x3d   :  { %p5640_p13 = scmp.ne.s32.totalorder %s84_s23, %s5639_s29  ;;  %p5645_p1 = scmp.lt.s32.totalorder %s5639_s29, %s5639_s29 }
  0x3f   :  { %p5646_p2 = por %p5645_p1, %p5644_p0 }
  0x41   :  { %p5647_p3 = pnand %p5646_p2, %p5640_p13 }
  0x43   :  { %5650 = shalt.err (!%p5647_p3)
}
  0x44   :  { %89 = dma.hbm_to_vmem [thread:$0]  %s6378_s12, 8192, %s84_s23, [#allocation8], %s5660_s19, %s5660_s19, %s5663_s24  }
  0x45   :  { %5651 = dma.done.wait [#allocation3], 32768  }
  0x46   :  { %5652 = vsyncadd [#allocation3], 4294934528 }
  0x47   :  { %5653 = dma.done.wait [#allocation5], 65536  }
  0x48   :  { %5654 = vsyncadd [#allocation5], 4294901760 }
  0x49   :  { %5655 = dma.done.wait [#allocation8], 8192  }
  0x4a   :  { %5656 = vsyncadd [#allocation8], 4294959104  ;;  %v128_v0 = vld [vmem:[%s6367_s1 + $0x80] sm:$0xff]  ;;  %v129_v1 = vld [vmem:[%s6367_s1 + $0x88] sm:$0xff]  ;;  %s6385_s30 = sld [smem:[#allocation12_spill]]  ;;  %vm5666_vm0 = vmmov 0  }
  0x4b   :  { %v112_v2 = vld [vmem:[%s6367_s1] sm:$0xff]  ;;  %v4585_v3 = vpack.c.bf16 %v129_v1, %v128_v0  ;;  %v113_v4 = vld [vmem:[%s6367_s1 + $0x8] sm:$0xff]  ;;  %v130_v5 = vld [vmem:[%s6367_s1 + $0x90] sm:$0xff] }
  0x4c   :  { %v131_v6 = vld [vmem:[%s6367_s1 + $0x98] sm:$0xff]  ;;  %v4587_v7 = vpack.c.bf16 %v113_v4, %v112_v2  ;;  %v114_v9 = vld [vmem:[%s6367_s1 + $0x10] sm:$0xff]  ;;  %v132_v11 = vld [vmem:[%s6367_s1 + $0xa0] sm:$0xff] }
  0x4d   :  { %v4589_v8 = vpack.c.bf16 %v131_v6, %v130_v5  ;;  %v115_v10 = vld [vmem:[%s6367_s1 + $0x18] sm:$0xff]  ;;  %4586 = vmatprep.subr.bf16.mxu0 %v4585_v3  ;;  %v133_v12 = vld [vmem:[%s6367_s1 + $0xa8] sm:$0xff]  ;;  %v116_v15 = vld [vmem:[%s6367_s1 + $0x20] sm:$0xff] }
  0x4e   :  { %4588 = vmatpush3.bf16.msra.mxu0 %v4587_v7  ;;  %v4591_v13 = vpack.c.bf16 %v115_v10, %v114_v9  ;;  %v4593_v14 = vpack.c.bf16 %v133_v12, %v132_v11  ;;  %v117_v16 = vld [vmem:[%s6367_s1 + $0x28] sm:$0xff]  ;;  %v134_v17 = vld [vmem:[%s6367_s1 + $0xb0] sm:$0xff]  ;;  %v135_v18 = vld [vmem:[%s6367_s1 + $0xb8] sm:$0xff] }
  0x4f   :  { %4590 = vmatprep.subr.bf16.mxu0 %v4589_v8  ;;  %v4595_v19 = vpack.c.bf16 %v117_v16, %v116_v15  ;;  %v4597_v20 = vpack.c.bf16 %v135_v18, %v134_v17  ;;  %v118_v21 = vld [vmem:[%s6367_s1 + $0x30] sm:$0xff]  ;;  %v119_v22 = vld [vmem:[%s6367_s1 + $0x38] sm:$0xff]  ;;  %v136_v23 = vld [vmem:[%s6367_s1 + $0xc0] sm:$0xff] }
  0x50   :  { %v137_v24 = vld [vmem:[%s6367_s1 + $0xc8] sm:$0xff]  ;;  %v4599_v26 = vpack.c.bf16 %v119_v22, %v118_v21  ;;  %v120_v28 = vld [vmem:[%s6367_s1 + $0x40] sm:$0xff]  ;;  %v138_v30 = vld [vmem:[%s6367_s1 + $0xd0] sm:$0xff] }
  0x51   :  { %v109_v25 = vld [vmem:[%s6385_s30 + $0x8] sm:$0xff]  ;;  %v4601_v27 = vpack.c.bf16 %v137_v24, %v136_v23  ;;  %v139_v31 = vld [vmem:[%s6367_s1 + $0xd8] sm:$0xff]  ;;  %v122_v34 = vld [vmem:[%s6367_s1 + $0x50] sm:$0xff] }
  0x52   :  { %4592 = vmatpush3.bf16.msra.mxu0 %v4591_v13  ;;  %215 = vmatprep.mubr.f32.mxu0 %v109_v25  ;;  %v121_v29 = vld [vmem:[%s6367_s1 + $0x48] sm:$0xff]  ;;  %v4605_v33 = vpack.c.bf16 %v139_v31, %v138_v30  ;;  %v123_v35 = vld [vmem:[%s6367_s1 + $0x58] sm:$0xff]  ;;  %v140_v36 = vld [vmem:[%s6367_s1 + $0xe0] sm:$0xff] }
  0x53   :  { %4594 = vmatprep.subr.bf16.mxu0 %v4593_v14  ;;  %v4603_v32 = vpack.c.bf16 %v121_v29, %v120_v28  ;;  %v141_v37 = vld [vmem:[%s6367_s1 + $0xe8] sm:$0xff]  ;;  %v4607_v38 = vpack.c.bf16 %v123_v35, %v122_v34  ;;  %v124_v40 = vld [vmem:[%s6367_s1 + $0x60] sm:$0xff]  ;;  %v142_v42 = vld [vmem:[%s6367_s1 + $0xf0] sm:$0xff] }
  0x54   :  { %v4609_v39 = vpack.c.bf16 %v141_v37, %v140_v36  ;;  %v125_v41 = vld [vmem:[%s6367_s1 + $0x68] sm:$0xff]  ;;  %v143_v43 = vld [vmem:[%s6367_s1 + $0xf8] sm:$0xff]  ;;  %v126_v46 = vld [vmem:[%s6367_s1 + $0x70] sm:$0xff] }
  0x55   :  { %v4611_v44 = vpack.c.bf16 %v125_v41, %v124_v40  ;;  %v4613_v45 = vpack.c.bf16 %v143_v43, %v142_v42  ;;  %v127_v47 = vld [vmem:[%s6367_s1 + $0x78] sm:$0xff]  ;;  %v108_v49 = vld [vmem:[%s6385_s30] sm:$0xff]  ;;  %v110_v51 = vld [vmem:[%s6385_s30 + $0x10] sm:$0xff] }
  0x56   :  { %4596 = vmatpush3.bf16.msra.mxu0 %v4595_v19  ;;  %v4615_v48 = vpack.c.bf16 %v127_v47, %v126_v46  ;;  %v111_v50 = vld [vmem:[%s6385_s30 + $0x18] sm:$0xff]  ;;  %v4034_v54 = vld [vmem:[%s6368_s2] ss:$0 sm:$0xff]  ;;  %v501_v61 = vld [vmem:[#allocation4 + $0x8] sm:$0xff] }
  0x57   :  { %4598 = vmatprep.subr.bf16.mxu0 %v4597_v20  ;;  %v517_v62 = vld [vmem:[#allocation4 + $0x88] sm:$0xff]  ;;  %v503_v63 = vld [vmem:[#allocation4 + $0x18] sm:$0xff]  ;;  %v500_v2 = vld [vmem:[#allocation4] sm:$0xff] }
  0x58   :  { %v4617_v0 = vpack.c.bf16 %v517_v62, %v501_v61  ;;  %v519_v1 = vld [vmem:[#allocation4 + $0x98] sm:$0xff]  ;;  %v516_v3 = vld [vmem:[#allocation4 + $0x80] sm:$0xff]  ;;  %v502_v6 = vld [vmem:[#allocation4 + $0x10] sm:$0xff] }
  0x59   :  { %v4649_v4 = vpack.c.bf16 %v519_v1, %v503_v63  ;;  %v4619_v5 = vpack.c.bf16 %v516_v3, %v500_v2  ;;  %v518_v7 = vld [vmem:[#allocation4 + $0x90] sm:$0xff]  ;;  %v533_v8 = vld [vmem:[#allocation4 + $0x108] sm:$0xff]  ;;  %v535_v11 = vld [vmem:[#allocation4 + $0x118] sm:$0xff] }
  0x5a   :  { %4600 = vmatpush3.bf16.msra.mxu0 %v4599_v26  ;;  %4618 = vmatprep.subr.bf16.mxu1 %v4617_v0  ;;  %v4651_v9 = vpack.c.bf16 %v518_v7, %v502_v6  ;;  %v549_v10 = vld [vmem:[#allocation4 + $0x188] sm:$0xff]  ;;  %v551_v12 = vld [vmem:[#allocation4 + $0x198] sm:$0xff]  ;;  %v532_v15 = vld [vmem:[#allocation4 + $0x100] sm:$0xff] }
  0x5b   :  { %4602 = vmatprep.subr.bf16.mxu0 %v4601_v27  ;;  %4620 = vmatpush1.bf16.msra.mxu1 %v4619_v5  ;;  %v4621_v13 = vpack.c.bf16 %v549_v10, %v533_v8  ;;  %v4653_v14 = vpack.c.bf16 %v551_v12, %v535_v11  ;;  %v548_v16 = vld [vmem:[#allocation4 + $0x180] sm:$0xff]  ;;  %v534_v17 = vld [vmem:[#allocation4 + $0x110] sm:$0xff]  ;;  %v565_v20 = vld [vmem:[#allocation4 + $0x208] sm:$0xff] }
  0x5c   :  { %v4623_v18 = vpack.c.bf16 %v548_v16, %v532_v15  ;;  %v550_v19 = vld [vmem:[#allocation4 + $0x190] sm:$0xff]  ;;  %v581_v21 = vld [vmem:[#allocation4 + $0x288] sm:$0xff]  ;;  %v567_v24 = vld [vmem:[#allocation4 + $0x218] sm:$0xff] }
  0x5d   :  { %4622 = vmatprep.subr.bf16.mxu1 %v4621_v13  ;;  %v4655_v22 = vpack.c.bf16 %v550_v19, %v534_v17  ;;  %v4625_v23 = vpack.c.bf16 %v581_v21, %v565_v20  ;;  %v583_v25 = vld [vmem:[#allocation4 + $0x298] sm:$0xff]  ;;  %v564_v26 = vld [vmem:[#allocation4 + $0x200] sm:$0xff]  ;;  %v566_v29 = vld [vmem:[#allocation4 + $0x210] sm:$0xff] }
  0x5e   :  { %4604 = vmatpush3.bf16.msra.mxu0 %v4603_v32  ;;  %v4657_v27 = vpack.c.bf16 %v583_v25, %v567_v24  ;;  %v580_v28 = vld [vmem:[#allocation4 + $0x280] sm:$0xff]  ;;  %v582_v30 = vld [vmem:[#allocation4 + $0x290] sm:$0xff]  ;;  %v597_v32 = vld [vmem:[#allocation4 + $0x308] sm:$0xff] }
  0x5f   :  { %4606 = vmatprep.subr.bf16.mxu0 %v4605_v33  ;;  %4624 = vmatpush1.bf16.msra.mxu1 %v4623_v18  ;;  %v4627_v31 = vpack.c.bf16 %v580_v28, %v564_v26  ;;  %v613_v33 = vld [vmem:[#allocation4 + $0x388] sm:$0xff]  ;;  %v599_v34 = vld [vmem:[#allocation4 + $0x318] sm:$0xff]  ;;  %v4659_v35 = vpack.c.bf16 %v582_v30, %v566_v29  ;;  %v598_v41 = vld [vmem:[#allocation4 + $0x310] sm:$0xff] }
  0x60   :  { %4626 = vmatprep.subr.bf16.mxu1 %v4625_v23  ;;  %v4629_v36 = vpack.c.bf16 %v613_v33, %v597_v32  ;;  %v615_v37 = vld [vmem:[#allocation4 + $0x398] sm:$0xff]  ;;  %v614_v42 = vld [vmem:[#allocation4 + $0x390] sm:$0xff]  ;;  %v661_v1 = vld [vmem:[#allocation4 + $0x508] sm:$0xff] }
  0x61   :  { %v4661_v40 = vpack.c.bf16 %v615_v37, %v599_v34  ;;  %v646_v63 = vld [vmem:[#allocation4 + $0x490] sm:$0xff]  ;;  %v677_v2 = vld [vmem:[#allocation4 + $0x588] sm:$0xff]  ;;  %v663_v3 = vld [vmem:[#allocation4 + $0x518] sm:$0xff] }
  0x62   :  { %4608 = vmatpush3.bf16.msra.mxu0 %v4607_v38  ;;  %v596_v38 = vld [vmem:[#allocation4 + $0x300] sm:$0xff]  ;;  %v679_v5 = vld [vmem:[#allocation4 + $0x598] sm:$0xff]  ;;  %v662_v10 = vld [vmem:[#allocation4 + $0x510] sm:$0xff] }
  0x63   :  { %4610 = vmatprep.subr.bf16.mxu0 %v4609_v39  ;;  %v612_v39 = vld [vmem:[#allocation4 + $0x380] sm:$0xff]  ;;  %4628 = vmatpush1.bf16.msra.mxu1 %v4627_v31  ;;  %v4669_v8 = vpack.c.bf16 %v679_v5, %v663_v3  ;;  %v678_v11 = vld [vmem:[#allocation4 + $0x590] sm:$0xff]  ;;  %v693_v13 = vld [vmem:[#allocation4 + $0x608] sm:$0xff] }
  0x64   :  { %v4631_v43 = vpack.c.bf16 %v612_v39, %v596_v38  ;;  %4630 = vmatprep.subr.bf16.mxu1 %v4629_v36  ;;  %v660_v6 = vld [vmem:[#allocation4 + $0x500] sm:$0xff]  ;;  %v4671_v12 = vpack.c.bf16 %v678_v11, %v662_v10  ;;  %v695_v15 = vld [vmem:[#allocation4 + $0x618] sm:$0xff]  ;;  %v710_v23 = vld [vmem:[#allocation4 + $0x690] sm:$0xff] }
  0x65   :  { %v676_v7 = vld [vmem:[#allocation4 + $0x580] sm:$0xff]  ;;  %v711_v17 = vld [vmem:[#allocation4 + $0x698] sm:$0xff]  ;;  %v725_v25 = vld [vmem:[#allocation4 + $0x708] sm:$0xff] }
  0x66   :  { %4612 = vmatpush3.bf16.msra.mxu0 %v4611_v44  ;;  %v4663_v44 = vpack.c.bf16 %v614_v42, %v598_v41  ;;  %v692_v18 = vld [vmem:[#allocation4 + $0x600] sm:$0xff]  ;;  %v4673_v20 = vpack.c.bf16 %v711_v17, %v695_v15  ;;  %v741_v26 = vld [vmem:[#allocation4 + $0x788] sm:$0xff]  ;;  %v743_v29 = vld [vmem:[#allocation4 + $0x798] sm:$0xff] }
  0x67   :  { %4614 = vmatprep.subr.bf16.mxu0 %v4613_v45  ;;  %4632 = vmatpush1.bf16.msra.mxu1 %v4631_v43  ;;  %v708_v19 = vld [vmem:[#allocation4 + $0x680] sm:$0xff]  ;;  %v4645_v28 = vpack.c.bf16 %v741_v26, %v725_v25  ;;  %v726_v34 = vld [vmem:[#allocation4 + $0x710] sm:$0xff]  ;;  %v505_v37 = vld [vmem:[#allocation4 + $0x28] sm:$0xff]  ;;  %v5664_v43 = vmov 0.0  }
  0x68   :  { %v4643_v21 = vpack.c.bf16 %v708_v19, %v692_v18  ;;  %v724_v30 = vld [vmem:[#allocation4 + $0x700] sm:$0xff]  ;;  %v521_v38 = vld [vmem:[#allocation4 + $0xa8] sm:$0xff]  ;;  %v507_v39 = vld [vmem:[#allocation4 + $0x38] sm:$0xff]  ;;  %820 = vmatprep.mubr.f32.mxu1 %v5664_v43 }
  0x69   :  { %v740_v31 = vld [vmem:[#allocation4 + $0x780] sm:$0xff]  ;;  %v523_v41 = vld [vmem:[#allocation4 + $0xb8] sm:$0xff]  ;;  %v570_v10 = vld [vmem:[#allocation4 + $0x230] sm:$0xff] }
  0x6a   :  { %4616 = vmatpush3.bf16.msra.mxu0 %v4615_v48  ;;  %v4647_v33 = vpack.c.bf16 %v740_v31, %v724_v30  ;;  %v4713_v42 = vpack.c.bf16 %v523_v41, %v507_v39  ;;  %v571_v3 = vld [vmem:[#allocation4 + $0x238] sm:$0xff]  ;;  %v586_v11 = vld [vmem:[#allocation4 + $0x2b0] sm:$0xff]  ;;  %v600_v18 = vld [vmem:[#allocation4 + $0x320] sm:$0xff] }
  0x6b   :  { %4650 = vmatprep.subr.bf16.mxu0 %v4649_v4  ;;  %v4637_v4 = vpack.c.bf16 %v677_v2, %v661_v1  ;;  %v569_v1 = vld [vmem:[#allocation4 + $0x228] sm:$0xff]  ;;  %v619_v15 = vld [vmem:[#allocation4 + $0x3b8] sm:$0xff]  ;;  %v4723_v17 = vpack.c.bf16 %v586_v11, %v570_v10  ;;  %v616_v19 = vld [vmem:[#allocation4 + $0x3a0] sm:$0xff] }
  0x6c   :  { %v585_v2 = vld [vmem:[#allocation4 + $0x2a8] sm:$0xff]  ;;  %v635_v26 = vld [vmem:[#allocation4 + $0x438] sm:$0xff]  ;;  %v632_v30 = vld [vmem:[#allocation4 + $0x420] sm:$0xff] }
  0x6d   :  { %216 = vmatmul.mubr.f32.vlgmr.msra.gmra.mrb[0].mxu0 %v108_v49  ;;  %v649_v25 = vld [vmem:[#allocation4 + $0x4a8] sm:$0xff]  ;;  %v648_v31 = vld [vmem:[#allocation4 + $0x4a0] sm:$0xff]  ;;  %v683_v39 = vld [vmem:[#allocation4 + $0x5b8] sm:$0xff] }
  0x6e   :  { %220 = vmatprep.mubr.f32.mxu0 %v111_v50  ;;  %4652 = vmatpush1.bf16.msra.mxu0 %v4651_v9  ;;  %v4639_v9 = vpack.c.bf16 %v676_v7, %v660_v6  ;;  %v568_v7 = vld [vmem:[#allocation4 + $0x220] sm:$0xff]  ;;  %v746_v10 = vld [vmem:[#allocation4 + $0x7b0] sm:$0xff]  ;;  %v509_v11 = vld [vmem:[#allocation4 + $0x48] sm:$0xff] }
  0x6f   :  { %4654 = vmatprep.subr.bf16.mxu0 %v4653_v14  ;;  %v709_v14 = vld [vmem:[#allocation4 + $0x688] sm:$0xff] }
  0x70   :  { %v4641_v16 = vpack.c.bf16 %v709_v14, %v693_v13  ;;  %v617_v13 = vld [vmem:[#allocation4 + $0x3a8] sm:$0xff]  ;;  %v603_v14 = vld [vmem:[#allocation4 + $0x338] sm:$0xff] }
  0x71   :  { %221 = vmatmul.mubr.f32.gmra.mrb[2].mxu0 %v110_v51 }
  0x72   :  { %4656 = vmatpush1.bf16.msra.mxu0 %v4655_v22  ;;  %v694_v22 = vld [vmem:[#allocation4 + $0x610] sm:$0xff]  ;;  %891 = vmatprep.mubr.f32.mxu0 %v5664_v43 }
  0x73   :  { %4658 = vmatprep.subr.bf16.mxu0 %v4657_v27  ;;  %v4675_v24 = vpack.c.bf16 %v710_v23, %v694_v22  ;;  %v727_v27 = vld [vmem:[#allocation4 + $0x718] sm:$0xff]  ;;  %v602_v22 = vld [vmem:[#allocation4 + $0x330] sm:$0xff] }
  0x74   :  { %v4677_v32 = vpack.c.bf16 %v743_v29, %v727_v27  ;;  %v618_v23 = vld [vmem:[#allocation4 + $0x3b0] sm:$0xff]  ;;  %v651_v27 = vld [vmem:[#allocation4 + $0x4b8] sm:$0xff] }
  0x75   :  { %v4727_v29 = vpack.c.bf16 %v618_v23, %v602_v22  ;;  %v526_v22 = vld [vmem:[#allocation4 + $0xd0] sm:$0xff]  ;;  %v541_v23 = vld [vmem:[#allocation4 + $0x148] sm:$0xff] }
  0x76   :  { %4660 = vmatpush1.bf16.msra.mxu0 %v4659_v35  ;;  %v742_v35 = vld [vmem:[#allocation4 + $0x790] sm:$0xff] }
  0x77   :  { %4662 = vmatprep.subr.bf16.mxu0 %v4661_v40  ;;  %v4679_v36 = vpack.c.bf16 %v742_v35, %v726_v34  ;;  %v4681_v40 = vpack.c.bf16 %v521_v38, %v505_v37  ;;  %v634_v34 = vld [vmem:[#allocation4 + $0x430] sm:$0xff]  ;;  %v681_v37 = vld [vmem:[#allocation4 + $0x5a8] sm:$0xff]  ;;  %v667_v38 = vld [vmem:[#allocation4 + $0x538] sm:$0xff] }
  0x78   :  { %v650_v35 = vld [vmem:[#allocation4 + $0x4b0] sm:$0xff] }
  0x79   :  { %v4731_v41 = vpack.c.bf16 %v650_v35, %v634_v34  ;;  %v558_v34 = vld [vmem:[#allocation4 + $0x1d0] sm:$0xff]  ;;  %v573_v35 = vld [vmem:[#allocation4 + $0x248] sm:$0xff] }
  0x7a   :  { %4664 = vmatpush1.bf16.msra.mxu0 %v4663_v44 }
 0x140   :  { %v4091_v52 = vpop.f32.mrb[0].mxu0 }
 0x141   :  { %v4092_v53 = vpop.f32.mrb[1].mxu0 }
 0x142   :  { %v4093_v55 = vadd.f32 %v4092_v53, %v4091_v52  ;;  %v629_v53 = vld [vmem:[#allocation4 + $0x408] sm:$0xff] }
 0x144   :  { %v4094_v56 = vpop.f32.mrb[2].mxu0  ;;  %v5924_v57 = vadd.f32 %v4093_v55, %v4034_v54  ;;  %v631_v55 = vld [vmem:[#allocation4 + $0x418] sm:$0xff] }
 0x145   :  { %v4095_v58 = vpop.f32.mrb[3].mxu0 }
 0x146   :  { %v4096_v59 = vadd.f32 %v4095_v58, %v4094_v56  ;;  %226 = vmax.xlane.f32.xlu1 %v5924_v57  ;;  %v628_v58 = vld [vmem:[#allocation4 + $0x400] sm:$0xff] }
 0x148   :  { %v5927_v60 = vadd.f32 %v4096_v59, %v4034_v54  ;;  %v645_v54 = vld [vmem:[#allocation4 + $0x488] sm:$0xff]  ;;  %v644_v59 = vld [vmem:[#allocation4 + $0x480] sm:$0xff] }
 0x149   :  { %v4633_v56 = vpack.c.bf16 %v645_v54, %v629_v53  ;;  %v4635_v62 = vpack.c.bf16 %v644_v59, %v628_v58  ;;  %v539_v53 = vld [vmem:[#allocation4 + $0x138] sm:$0xff]  ;;  %v536_v58 = vld [vmem:[#allocation4 + $0x120] sm:$0xff] }
 0x14a   :  { %228 = vmax.xlane.f32.xlu0 %v5927_v60  ;;  %v555_v54 = vld [vmem:[#allocation4 + $0x1b8] sm:$0xff]  ;;  %v552_v59 = vld [vmem:[#allocation4 + $0x1a0] sm:$0xff] }
 0x14b   :  { %4634 = vmatprep.subr.bf16.mxu1 %v4633_v56  ;;  %v4687_v5 = vpack.c.bf16 %v552_v59, %v536_v58  ;;  %v712_v58 = vld [vmem:[#allocation4 + $0x6a0] sm:$0xff] }
 0x14c   :  { %4636 = vmatpush1.bf16.msra.mxu1 %v4635_v62 }
 0x14d   :  { %4638 = vmatprep.subr.bf16.mxu1 %v4637_v4  ;;  %v587_v4 = vld [vmem:[#allocation4 + $0x2b8] sm:$0xff] }
 0x150   :  { %4640 = vmatpush1.bf16.msra.mxu1 %v4639_v9  ;;  %v4721_v9 = vpack.c.bf16 %v587_v4, %v571_v3  ;;  %v747_v3 = vld [vmem:[#allocation4 + $0x7b8] sm:$0xff] }
 0x151   :  { %4642 = vmatprep.subr.bf16.mxu1 %v4641_v16 }
 0x154   :  { %4644 = vmatpush1.bf16.msra.mxu1 %v4643_v21  ;;  %v4725_v21 = vpack.c.bf16 %v619_v15, %v603_v14  ;;  %v527_v14 = vld [vmem:[#allocation4 + $0xd8] sm:$0xff] }
 0x155   :  { %4646 = vmatprep.subr.bf16.mxu1 %v4645_v28  ;;  %v4695_v28 = vpack.c.bf16 %v616_v19, %v600_v18  ;;  %v524_v18 = vld [vmem:[#allocation4 + $0xc0] sm:$0xff] }
 0x158   :  { %4648 = vmatpush1.bf16.msra.mxu1 %v4647_v33  ;;  %v4729_v33 = vpack.c.bf16 %v651_v27, %v635_v26  ;;  %v559_v26 = vld [vmem:[#allocation4 + $0x1d8] sm:$0xff] }
 0x159   :  { %4682 = vmatprep.subr.bf16.mxu1 %v4681_v40  ;;  %v4699_v40 = vpack.c.bf16 %v648_v31, %v632_v30  ;;  %v556_v30 = vld [vmem:[#allocation4 + $0x1c0] sm:$0xff] }
 0x1d3   :  { %v227_v45 = vpop.xlane.xlu1 %226 }
 0x1d4   :  { %v230_v46 = vsub.f32 %v5924_v57, %v227_v45  ;;  %v647_v57 = vld [vmem:[#allocation4 + $0x498] sm:$0xff]  ;;  %v504_v45 = vld [vmem:[#allocation4 + $0x20] sm:$0xff] }
 0x1d5   :  { %v4665_v61 = vpack.c.bf16 %v647_v57, %v631_v55 }
 0x1d6   :  { %v232_v47 = vmul.f32 1.442695, %v230_v46  ;;  %v520_v46 = vld [vmem:[#allocation4 + $0xa0] sm:$0xff] }
 0x1d7   :  { %v229_v48 = vpop.xlane.xlu0 %228  ;;  %4666 = vmatprep.subr.bf16.mxu0 %v4665_v61  ;;  %v4683_v56 = vpack.c.bf16 %v520_v46, %v504_v45  ;;  %v4733_v46 = vpack.c.bf16 %v683_v39, %v667_v38  ;;  %v591_v38 = vld [vmem:[#allocation4 + $0x2d8] sm:$0xff] }
 0x1d8   :  { %5507 = vpow2.f32 %v232_v47  ;;  %v231_v49 = vsub.f32 %v5927_v60, %v229_v48  ;;  %v630_v60 = vld [vmem:[#allocation4 + $0x410] sm:$0xff] }
 0x1d9   :  { %v4667_v0 = vpack.c.bf16 %v646_v63, %v630_v60  ;;  %v506_v47 = vld [vmem:[#allocation4 + $0x30] sm:$0xff]  ;;  %v4717_v60 = vpack.c.bf16 %v555_v54, %v539_v53  ;;  %v699_v53 = vld [vmem:[#allocation4 + $0x638] sm:$0xff] }
 0x1da   :  { %v234_v50 = vmul.f32 1.442695, %v231_v49  ;;  %v522_v48 = vld [vmem:[#allocation4 + $0xb0] sm:$0xff]  ;;  %v537_v49 = vld [vmem:[#allocation4 + $0x128] sm:$0xff]  ;;  %v715_v54 = vld [vmem:[#allocation4 + $0x6b8] sm:$0xff] }
 0x1db   :  { %4668 = vmatpush1.bf16.msra.mxu0 %v4667_v0  ;;  %v4715_v57 = vpack.c.bf16 %v522_v48, %v506_v47  ;;  %v538_v63 = vld [vmem:[#allocation4 + $0x130] sm:$0xff] }
 0x1dc   :  { %5509 = vpow2.f32 %v234_v50  ;;  %4670 = vmatprep.subr.bf16.mxu0 %v4669_v8  ;;  %v553_v50 = vld [vmem:[#allocation4 + $0x1a8] sm:$0xff]  ;;  %v554_v0 = vld [vmem:[#allocation4 + $0x1b0] sm:$0xff]  ;;  %v584_v8 = vld [vmem:[#allocation4 + $0x2a0] sm:$0xff] }
 0x1dd   :  { %v4685_v62 = vpack.c.bf16 %v553_v50, %v537_v49  ;;  %v4719_v6 = vpack.c.bf16 %v554_v0, %v538_v63  ;;  %v4691_v16 = vpack.c.bf16 %v584_v8, %v568_v7  ;;  %v666_v47 = vld [vmem:[#allocation4 + $0x530] sm:$0xff]  ;;  %v697_v49 = vld [vmem:[#allocation4 + $0x628] sm:$0xff]  ;;  %v744_v7 = vld [vmem:[#allocation4 + $0x7a0] sm:$0xff] }
 0x1de   :  { %v682_v48 = vld [vmem:[#allocation4 + $0x5b0] sm:$0xff]  ;;  %v713_v50 = vld [vmem:[#allocation4 + $0x6a8] sm:$0xff] }
 0x1df   :  { %4672 = vmatpush1.bf16.msra.mxu0 %v4671_v12  ;;  %v601_v12 = vld [vmem:[#allocation4 + $0x328] sm:$0xff]  ;;  %v4705_v59 = vpack.c.bf16 %v713_v50, %v697_v49  ;;  %v714_v63 = vld [vmem:[#allocation4 + $0x6b0] sm:$0xff]  ;;  %v607_v50 = vld [vmem:[#allocation4 + $0x358] sm:$0xff] }
 0x1e0   :  { %4674 = vmatprep.subr.bf16.mxu0 %v4673_v20  ;;  %v4693_v20 = vpack.c.bf16 %v617_v13, %v601_v12  ;;  %v729_v0 = vld [vmem:[#allocation4 + $0x728] sm:$0xff]  ;;  %v511_v13 = vld [vmem:[#allocation4 + $0x58] sm:$0xff] }
 0x1e1   :  { %v525_v12 = vld [vmem:[#allocation4 + $0xc8] sm:$0xff] }
 0x1e2   :  { %v5932_v51 = vpop.eup %5507  ;;  %v4745_v19 = vpack.c.bf16 %v525_v12, %v509_v11  ;;  %v621_v49 = vld [vmem:[#allocation4 + $0x3c8] sm:$0xff]  ;;  %v671_v12 = vld [vmem:[#allocation4 + $0x558] sm:$0xff] }
 0x1e3   :  { %236 = vadd.xlane.f32.xlu1 %v5932_v51  ;;  %4676 = vmatpush1.bf16.msra.mxu0 %v4675_v24  ;;  %v633_v24 = vld [vmem:[#allocation4 + $0x428] sm:$0xff] }
 0x1e4   :  { %4678 = vmatprep.subr.bf16.mxu0 %v4677_v32  ;;  %v4697_v32 = vpack.c.bf16 %v649_v25, %v633_v24  ;;  %v557_v24 = vld [vmem:[#allocation4 + $0x1c8] sm:$0xff]  ;;  %v543_v25 = vld [vmem:[#allocation4 + $0x158] sm:$0xff] }
 0x1e5   :  { %v4749_v31 = vpack.c.bf16 %v557_v24, %v541_v23  ;;  %v685_v11 = vld [vmem:[#allocation4 + $0x5c8] sm:$0xff]  ;;  %v703_v24 = vld [vmem:[#allocation4 + $0x658] sm:$0xff] }
 0x1e6   :  { %v5935_v52 = vpop.eup %5509  ;;  %v717_v23 = vld [vmem:[#allocation4 + $0x6c8] sm:$0xff] }
 0x1e7   :  { %238 = vadd.xlane.f32.xlu0 %v5935_v52  ;;  %4680 = vmatpush1.bf16.msra.mxu0 %v4679_v36  ;;  %v665_v36 = vld [vmem:[#allocation4 + $0x528] sm:$0xff] }
 0x1e8   :  { %4714 = vmatprep.subr.bf16.mxu0 %v4713_v42  ;;  %v664_v42 = vld [vmem:[#allocation4 + $0x520] sm:$0xff]  ;;  %v4701_v45 = vpack.c.bf16 %v681_v37, %v665_v36  ;;  %v589_v36 = vld [vmem:[#allocation4 + $0x2c8] sm:$0xff]  ;;  %v575_v37 = vld [vmem:[#allocation4 + $0x258] sm:$0xff] }
 0x274   :  { %v239_v44 = vpop.xlane.xlu0 %238 }
 0x275   :  { %5511 = vrcp.f32 %v239_v44  ;;  %v680_v44 = vld [vmem:[#allocation4 + $0x5a0] sm:$0xff] }
 0x27f   :  { %v5512_v55 = vpop.eup %5511 }
 0x280   :  { %v5941_v61 = vmul.f32 %v5512_v55, %v5935_v52  ;;  %v4689_v52 = vpack.c.bf16 %v585_v2, %v569_v1  ;;  %v4703_v55 = vpack.c.bf16 %v680_v44, %v664_v42  ;;  %v745_v1 = vld [vmem:[#allocation4 + $0x7a8] sm:$0xff]  ;;  %v731_v2 = vld [vmem:[#allocation4 + $0x738] sm:$0xff]  ;;  %v588_v42 = vld [vmem:[#allocation4 + $0x2c0] sm:$0xff]  ;;  %v4753_v44 = vpack.c.bf16 %v589_v36, %v573_v35 }
 0x281   :  { %v4709_v8 = vpack.c.bf16 %v745_v1, %v729_v0  ;;  %v653_v0 = vld [vmem:[#allocation4 + $0x4c8] sm:$0xff]  ;;  %v639_v1 = vld [vmem:[#allocation4 + $0x458] sm:$0xff] }
 0x282   :  { %821 = vmatmul.mubr.f32.vlgmr.msra.gmra.mrb[0].mxu1 %v5941_v61  ;;  %892 = vmatmul.mubr.f32.vlgmr.msra.gmra.mrb[4].mxu0 %v5941_v61  ;;  %v749_v35 = vld [vmem:[#allocation4 + $0x7c8] sm:$0xff]  ;;  %v735_v36 = vld [vmem:[#allocation4 + $0x758] sm:$0xff] }
 0x283   :  { %4684 = vmatpush1.bf16.msra.mxu1 %v4683_v56  ;;  %4716 = vmatpush1.bf16.msra.mxu0 %v4715_v57  ;;  %v4735_v56 = vpack.c.bf16 %v682_v48, %v666_v47  ;;  %v696_v57 = vld [vmem:[#allocation4 + $0x620] sm:$0xff]  ;;  %v590_v47 = vld [vmem:[#allocation4 + $0x2d0] sm:$0xff]  ;;  %v605_v48 = vld [vmem:[#allocation4 + $0x348] sm:$0xff] }
 0x284   :  { %4686 = vmatprep.subr.bf16.mxu1 %v4685_v62  ;;  %4718 = vmatprep.subr.bf16.mxu0 %v4717_v60  ;;  %v4737_v62 = vpack.c.bf16 %v715_v54, %v699_v53  ;;  %v698_v60 = vld [vmem:[#allocation4 + $0x630] sm:$0xff]  ;;  %v4707_v4 = vpack.c.bf16 %v712_v58, %v696_v57  ;;  %v623_v53 = vld [vmem:[#allocation4 + $0x3d8] sm:$0xff]  ;;  %v620_v57 = vld [vmem:[#allocation4 + $0x3c0] sm:$0xff]  ;;  %v4757_v58 = vpack.c.bf16 %v621_v49, %v605_v48 }
 0x285   :  { %962 = vmatprep.mubr.f32.mxu1 %v5664_v43  ;;  %1033 = vmatprep.mubr.f32.mxu0 %v5664_v43  ;;  %v529_v48 = vld [vmem:[#allocation4 + $0xe8] sm:$0xff]  ;;  %v515_v49 = vld [vmem:[#allocation4 + $0x78] sm:$0xff] }
 0x287   :  { %4688 = vmatpush1.bf16.msra.mxu1 %v4687_v5  ;;  %4720 = vmatpush1.bf16.msra.mxu0 %v4719_v6  ;;  %v4739_v5 = vpack.c.bf16 %v714_v63, %v698_v60  ;;  %v728_v6 = vld [vmem:[#allocation4 + $0x720] sm:$0xff]  ;;  %v622_v60 = vld [vmem:[#allocation4 + $0x3d0] sm:$0xff]  ;;  %v637_v63 = vld [vmem:[#allocation4 + $0x448] sm:$0xff] }
 0x288   :  { %4690 = vmatprep.subr.bf16.mxu1 %v4689_v52  ;;  %4722 = vmatprep.subr.bf16.mxu0 %v4721_v9  ;;  %v4741_v52 = vpack.c.bf16 %v747_v3, %v731_v2  ;;  %v730_v9 = vld [vmem:[#allocation4 + $0x730] sm:$0xff]  ;;  %v4711_v15 = vpack.c.bf16 %v744_v7, %v728_v6  ;;  %v655_v2 = vld [vmem:[#allocation4 + $0x4d8] sm:$0xff]  ;;  %v652_v6 = vld [vmem:[#allocation4 + $0x4c0] sm:$0xff]  ;;  %v4761_v7 = vpack.c.bf16 %v653_v0, %v637_v63 }
 0x289   :  { %v561_v63 = vld [vmem:[#allocation4 + $0x1e8] sm:$0xff]  ;;  %v547_v0 = vld [vmem:[#allocation4 + $0x178] sm:$0xff] }
 0x28b   :  { %4692 = vmatpush1.bf16.msra.mxu1 %v4691_v16  ;;  %4724 = vmatpush1.bf16.msra.mxu0 %v4723_v17  ;;  %v4743_v16 = vpack.c.bf16 %v746_v10, %v730_v9  ;;  %v508_v17 = vld [vmem:[#allocation4 + $0x40] sm:$0xff]  ;;  %v654_v9 = vld [vmem:[#allocation4 + $0x4d0] sm:$0xff]  ;;  %v669_v10 = vld [vmem:[#allocation4 + $0x548] sm:$0xff] }
 0x28c   :  { %4694 = vmatprep.subr.bf16.mxu1 %v4693_v20  ;;  %4726 = vmatprep.subr.bf16.mxu0 %v4725_v21  ;;  %v4777_v20 = vpack.c.bf16 %v527_v14, %v511_v13  ;;  %v510_v21 = vld [vmem:[#allocation4 + $0x50] sm:$0xff]  ;;  %v4747_v27 = vpack.c.bf16 %v524_v18, %v508_v17  ;;  %v687_v13 = vld [vmem:[#allocation4 + $0x5d8] sm:$0xff]  ;;  %v684_v17 = vld [vmem:[#allocation4 + $0x5c0] sm:$0xff]  ;;  %v4765_v18 = vpack.c.bf16 %v685_v11, %v669_v10 }
 0x28d   :  { %v593_v10 = vld [vmem:[#allocation4 + $0x2e8] sm:$0xff]  ;;  %v579_v11 = vld [vmem:[#allocation4 + $0x278] sm:$0xff] }
 0x28f   :  { %4696 = vmatpush1.bf16.msra.mxu1 %v4695_v28  ;;  %4728 = vmatpush1.bf16.msra.mxu0 %v4727_v29  ;;  %v4779_v28 = vpack.c.bf16 %v526_v22, %v510_v21  ;;  %v540_v29 = vld [vmem:[#allocation4 + $0x140] sm:$0xff]  ;;  %v686_v21 = vld [vmem:[#allocation4 + $0x5d0] sm:$0xff]  ;;  %v701_v22 = vld [vmem:[#allocation4 + $0x648] sm:$0xff] }
 0x290   :  { %4698 = vmatprep.subr.bf16.mxu1 %v4697_v32  ;;  %4730 = vmatprep.subr.bf16.mxu0 %v4729_v33  ;;  %v4781_v32 = vpack.c.bf16 %v559_v26, %v543_v25  ;;  %v542_v33 = vld [vmem:[#allocation4 + $0x150] sm:$0xff]  ;;  %v4751_v39 = vpack.c.bf16 %v556_v30, %v540_v29  ;;  %v719_v25 = vld [vmem:[#allocation4 + $0x6d8] sm:$0xff]  ;;  %v716_v29 = vld [vmem:[#allocation4 + $0x6c0] sm:$0xff]  ;;  %v4769_v30 = vpack.c.bf16 %v717_v23, %v701_v22 }
 0x291   :  { %v625_v22 = vld [vmem:[#allocation4 + $0x3e8] sm:$0xff]  ;;  %v611_v23 = vld [vmem:[#allocation4 + $0x378] sm:$0xff] }
 0x293   :  { %4700 = vmatpush1.bf16.msra.mxu1 %v4699_v40  ;;  %4732 = vmatpush1.bf16.msra.mxu0 %v4731_v41  ;;  %v4783_v40 = vpack.c.bf16 %v558_v34, %v542_v33  ;;  %v572_v41 = vld [vmem:[#allocation4 + $0x240] sm:$0xff]  ;;  %v718_v33 = vld [vmem:[#allocation4 + $0x6d0] sm:$0xff]  ;;  %v733_v34 = vld [vmem:[#allocation4 + $0x748] sm:$0xff] }
 0x294   :  { %4702 = vmatprep.subr.bf16.mxu1 %v4701_v45  ;;  %4734 = vmatprep.subr.bf16.mxu0 %v4733_v46  ;;  %v4785_v45 = vpack.c.bf16 %v591_v38, %v575_v37  ;;  %v574_v46 = vld [vmem:[#allocation4 + $0x250] sm:$0xff]  ;;  %v4755_v54 = vpack.c.bf16 %v588_v42, %v572_v41  ;;  %v751_v37 = vld [vmem:[#allocation4 + $0x7d8] sm:$0xff]  ;;  %v748_v41 = vld [vmem:[#allocation4 + $0x7c0] sm:$0xff]  ;;  %v4773_v42 = vpack.c.bf16 %v749_v35, %v733_v34 }
 0x295   :  { %v657_v34 = vld [vmem:[#allocation4 + $0x4e8] sm:$0xff]  ;;  %v643_v35 = vld [vmem:[#allocation4 + $0x478] sm:$0xff] }
 0x297   :  { %4704 = vmatpush1.bf16.msra.mxu1 %v4703_v55  ;;  %4736 = vmatpush1.bf16.msra.mxu0 %v4735_v56  ;;  %v4787_v55 = vpack.c.bf16 %v590_v47, %v574_v46  ;;  %v604_v56 = vld [vmem:[#allocation4 + $0x340] sm:$0xff]  ;;  %v750_v46 = vld [vmem:[#allocation4 + $0x7d0] sm:$0xff]  ;;  %v513_v47 = vld [vmem:[#allocation4 + $0x68] sm:$0xff] }
 0x298   :  { %4706 = vmatprep.subr.bf16.mxu1 %v4705_v59  ;;  %4738 = vmatprep.subr.bf16.mxu0 %v4737_v62  ;;  %v4789_v59 = vpack.c.bf16 %v623_v53, %v607_v50  ;;  %v606_v62 = vld [vmem:[#allocation4 + $0x350] sm:$0xff]  ;;  %v4759_v3 = vpack.c.bf16 %v620_v57, %v604_v56  ;;  %v531_v50 = vld [vmem:[#allocation4 + $0xf8] sm:$0xff]  ;;  %v528_v56 = vld [vmem:[#allocation4 + $0xe0] sm:$0xff]  ;;  %v4809_v57 = vpack.c.bf16 %v529_v48, %v513_v47 }
 0x299   :  { %v689_v47 = vld [vmem:[#allocation4 + $0x5e8] sm:$0xff]  ;;  %v675_v48 = vld [vmem:[#allocation4 + $0x578] sm:$0xff] }
 0x29b   :  { %4708 = vmatpush1.bf16.msra.mxu1 %v4707_v4  ;;  %4740 = vmatpush1.bf16.msra.mxu0 %v4739_v5  ;;  %v4791_v4 = vpack.c.bf16 %v622_v60, %v606_v62  ;;  %v636_v5 = vld [vmem:[#allocation4 + $0x440] sm:$0xff]  ;;  %v530_v62 = vld [vmem:[#allocation4 + $0xf0] sm:$0xff]  ;;  %v545_v60 = vld [vmem:[#allocation4 + $0x168] sm:$0xff] }
 0x29c   :  { %4710 = vmatprep.subr.bf16.mxu1 %v4709_v8  ;;  %4742 = vmatprep.subr.bf16.mxu0 %v4741_v52  ;;  %v4793_v8 = vpack.c.bf16 %v655_v2, %v639_v1  ;;  %v638_v52 = vld [vmem:[#allocation4 + $0x450] sm:$0xff]  ;;  %v4763_v14 = vpack.c.bf16 %v652_v6, %v636_v5  ;;  %v563_v1 = vld [vmem:[#allocation4 + $0x1f8] sm:$0xff]  ;;  %v560_v5 = vld [vmem:[#allocation4 + $0x1e0] sm:$0xff]  ;;  %v4813_v6 = vpack.c.bf16 %v561_v63, %v545_v60 }
 0x29d   :  { %v721_v60 = vld [vmem:[#allocation4 + $0x6e8] sm:$0xff]  ;;  %v707_v63 = vld [vmem:[#allocation4 + $0x678] sm:$0xff] }
 0x29f   :  { %4712 = vmatpush1.bf16.msra.mxu1 %v4711_v15  ;;  %4744 = vmatpush1.bf16.msra.mxu0 %v4743_v16  ;;  %v4795_v15 = vpack.c.bf16 %v654_v9, %v638_v52  ;;  %v668_v16 = vld [vmem:[#allocation4 + $0x540] sm:$0xff]  ;;  %v562_v52 = vld [vmem:[#allocation4 + $0x1f0] sm:$0xff]  ;;  %v577_v9 = vld [vmem:[#allocation4 + $0x268] sm:$0xff] }
 0x2a0   :  { %4746 = vmatprep.subr.bf16.mxu1 %v4745_v19  ;;  %4778 = vmatprep.subr.bf16.mxu0 %v4777_v20  ;;  %v4797_v19 = vpack.c.bf16 %v687_v13, %v671_v12  ;;  %v670_v20 = vld [vmem:[#allocation4 + $0x550] sm:$0xff]  ;;  %v4767_v26 = vpack.c.bf16 %v684_v17, %v668_v16  ;;  %v595_v12 = vld [vmem:[#allocation4 + $0x2f8] sm:$0xff]  ;;  %v592_v16 = vld [vmem:[#allocation4 + $0x2e0] sm:$0xff]  ;;  %v4817_v17 = vpack.c.bf16 %v593_v10, %v577_v9 }
 0x2a1   :  { %v753_v9 = vld [vmem:[#allocation4 + $0x7e8] sm:$0xff]  ;;  %v739_v10 = vld [vmem:[#allocation4 + $0x778] sm:$0xff] }
 0x2a2   :  { %963 = vmatmul.mubr.f32.vlgmr.msra.gmra.mrb[2].mxu1 %v5941_v61  ;;  %1034 = vmatmul.mubr.f32.vlgmr.msra.gmra.mrb[6].mxu0 %v5941_v61 }
 0x2a3   :  { %4748 = vmatpush1.bf16.msra.mxu1 %v4747_v27  ;;  %4780 = vmatpush1.bf16.msra.mxu0 %v4779_v28  ;;  %v4799_v27 = vpack.c.bf16 %v686_v21, %v670_v20  ;;  %v700_v28 = vld [vmem:[#allocation4 + $0x640] sm:$0xff]  ;;  %v594_v20 = vld [vmem:[#allocation4 + $0x2f0] sm:$0xff]  ;;  %v609_v21 = vld [vmem:[#allocation4 + $0x368] sm:$0xff] }
 0x2a4   :  { %4750 = vmatprep.subr.bf16.mxu1 %v4749_v31  ;;  %4782 = vmatprep.subr.bf16.mxu0 %v4781_v32  ;;  %v4801_v31 = vpack.c.bf16 %v719_v25, %v703_v24  ;;  %v702_v32 = vld [vmem:[#allocation4 + $0x650] sm:$0xff]  ;;  %v4771_v38 = vpack.c.bf16 %v716_v29, %v700_v28  ;;  %v627_v24 = vld [vmem:[#allocation4 + $0x3f8] sm:$0xff]  ;;  %v624_v28 = vld [vmem:[#allocation4 + $0x3e0] sm:$0xff]  ;;  %v4821_v29 = vpack.c.bf16 %v625_v22, %v609_v21 }
 0x2a5   :  { %1104 = vmatprep.mubr.f32.mxu1 %v5664_v43  ;;  %1175 = vmatprep.mubr.f32.mxu0 %v5664_v43  ;;  %v261_v21 = vld [vmem:[#allocation2 + $0x88] sm:$0xff]  ;;  %v247_v22 = vld [vmem:[#allocation2 + $0x18] sm:$0xff] }
 0x2a7   :  { %4752 = vmatpush1.bf16.msra.mxu1 %v4751_v39  ;;  %4784 = vmatpush1.bf16.msra.mxu0 %v4783_v40  ;;  %v4803_v39 = vpack.c.bf16 %v718_v33, %v702_v32  ;;  %v732_v40 = vld [vmem:[#allocation4 + $0x740] sm:$0xff]  ;;  %v626_v32 = vld [vmem:[#allocation4 + $0x3f0] sm:$0xff]  ;;  %v641_v33 = vld [vmem:[#allocation4 + $0x468] sm:$0xff] }
 0x2a8   :  { %4754 = vmatprep.subr.bf16.mxu1 %v4753_v44  ;;  %4786 = vmatprep.subr.bf16.mxu0 %v4785_v45  ;;  %v4805_v44 = vpack.c.bf16 %v751_v37, %v735_v36  ;;  %v734_v45 = vld [vmem:[#allocation4 + $0x750] sm:$0xff]  ;;  %v4775_v53 = vpack.c.bf16 %v748_v41, %v732_v40  ;;  %v659_v36 = vld [vmem:[#allocation4 + $0x4f8] sm:$0xff]  ;;  %v656_v40 = vld [vmem:[#allocation4 + $0x4e0] sm:$0xff]  ;;  %v4825_v41 = vpack.c.bf16 %v657_v34, %v641_v33 }
 0x2a9   :  { %v293_v33 = vld [vmem:[#allocation2 + $0x188] sm:$0xff]  ;;  %v279_v34 = vld [vmem:[#allocation2 + $0x118] sm:$0xff] }
 0x2ab   :  { %4756 = vmatpush1.bf16.msra.mxu1 %v4755_v54  ;;  %4788 = vmatpush1.bf16.msra.mxu0 %v4787_v55  ;;  %v4807_v54 = vpack.c.bf16 %v750_v46, %v734_v45  ;;  %v512_v55 = vld [vmem:[#allocation4 + $0x60] sm:$0xff]  ;;  %v658_v45 = vld [vmem:[#allocation4 + $0x4f0] sm:$0xff]  ;;  %v673_v46 = vld [vmem:[#allocation4 + $0x568] sm:$0xff] }
 0x2ac   :  { %4758 = vmatprep.subr.bf16.mxu1 %v4757_v58  ;;  %4790 = vmatprep.subr.bf16.mxu0 %v4789_v59  ;;  %v4841_v58 = vpack.c.bf16 %v531_v50, %v515_v49  ;;  %v514_v59 = vld [vmem:[#allocation4 + $0x70] sm:$0xff]  ;;  %v4811_v2 = vpack.c.bf16 %v528_v56, %v512_v55  ;;  %v691_v49 = vld [vmem:[#allocation4 + $0x5f8] sm:$0xff]  ;;  %v688_v55 = vld [vmem:[#allocation4 + $0x5e0] sm:$0xff]  ;;  %v4829_v56 = vpack.c.bf16 %v689_v47, %v673_v46 }
 0x2ad   :  { %v325_v46 = vld [vmem:[#allocation2 + $0x288] sm:$0xff]  ;;  %v311_v47 = vld [vmem:[#allocation2 + $0x218] sm:$0xff] }
 0x2af   :  { %4760 = vmatpush1.bf16.msra.mxu1 %v4759_v3  ;;  %4792 = vmatpush1.bf16.msra.mxu0 %v4791_v4  ;;  %v4843_v3 = vpack.c.bf16 %v530_v62, %v514_v59  ;;  %v544_v4 = vld [vmem:[#allocation4 + $0x160] sm:$0xff]  ;;  %v690_v59 = vld [vmem:[#allocation4 + $0x5f0] sm:$0xff]  ;;  %v705_v62 = vld [vmem:[#allocation4 + $0x668] sm:$0xff] }
 0x2b0   :  { %4762 = vmatprep.subr.bf16.mxu1 %v4761_v7  ;;  %4794 = vmatprep.subr.bf16.mxu0 %v4793_v8  ;;  %v4845_v7 = vpack.c.bf16 %v563_v1, %v547_v0  ;;  %v546_v8 = vld [vmem:[#allocation4 + $0x170] sm:$0xff]  ;;  %v4815_v13 = vpack.c.bf16 %v560_v5, %v544_v4  ;;  %v723_v0 = vld [vmem:[#allocation4 + $0x6f8] sm:$0xff]  ;;  %v720_v4 = vld [vmem:[#allocation4 + $0x6e0] sm:$0xff]  ;;  %v4833_v5 = vpack.c.bf16 %v721_v60, %v705_v62 }
 0x2b1   :  { %v357_v62 = vld [vmem:[#allocation2 + $0x388] sm:$0xff]  ;;  %v343_v60 = vld [vmem:[#allocation2 + $0x318] sm:$0xff] }
 0x2b3   :  { %4764 = vmatpush1.bf16.msra.mxu1 %v4763_v14  ;;  %4796 = vmatpush1.bf16.msra.mxu0 %v4795_v15  ;;  %v4847_v14 = vpack.c.bf16 %v562_v52, %v546_v8  ;;  %v576_v15 = vld [vmem:[#allocation4 + $0x260] sm:$0xff]  ;;  %v722_v8 = vld [vmem:[#allocation4 + $0x6f0] sm:$0xff]  ;;  %v737_v52 = vld [vmem:[#allocation4 + $0x768] sm:$0xff] }
 0x2b4   :  { %4766 = vmatprep.subr.bf16.mxu1 %v4765_v18  ;;  %4798 = vmatprep.subr.bf16.mxu0 %v4797_v19  ;;  %v4849_v18 = vpack.c.bf16 %v595_v12, %v579_v11  ;;  %v578_v19 = vld [vmem:[#allocation4 + $0x270] sm:$0xff]  ;;  %v4819_v25 = vpack.c.bf16 %v592_v16, %v576_v15  ;;  %v755_v11 = vld [vmem:[#allocation4 + $0x7f8] sm:$0xff]  ;;  %v752_v15 = vld [vmem:[#allocation4 + $0x7e0] sm:$0xff]  ;;  %v4837_v16 = vpack.c.bf16 %v753_v9, %v737_v52 }
 0x2b5   :  { %v375_v52 = vld [vmem:[#allocation2 + $0x418] sm:$0xff] }
 0x2b6   :  { %v391_v9 = vld [vmem:[#allocation2 + $0x498] sm:$0xff] }
 0x2b7   :  { %4768 = vmatpush1.bf16.msra.mxu1 %v4767_v26  ;;  %4800 = vmatpush1.bf16.msra.mxu0 %v4799_v27  ;;  %v4851_v26 = vpack.c.bf16 %v594_v20, %v578_v19  ;;  %v608_v27 = vld [vmem:[#allocation4 + $0x360] sm:$0xff]  ;;  %v754_v19 = vld [vmem:[#allocation4 + $0x7f0] sm:$0xff]  ;;  %v245_v20 = vld [vmem:[#allocation2 + $0x8] sm:$0xff] }
 0x2b8   :  { %4770 = vmatprep.subr.bf16.mxu1 %v4769_v30  ;;  %4802 = vmatprep.subr.bf16.mxu0 %v4801_v31  ;;  %v4853_v30 = vpack.c.bf16 %v627_v24, %v611_v23  ;;  %v610_v31 = vld [vmem:[#allocation4 + $0x370] sm:$0xff]  ;;  %v4823_v37 = vpack.c.bf16 %v624_v28, %v608_v27  ;;  %v263_v23 = vld [vmem:[#allocation2 + $0x98] sm:$0xff]  ;;  %v260_v27 = vld [vmem:[#allocation2 + $0x80] sm:$0xff]  ;;  %v4873_v28 = vpack.c.bf16 %v261_v21, %v245_v20 }
 0x2b9   :  { %v407_v20 = vld [vmem:[#allocation2 + $0x518] sm:$0xff] }
 0x2ba   :  { %v423_v21 = vld [vmem:[#allocation2 + $0x598] sm:$0xff] }
 0x2bb   :  { %4772 = vmatpush1.bf16.msra.mxu1 %v4771_v38  ;;  %4804 = vmatpush1.bf16.msra.mxu0 %v4803_v39  ;;  %v4855_v38 = vpack.c.bf16 %v626_v32, %v610_v31  ;;  %v640_v39 = vld [vmem:[#allocation4 + $0x460] sm:$0xff]  ;;  %v262_v31 = vld [vmem:[#allocation2 + $0x90] sm:$0xff]  ;;  %v277_v32 = vld [vmem:[#allocation2 + $0x108] sm:$0xff] }
 0x2bc   :  { %4774 = vmatprep.subr.bf16.mxu1 %v4773_v42  ;;  %4806 = vmatprep.subr.bf16.mxu0 %v4805_v44  ;;  %v4857_v42 = vpack.c.bf16 %v659_v36, %v643_v35  ;;  %v642_v44 = vld [vmem:[#allocation4 + $0x470] sm:$0xff]  ;;  %v4827_v50 = vpack.c.bf16 %v656_v40, %v640_v39  ;;  %v295_v35 = vld [vmem:[#allocation2 + $0x198] sm:$0xff]  ;;  %v292_v39 = vld [vmem:[#allocation2 + $0x180] sm:$0xff]  ;;  %v4877_v40 = vpack.c.bf16 %v293_v33, %v277_v32 }
 0x2bd   :  { %v453_v32 = vld [vmem:[#allocation2 + $0x688] sm:$0xff]  ;;  %v439_v33 = vld [vmem:[#allocation2 + $0x618] sm:$0xff] }
 0x2bf   :  { %4776 = vmatpush1.bf16.msra.mxu1 %v4775_v53  ;;  %4808 = vmatpush1.bf16.msra.mxu0 %v4807_v54  ;;  %v4859_v53 = vpack.c.bf16 %v658_v45, %v642_v44  ;;  %v672_v54 = vld [vmem:[#allocation4 + $0x560] sm:$0xff]  ;;  %v294_v44 = vld [vmem:[#allocation2 + $0x190] sm:$0xff]  ;;  %v309_v45 = vld [vmem:[#allocation2 + $0x208] sm:$0xff] }
 0x2c0   :  { %4810 = vmatprep.subr.bf16.mxu1 %v4809_v57  ;;  %4842 = vmatprep.subr.bf16.mxu0 %v4841_v58  ;;  %v4861_v57 = vpack.c.bf16 %v691_v49, %v675_v48  ;;  %v674_v58 = vld [vmem:[#allocation4 + $0x570] sm:$0xff]  ;;  %v4831_v1 = vpack.c.bf16 %v688_v55, %v672_v54  ;;  %v327_v48 = vld [vmem:[#allocation2 + $0x298] sm:$0xff]  ;;  %v324_v54 = vld [vmem:[#allocation2 + $0x280] sm:$0xff]  ;;  %v4881_v55 = vpack.c.bf16 %v325_v46, %v309_v45 }
 0x2c1   :  { %v485_v45 = vld [vmem:[#allocation2 + $0x788] sm:$0xff]  ;;  %v471_v46 = vld [vmem:[#allocation2 + $0x718] sm:$0xff] }
 0x2c2   :  { %1105 = vmatmul.mubr.f32.vlgmr.msra.gmra.mrb[4].mxu1 %v5941_v61  ;;  %1176 = vmatmul.mubr.f32.vlgmr.msra.gmra.mrb[8].mxu0 %v5941_v61 }
 0x2c3   :  { %4812 = vmatpush1.bf16.msra.mxu1 %v4811_v2  ;;  %4844 = vmatpush1.bf16.msra.mxu0 %v4843_v3  ;;  %v4863_v2 = vpack.c.bf16 %v690_v59, %v674_v58  ;;  %v704_v3 = vld [vmem:[#allocation4 + $0x660] sm:$0xff]  ;;  %v326_v58 = vld [vmem:[#allocation2 + $0x290] sm:$0xff]  ;;  %v341_v59 = vld [vmem:[#allocation2 + $0x308] sm:$0xff] }
 0x2c4   :  { %4814 = vmatprep.subr.bf16.mxu1 %v4813_v6  ;;  %4846 = vmatprep.subr.bf16.mxu0 %v4845_v7  ;;  %v4865_v6 = vpack.c.bf16 %v723_v0, %v707_v63  ;;  %v706_v7 = vld [vmem:[#allocation4 + $0x670] sm:$0xff]  ;;  %v4835_v12 = vpack.c.bf16 %v720_v4, %v704_v3  ;;  %v359_v63 = vld [vmem:[#allocation2 + $0x398] sm:$0xff]  ;;  %v4885_v3 = vpack.c.bf16 %v357_v62, %v341_v59  ;;  %v265_v59 = vld [vmem:[#allocation2 + $0xa8] sm:$0xff] }
 0x2c5   :  { %1246 = vmatprep.mubr.f32.mxu1 %v5664_v43  ;;  %1317 = vmatprep.mubr.f32.mxu0 %v5664_v43  ;;  %v4917_v4 = vpack.c.bf16 %v359_v63, %v343_v60  ;;  %v251_v62 = vld [vmem:[#allocation2 + $0x38] sm:$0xff] }
 0x2c6   :  { %v267_v60 = vld [vmem:[#allocation2 + $0xb8] sm:$0xff] }
 0x2c7   :  { %4816 = vmatpush1.bf16.msra.mxu1 %v4815_v13  ;;  %4848 = vmatpush1.bf16.msra.mxu0 %v4847_v14  ;;  %v4867_v13 = vpack.c.bf16 %v722_v8, %v706_v7  ;;  %v736_v14 = vld [vmem:[#allocation4 + $0x760] sm:$0xff]  ;;  %v373_v7 = vld [vmem:[#allocation2 + $0x408] sm:$0xff] }
 0x2c8   :  { %4818 = vmatprep.subr.bf16.mxu1 %v4817_v17  ;;  %4850 = vmatprep.subr.bf16.mxu0 %v4849_v18  ;;  %v4869_v17 = vpack.c.bf16 %v755_v11, %v739_v10  ;;  %v738_v18 = vld [vmem:[#allocation4 + $0x770] sm:$0xff]  ;;  %v4839_v24 = vpack.c.bf16 %v752_v15, %v736_v14  ;;  %v389_v8 = vld [vmem:[#allocation2 + $0x488] sm:$0xff]  ;;  %v4921_v15 = vpack.c.bf16 %v391_v9, %v375_v52  ;;  %v283_v52 = vld [vmem:[#allocation2 + $0x138] sm:$0xff] }
 0x2c9   :  { %v4889_v14 = vpack.c.bf16 %v389_v8, %v373_v7  ;;  %v297_v8 = vld [vmem:[#allocation2 + $0x1a8] sm:$0xff]  ;;  %v299_v9 = vld [vmem:[#allocation2 + $0x1b8] sm:$0xff] }
 0x2cb   :  { %4820 = vmatpush1.bf16.msra.mxu1 %v4819_v25  ;;  %4852 = vmatpush1.bf16.msra.mxu0 %v4851_v26  ;;  %v4871_v25 = vpack.c.bf16 %v754_v19, %v738_v18  ;;  %v244_v26 = vld [vmem:[#allocation2] sm:$0xff]  ;;  %v405_v18 = vld [vmem:[#allocation2 + $0x508] sm:$0xff] }
 0x2cc   :  { %4822 = vmatprep.subr.bf16.mxu1 %v4821_v29  ;;  %4854 = vmatprep.subr.bf16.mxu0 %v4853_v30  ;;  %v4905_v29 = vpack.c.bf16 %v263_v23, %v247_v22  ;;  %v246_v30 = vld [vmem:[#allocation2 + $0x10] sm:$0xff]  ;;  %v4875_v36 = vpack.c.bf16 %v260_v27, %v244_v26  ;;  %v421_v19 = vld [vmem:[#allocation2 + $0x588] sm:$0xff]  ;;  %v237_v26 = vpop.xlane.xlu1 %236 }
 0x2cd   :  { %v4893_v27 = vpack.c.bf16 %v421_v19, %v405_v18  ;;  %5513 = vrcp.f32 %v237_v26  ;;  %v298_v18 = vld [vmem:[#allocation2 + $0x1b0] sm:$0xff]  ;;  %v313_v19 = vld [vmem:[#allocation2 + $0x228] sm:$0xff] }
 0x2cf   :  { %4824 = vmatpush1.bf16.msra.mxu1 %v4823_v37  ;;  %4856 = vmatpush1.bf16.msra.mxu0 %v4855_v38  ;;  %v4907_v37 = vpack.c.bf16 %v262_v31, %v246_v30  ;;  %v276_v38 = vld [vmem:[#allocation2 + $0x100] sm:$0xff]  ;;  %v422_v30 = vld [vmem:[#allocation2 + $0x590] sm:$0xff]  ;;  %v437_v31 = vld [vmem:[#allocation2 + $0x608] sm:$0xff] }
 0x2d0   :  { %4826 = vmatprep.subr.bf16.mxu1 %v4825_v41  ;;  %4858 = vmatprep.subr.bf16.mxu0 %v4857_v42  ;;  %v4909_v41 = vpack.c.bf16 %v295_v35, %v279_v34  ;;  %v278_v42 = vld [vmem:[#allocation2 + $0x110] sm:$0xff]  ;;  %v4879_v49 = vpack.c.bf16 %v292_v39, %v276_v38  ;;  %v455_v34 = vld [vmem:[#allocation2 + $0x698] sm:$0xff]  ;;  %v452_v38 = vld [vmem:[#allocation2 + $0x680] sm:$0xff]  ;;  %v4897_v39 = vpack.c.bf16 %v453_v32, %v437_v31 }
 0x2d1   :  { %v361_v31 = vld [vmem:[#allocation2 + $0x3a8] sm:$0xff]  ;;  %v347_v32 = vld [vmem:[#allocation2 + $0x338] sm:$0xff] }
 0x2d3   :  { %4828 = vmatpush1.bf16.msra.mxu1 %v4827_v50  ;;  %4860 = vmatpush1.bf16.msra.mxu0 %v4859_v53  ;;  %v4911_v50 = vpack.c.bf16 %v294_v44, %v278_v42  ;;  %v308_v53 = vld [vmem:[#allocation2 + $0x200] sm:$0xff]  ;;  %v454_v42 = vld [vmem:[#allocation2 + $0x690] sm:$0xff]  ;;  %v469_v44 = vld [vmem:[#allocation2 + $0x708] sm:$0xff] }
 0x2d4   :  { %4830 = vmatprep.subr.bf16.mxu1 %v4829_v56  ;;  %4862 = vmatprep.subr.bf16.mxu0 %v4861_v57  ;;  %v4913_v56 = vpack.c.bf16 %v327_v48, %v311_v47  ;;  %v310_v57 = vld [vmem:[#allocation2 + $0x210] sm:$0xff]  ;;  %v487_v47 = vld [vmem:[#allocation2 + $0x798] sm:$0xff] }
 0x2d5   :  { %v4915_v0 = vpack.c.bf16 %v326_v58, %v310_v57  ;;  %v486_v57 = vld [vmem:[#allocation2 + $0x790] sm:$0xff]  ;;  %v249_v58 = vld [vmem:[#allocation2 + $0x28] sm:$0xff] }
 0x2d7   :  { %4832 = vmatpush1.bf16.msra.mxu1 %v4831_v1  ;;  %4864 = vmatpush1.bf16.msra.mxu0 %v4863_v2  ;;  %v340_v1 = vld [vmem:[#allocation2 + $0x300] sm:$0xff]  ;;  %v5514_v7 = vpop.eup %5513 }
 0x2d8   :  { %4834 = vmatprep.subr.bf16.mxu1 %v4833_v5  ;;  %4866 = vmatprep.subr.bf16.mxu0 %v4865_v6  ;;  %v356_v2 = vld [vmem:[#allocation2 + $0x380] sm:$0xff]  ;;  %v342_v5 = vld [vmem:[#allocation2 + $0x310] sm:$0xff] }
 0x2d9   :  { %v358_v6 = vld [vmem:[#allocation2 + $0x390] sm:$0xff]  ;;  %v4887_v10 = vpack.c.bf16 %v356_v2, %v340_v1  ;;  %v264_v1 = vld [vmem:[#allocation2 + $0xa0] sm:$0xff]  ;;  %v4937_v2 = vpack.c.bf16 %v265_v59, %v249_v58  ;;  %v425_v58 = vld [vmem:[#allocation2 + $0x5a8] sm:$0xff] }
 0x2da   :  { %v4919_v11 = vpack.c.bf16 %v358_v6, %v342_v5  ;;  %v266_v5 = vld [vmem:[#allocation2 + $0xb0] sm:$0xff]  ;;  %v281_v6 = vld [vmem:[#allocation2 + $0x128] sm:$0xff]  ;;  %v411_v59 = vld [vmem:[#allocation2 + $0x538] sm:$0xff] }
 0x2db   :  { %4836 = vmatpush1.bf16.msra.mxu1 %v4835_v12  ;;  %4868 = vmatpush1.bf16.msra.mxu0 %v4867_v13  ;;  %v372_v12 = vld [vmem:[#allocation2 + $0x400] sm:$0xff] }
 0x2dc   :  { %4838 = vmatprep.subr.bf16.mxu1 %v4837_v16  ;;  %4870 = vmatprep.subr.bf16.mxu0 %v4869_v17  ;;  %v388_v13 = vld [vmem:[#allocation2 + $0x480] sm:$0xff]  ;;  %v374_v16 = vld [vmem:[#allocation2 + $0x410] sm:$0xff] }
 0x2dd   :  { %v390_v17 = vld [vmem:[#allocation2 + $0x490] sm:$0xff]  ;;  %v4891_v22 = vpack.c.bf16 %v388_v13, %v372_v12  ;;  %v280_v12 = vld [vmem:[#allocation2 + $0x120] sm:$0xff] }
 0x2de   :  { %v4923_v23 = vpack.c.bf16 %v390_v17, %v374_v16  ;;  %v296_v13 = vld [vmem:[#allocation2 + $0x1a0] sm:$0xff]  ;;  %v4973_v16 = vpack.c.bf16 %v299_v9, %v283_v52  ;;  %v282_v17 = vld [vmem:[#allocation2 + $0x130] sm:$0xff] }
 0x2df   :  { %4840 = vmatpush1.bf16.msra.mxu1 %v4839_v24  ;;  %4872 = vmatpush1.bf16.msra.mxu0 %v4871_v25  ;;  %v404_v24 = vld [vmem:[#allocation2 + $0x500] sm:$0xff] }
 0x2e0   :  { %4874 = vmatprep.subr.bf16.mxu1 %v4873_v28  ;;  %4906 = vmatprep.subr.bf16.mxu0 %v4905_v29  ;;  %v420_v25 = vld [vmem:[#allocation2 + $0x580] sm:$0xff]  ;;  %v4925_v28 = vpack.c.bf16 %v423_v21, %v407_v20  ;;  %v406_v29 = vld [vmem:[#allocation2 + $0x510] sm:$0xff]  ;;  %v329_v20 = vld [vmem:[#allocation2 + $0x2a8] sm:$0xff] }
 0x2e1   :  { %v4895_v35 = vpack.c.bf16 %v420_v25, %v404_v24  ;;  %v315_v21 = vld [vmem:[#allocation2 + $0x238] sm:$0xff]  ;;  %v4975_v24 = vpack.c.bf16 %v298_v18, %v282_v17  ;;  %v328_v25 = vld [vmem:[#allocation2 + $0x2a0] sm:$0xff]  ;;  %v4945_v26 = vpack.c.bf16 %v329_v20, %v313_v19  ;;  %v473_v17 = vld [vmem:[#allocation2 + $0x728] sm:$0xff] }
 0x2e2   :  { %1247 = vmatmul.mubr.f32.vlgmr.msra.gmra.mrb[6].mxu1 %v5941_v61  ;;  %1318 = vmatmul.mubr.f32.vlgmr.msra.gmra.mrb[10].mxu0 %v5941_v61  ;;  %v4883_v61 = vpack.c.bf16 %v324_v54, %v308_v53  ;;  %v484_v53 = vld [vmem:[#allocation2 + $0x780] sm:$0xff]  ;;  %v4901_v54 = vpack.c.bf16 %v485_v45, %v469_v44  ;;  %v393_v44 = vld [vmem:[#allocation2 + $0x4a8] sm:$0xff]  ;;  %v379_v45 = vld [vmem:[#allocation2 + $0x438] sm:$0xff] }
 0x2e3   :  { %4876 = vmatpush1.bf16.msra.mxu1 %v4875_v36  ;;  %4908 = vmatpush1.bf16.msra.mxu0 %v4907_v37  ;;  %v4927_v36 = vpack.c.bf16 %v422_v30, %v406_v29  ;;  %v436_v37 = vld [vmem:[#allocation2 + $0x600] sm:$0xff]  ;;  %v330_v29 = vld [vmem:[#allocation2 + $0x2b0] sm:$0xff]  ;;  %v345_v30 = vld [vmem:[#allocation2 + $0x328] sm:$0xff] }
 0x2e4   :  { %4878 = vmatprep.subr.bf16.mxu1 %v4877_v40  ;;  %4910 = vmatprep.subr.bf16.mxu0 %v4909_v41  ;;  %v4929_v40 = vpack.c.bf16 %v455_v34, %v439_v33  ;;  %v438_v41 = vld [vmem:[#allocation2 + $0x610] sm:$0xff]  ;;  %v4899_v48 = vpack.c.bf16 %v452_v38, %v436_v37  ;;  %v363_v33 = vld [vmem:[#allocation2 + $0x3b8] sm:$0xff]  ;;  %v360_v37 = vld [vmem:[#allocation2 + $0x3a0] sm:$0xff]  ;;  %v4949_v38 = vpack.c.bf16 %v361_v31, %v345_v30 }
 0x2e5   :  { %1388 = vmatprep.mubr.f32.mxu1 %v5664_v43  ;;  %1459 = vmatprep.mubr.f32.mxu0 %v5664_v43  ;;  %v489_v18 = vld [vmem:[#allocation2 + $0x7a8] sm:$0xff]  ;;  %v475_v19 = vld [vmem:[#allocation2 + $0x738] sm:$0xff] }
 0x2e6   :  { %v491_v20 = vld [vmem:[#allocation2 + $0x7b8] sm:$0xff] }
 0x2e7   :  { %4880 = vmatpush1.bf16.msra.mxu1 %v4879_v49  ;;  %4912 = vmatpush1.bf16.msra.mxu0 %v4911_v50  ;;  %v4931_v49 = vpack.c.bf16 %v454_v42, %v438_v41  ;;  %v468_v50 = vld [vmem:[#allocation2 + $0x700] sm:$0xff]  ;;  %v362_v41 = vld [vmem:[#allocation2 + $0x3b0] sm:$0xff]  ;;  %v377_v42 = vld [vmem:[#allocation2 + $0x428] sm:$0xff] }
 0x2e8   :  { %4882 = vmatprep.subr.bf16.mxu1 %v4881_v55  ;;  %4914 = vmatprep.subr.bf16.mxu0 %v4913_v56  ;;  %v4933_v55 = vpack.c.bf16 %v487_v47, %v471_v46  ;;  %v470_v56 = vld [vmem:[#allocation2 + $0x710] sm:$0xff]  ;;  %v4903_v63 = vpack.c.bf16 %v484_v53, %v468_v50  ;;  %v395_v46 = vld [vmem:[#allocation2 + $0x4b8] sm:$0xff]  ;;  %v392_v50 = vld [vmem:[#allocation2 + $0x4a0] sm:$0xff]  ;;  %v4953_v53 = vpack.c.bf16 %v393_v44, %v377_v42 }
 0x2e9   :  { %v255_v30 = vld [vmem:[#allocation2 + $0x58] sm:$0xff] }
 0x2ea   :  { %v271_v31 = vld [vmem:[#allocation2 + $0xd8] sm:$0xff] }
 0x2eb   :  { %4884 = vmatpush1.bf16.msra.mxu1 %v4883_v61  ;;  %4916 = vmatpush1.bf16.msra.mxu0 %v4915_v0  ;;  %v4935_v61 = vpack.c.bf16 %v486_v57, %v470_v56  ;;  %v248_v0 = vld [vmem:[#allocation2 + $0x20] sm:$0xff]  ;;  %v394_v56 = vld [vmem:[#allocation2 + $0x4b0] sm:$0xff]  ;;  %v409_v57 = vld [vmem:[#allocation2 + $0x528] sm:$0xff] }
 0x2ec   :  { %4886 = vmatprep.subr.bf16.mxu1 %v4885_v3  ;;  %4918 = vmatprep.subr.bf16.mxu0 %v4917_v4  ;;  %v4969_v3 = vpack.c.bf16 %v267_v60, %v251_v62  ;;  %v250_v4 = vld [vmem:[#allocation2 + $0x30] sm:$0xff]  ;;  %v427_v62 = vld [vmem:[#allocation2 + $0x5b8] sm:$0xff] }
 0x2ed   :  { %v287_v42 = vld [vmem:[#allocation2 + $0x158] sm:$0xff] }
 0x2ee   :  { %v303_v44 = vld [vmem:[#allocation2 + $0x1d8] sm:$0xff] }
 0x2ef   :  { %4888 = vmatpush1.bf16.msra.mxu1 %v4887_v10  ;;  %4920 = vmatpush1.bf16.msra.mxu0 %v4919_v11  ;;  %v4939_v10 = vpack.c.bf16 %v264_v1, %v248_v0  ;;  %v4971_v11 = vpack.c.bf16 %v266_v5, %v250_v4  ;;  %v424_v0 = vld [vmem:[#allocation2 + $0x5a0] sm:$0xff]  ;;  %v4957_v1 = vpack.c.bf16 %v425_v58, %v409_v57  ;;  %v426_v4 = vld [vmem:[#allocation2 + $0x5b0] sm:$0xff]  ;;  %v441_v5 = vld [vmem:[#allocation2 + $0x628] sm:$0xff] }
 0x2f0   :  { %4890 = vmatprep.subr.bf16.mxu1 %v4889_v14  ;;  %4922 = vmatprep.subr.bf16.mxu0 %v4921_v15  ;;  %v5960_v14 = vmul.f32 %v5514_v7, %v5932_v51  ;;  %v4941_v15 = vpack.c.bf16 %v297_v8, %v281_v6  ;;  %v312_v51 = vld [vmem:[#allocation2 + $0x220] sm:$0xff]  ;;  %v457_v6 = vld [vmem:[#allocation2 + $0x6a8] sm:$0xff]  ;;  %v443_v7 = vld [vmem:[#allocation2 + $0x638] sm:$0xff] }
 0x2f1   :  { %v4947_v34 = vpack.c.bf16 %v328_v25, %v312_v51  ;;  %v459_v8 = vld [vmem:[#allocation2 + $0x6b8] sm:$0xff]  ;;  %v4965_v51 = vpack.c.bf16 %v489_v18, %v473_v17  ;;  %v4997_v25 = vpack.c.bf16 %v491_v20, %v475_v19 }
 0x2f2   :  { %v319_v57 = vld [vmem:[#allocation2 + $0x258] sm:$0xff] }
 0x2f3   :  { %4892 = vmatpush1.bf16.msra.mxu1 %v4891_v22  ;;  %4924 = vmatpush1.bf16.msra.mxu0 %v4923_v23  ;;  %v331_v22 = vld [vmem:[#allocation2 + $0x2b8] sm:$0xff]  ;;  %v4943_v23 = vpack.c.bf16 %v296_v13, %v280_v12  ;;  %v4961_v12 = vpack.c.bf16 %v457_v6, %v441_v5  ;;  %v4993_v13 = vpack.c.bf16 %v459_v8, %v443_v7 }
 0x2f4   :  { %4894 = vmatprep.subr.bf16.mxu1 %v4893_v27  ;;  %4926 = vmatprep.subr.bf16.mxu0 %v4925_v28  ;;  %v4977_v27 = vpack.c.bf16 %v331_v22, %v315_v21  ;;  %v314_v28 = vld [vmem:[#allocation2 + $0x230] sm:$0xff]  ;;  %v335_v58 = vld [vmem:[#allocation2 + $0x2d8] sm:$0xff] }
 0x2f5   :  { %v351_v5 = vld [vmem:[#allocation2 + $0x358] sm:$0xff] }
 0x2f6   :  { %v367_v6 = vld [vmem:[#allocation2 + $0x3d8] sm:$0xff] }
 0x2f7   :  { %4896 = vmatpush1.bf16.msra.mxu1 %v4895_v35  ;;  %4928 = vmatpush1.bf16.msra.mxu0 %v4927_v36  ;;  %v4979_v35 = vpack.c.bf16 %v330_v29, %v314_v28  ;;  %v344_v36 = vld [vmem:[#allocation2 + $0x320] sm:$0xff]  ;;  %v253_v28 = vld [vmem:[#allocation2 + $0x48] sm:$0xff]  ;;  %v383_v17 = vld [vmem:[#allocation2 + $0x458] sm:$0xff] }
 0x2f8   :  { %4898 = vmatprep.subr.bf16.mxu1 %v4897_v39  ;;  %4930 = vmatprep.subr.bf16.mxu0 %v4929_v40  ;;  %v4981_v39 = vpack.c.bf16 %v363_v33, %v347_v32  ;;  %v346_v40 = vld [vmem:[#allocation2 + $0x330] sm:$0xff]  ;;  %v4951_v47 = vpack.c.bf16 %v360_v37, %v344_v36  ;;  %v269_v29 = vld [vmem:[#allocation2 + $0xc8] sm:$0xff]  ;;  %v5033_v37 = vpack.c.bf16 %v271_v31, %v255_v30  ;;  %v399_v18 = vld [vmem:[#allocation2 + $0x4d8] sm:$0xff] }
 0x2f9   :  { %v5001_v36 = vpack.c.bf16 %v269_v29, %v253_v28  ;;  %v415_v28 = vld [vmem:[#allocation2 + $0x558] sm:$0xff] }
 0x2fa   :  { %v431_v29 = vld [vmem:[#allocation2 + $0x5d8] sm:$0xff] }
 0x2fb   :  { %4900 = vmatpush1.bf16.msra.mxu1 %v4899_v48  ;;  %4932 = vmatpush1.bf16.msra.mxu0 %v4931_v49  ;;  %v4983_v48 = vpack.c.bf16 %v362_v41, %v346_v40  ;;  %v376_v49 = vld [vmem:[#allocation2 + $0x420] sm:$0xff]  ;;  %v285_v40 = vld [vmem:[#allocation2 + $0x148] sm:$0xff] }
 0x2fc   :  { %4902 = vmatprep.subr.bf16.mxu1 %v4901_v54  ;;  %4934 = vmatprep.subr.bf16.mxu0 %v4933_v55  ;;  %v4985_v54 = vpack.c.bf16 %v395_v46, %v379_v45  ;;  %v378_v55 = vld [vmem:[#allocation2 + $0x430] sm:$0xff]  ;;  %v4955_v60 = vpack.c.bf16 %v392_v50, %v376_v49  ;;  %v301_v41 = vld [vmem:[#allocation2 + $0x1c8] sm:$0xff]  ;;  %v5037_v50 = vpack.c.bf16 %v303_v44, %v287_v42 }
 0x2fd   :  { %v5005_v49 = vpack.c.bf16 %v301_v41, %v285_v40  ;;  %v447_v40 = vld [vmem:[#allocation2 + $0x658] sm:$0xff] }
 0x2fe   :  { %v463_v41 = vld [vmem:[#allocation2 + $0x6d8] sm:$0xff] }
 0x2ff   :  { %4904 = vmatpush1.bf16.msra.mxu1 %v4903_v63  ;;  %4936 = vmatpush1.bf16.msra.mxu0 %v4935_v61  ;;  %v4987_v63 = vpack.c.bf16 %v394_v56, %v378_v55  ;;  %v408_v61 = vld [vmem:[#allocation2 + $0x520] sm:$0xff]  ;;  %v317_v55 = vld [vmem:[#allocation2 + $0x248] sm:$0xff] }
 0x300   :  { %4938 = vmatprep.subr.bf16.mxu1 %v4937_v2  ;;  %4970 = vmatprep.subr.bf16.mxu0 %v4969_v3  ;;  %v4989_v2 = vpack.c.bf16 %v427_v62, %v411_v59  ;;  %v410_v3 = vld [vmem:[#allocation2 + $0x530] sm:$0xff]  ;;  %v4959_v52 = vpack.c.bf16 %v424_v0, %v408_v61  ;;  %v333_v56 = vld [vmem:[#allocation2 + $0x2c8] sm:$0xff]  ;;  %v5041_v0 = vpack.c.bf16 %v335_v58, %v319_v57 }
 0x301   :  { %v4991_v9 = vpack.c.bf16 %v426_v4, %v410_v3  ;;  %v5009_v61 = vpack.c.bf16 %v333_v56, %v317_v55  ;;  %v349_v3 = vld [vmem:[#allocation2 + $0x348] sm:$0xff]  ;;  %v479_v55 = vld [vmem:[#allocation2 + $0x758] sm:$0xff] }
 0x302   :  { %1389 = vmatmul.mubr.f32.vlgmr.msra.gmra.mrb[0].mxu1 %v5960_v14  ;;  %1460 = vmatmul.mubr.f32.vlgmr.msra.gmra.mrb[4].mxu0 %v5960_v14  ;;  %v365_v4 = vld [vmem:[#allocation2 + $0x3c8] sm:$0xff]  ;;  %v495_v56 = vld [vmem:[#allocation2 + $0x7d8] sm:$0xff] }
 0x303   :  { %4940 = vmatpush1.bf16.msra.mxu1 %v4939_v10  ;;  %4972 = vmatpush1.bf16.msra.mxu0 %v4971_v11  ;;  %v440_v10 = vld [vmem:[#allocation2 + $0x620] sm:$0xff] }
 0x304   :  { %4942 = vmatprep.subr.bf16.mxu1 %v4941_v15  ;;  %4974 = vmatprep.subr.bf16.mxu0 %v4973_v16  ;;  %v456_v11 = vld [vmem:[#allocation2 + $0x6a0] sm:$0xff]  ;;  %v442_v15 = vld [vmem:[#allocation2 + $0x630] sm:$0xff] }
 0x305   :  { %1530 = vmatprep.mubr.f32.mxu1 %v5664_v43  ;;  %1601 = vmatprep.mubr.f32.mxu0 %v5664_v43  ;;  %v458_v16 = vld [vmem:[#allocation2 + $0x6b0] sm:$0xff]  ;;  %v4963_v21 = vpack.c.bf16 %v456_v11, %v440_v10  ;;  %v5013_v10 = vpack.c.bf16 %v365_v4, %v349_v3  ;;  %v5045_v11 = vpack.c.bf16 %v367_v6, %v351_v5  ;;  %v259_v3 = vld [vmem:[#allocation2 + $0x78] sm:$0xff] }
 0x306   :  { %v4995_v22 = vpack.c.bf16 %v458_v16, %v442_v15  ;;  %v381_v15 = vld [vmem:[#allocation2 + $0x448] sm:$0xff]  ;;  %v275_v4 = vld [vmem:[#allocation2 + $0xf8] sm:$0xff] }
 0x307   :  { %4944 = vmatpush1.bf16.msra.mxu1 %v4943_v23  ;;  %4976 = vmatpush1.bf16.msra.mxu0 %v4975_v24  ;;  %v472_v23 = vld [vmem:[#allocation2 + $0x720] sm:$0xff]  ;;  %v397_v16 = vld [vmem:[#allocation2 + $0x4c8] sm:$0xff] }
 0x308   :  { %4946 = vmatprep.subr.bf16.mxu1 %v4945_v26  ;;  %4978 = vmatprep.subr.bf16.mxu0 %v4977_v27  ;;  %v488_v24 = vld [vmem:[#allocation2 + $0x7a0] sm:$0xff]  ;;  %v474_v26 = vld [vmem:[#allocation2 + $0x730] sm:$0xff] }
 0x309   :  { %v490_v27 = vld [vmem:[#allocation2 + $0x7b0] sm:$0xff]  ;;  %v4967_v32 = vpack.c.bf16 %v488_v24, %v472_v23  ;;  %v5017_v23 = vpack.c.bf16 %v397_v16, %v381_v15  ;;  %v5049_v24 = vpack.c.bf16 %v399_v18, %v383_v17  ;;  %v291_v15 = vld [vmem:[#allocation2 + $0x178] sm:$0xff] }
 0x30a   :  { %v4999_v33 = vpack.c.bf16 %v490_v27, %v474_v26  ;;  %v413_v26 = vld [vmem:[#allocation2 + $0x548] sm:$0xff]  ;;  %v307_v16 = vld [vmem:[#allocation2 + $0x1f8] sm:$0xff] }
 0x30b   :  { %4948 = vmatpush1.bf16.msra.mxu1 %v4947_v34  ;;  %4980 = vmatpush1.bf16.msra.mxu0 %v4979_v35  ;;  %v252_v34 = vld [vmem:[#allocation2 + $0x40] sm:$0xff]  ;;  %v429_v27 = vld [vmem:[#allocation2 + $0x5c8] sm:$0xff] }
 0x30c   :  { %4950 = vmatprep.subr.bf16.mxu1 %v4949_v38  ;;  %4982 = vmatprep.subr.bf16.mxu0 %v4981_v39  ;;  %v268_v35 = vld [vmem:[#allocation2 + $0xc0] sm:$0xff]  ;;  %v254_v38 = vld [vmem:[#allocation2 + $0x50] sm:$0xff] }
 0x30d   :  { %v270_v39 = vld [vmem:[#allocation2 + $0xd0] sm:$0xff]  ;;  %v5003_v45 = vpack.c.bf16 %v268_v35, %v252_v34  ;;  %v5021_v34 = vpack.c.bf16 %v429_v27, %v413_v26  ;;  %v5053_v35 = vpack.c.bf16 %v431_v29, %v415_v28  ;;  %v323_v26 = vld [vmem:[#allocation2 + $0x278] sm:$0xff] }
 0x30e   :  { %v5035_v46 = vpack.c.bf16 %v270_v39, %v254_v38  ;;  %v445_v38 = vld [vmem:[#allocation2 + $0x648] sm:$0xff]  ;;  %v339_v27 = vld [vmem:[#allocation2 + $0x2f8] sm:$0xff] }
 0x30f   :  { %4952 = vmatpush1.bf16.msra.mxu1 %v4951_v47  ;;  %4984 = vmatpush1.bf16.msra.mxu0 %v4983_v48  ;;  %v284_v47 = vld [vmem:[#allocation2 + $0x140] sm:$0xff]  ;;  %v461_v39 = vld [vmem:[#allocation2 + $0x6c8] sm:$0xff] }
 0x310   :  { %4954 = vmatprep.subr.bf16.mxu1 %v4953_v53  ;;  %4986 = vmatprep.subr.bf16.mxu0 %v4985_v54  ;;  %v300_v48 = vld [vmem:[#allocation2 + $0x1c0] sm:$0xff]  ;;  %v286_v53 = vld [vmem:[#allocation2 + $0x150] sm:$0xff] }
 0x311   :  { %v302_v54 = vld [vmem:[#allocation2 + $0x1d0] sm:$0xff]  ;;  %v5007_v59 = vpack.c.bf16 %v300_v48, %v284_v47  ;;  %v5025_v47 = vpack.c.bf16 %v461_v39, %v445_v38  ;;  %v5057_v48 = vpack.c.bf16 %v463_v41, %v447_v40  ;;  %v355_v38 = vld [vmem:[#allocation2 + $0x378] sm:$0xff] }
 0x312   :  { %v5039_v62 = vpack.c.bf16 %v302_v54, %v286_v53  ;;  %v477_v53 = vld [vmem:[#allocation2 + $0x748] sm:$0xff]  ;;  %v371_v39 = vld [vmem:[#allocation2 + $0x3f8] sm:$0xff] }
 0x313   :  { %4956 = vmatpush1.bf16.msra.mxu1 %v4955_v60  ;;  %4988 = vmatpush1.bf16.msra.mxu0 %v4987_v63  ;;  %v316_v60 = vld [vmem:[#allocation2 + $0x240] sm:$0xff]  ;;  %v493_v54 = vld [vmem:[#allocation2 + $0x7c8] sm:$0xff] }
 0x314   :  { %4958 = vmatprep.subr.bf16.mxu1 %v4957_v1  ;;  %4990 = vmatprep.subr.bf16.mxu0 %v4989_v2  ;;  %v332_v63 = vld [vmem:[#allocation2 + $0x2c0] sm:$0xff]  ;;  %v318_v1 = vld [vmem:[#allocation2 + $0x250] sm:$0xff] }
 0x315   :  { %v334_v2 = vld [vmem:[#allocation2 + $0x2d0] sm:$0xff]  ;;  %v5011_v7 = vpack.c.bf16 %v332_v63, %v316_v60  ;;  %v5029_v60 = vpack.c.bf16 %v493_v54, %v477_v53  ;;  %v5061_v63 = vpack.c.bf16 %v495_v56, %v479_v55  ;;  %v387_v53 = vld [vmem:[#allocation2 + $0x478] sm:$0xff] }
 0x316   :  { %v5043_v8 = vpack.c.bf16 %v334_v2, %v318_v1  ;;  %v257_v1 = vld [vmem:[#allocation2 + $0x68] sm:$0xff]  ;;  %v403_v54 = vld [vmem:[#allocation2 + $0x4f8] sm:$0xff] }
 0x317   :  { %4960 = vmatpush1.bf16.msra.mxu1 %v4959_v52  ;;  %4992 = vmatpush1.bf16.msra.mxu0 %v4991_v9  ;;  %v348_v52 = vld [vmem:[#allocation2 + $0x340] sm:$0xff]  ;;  %v273_v2 = vld [vmem:[#allocation2 + $0xe8] sm:$0xff] }
 0x318   :  { %4962 = vmatprep.subr.bf16.mxu1 %v4961_v12  ;;  %4994 = vmatprep.subr.bf16.mxu0 %v4993_v13  ;;  %v364_v9 = vld [vmem:[#allocation2 + $0x3c0] sm:$0xff]  ;;  %v350_v12 = vld [vmem:[#allocation2 + $0x350] sm:$0xff] }
 0x319   :  { %v366_v13 = vld [vmem:[#allocation2 + $0x3d0] sm:$0xff]  ;;  %v5015_v19 = vpack.c.bf16 %v364_v9, %v348_v52  ;;  %v5065_v52 = vpack.c.bf16 %v273_v2, %v257_v1  ;;  %v5097_v9 = vpack.c.bf16 %v275_v4, %v259_v3  ;;  %v419_v1 = vld [vmem:[#allocation2 + $0x578] sm:$0xff] }
 0x31a   :  { %v5047_v20 = vpack.c.bf16 %v366_v13, %v350_v12  ;;  %v289_v12 = vld [vmem:[#allocation2 + $0x168] sm:$0xff]  ;;  %v435_v2 = vld [vmem:[#allocation2 + $0x5f8] sm:$0xff] }
 0x31b   :  { %4964 = vmatpush1.bf16.msra.mxu1 %v4963_v21  ;;  %4996 = vmatpush1.bf16.msra.mxu0 %v4995_v22  ;;  %v380_v21 = vld [vmem:[#allocation2 + $0x440] sm:$0xff]  ;;  %v305_v13 = vld [vmem:[#allocation2 + $0x1e8] sm:$0xff] }
 0x31c   :  { %4966 = vmatprep.subr.bf16.mxu1 %v4965_v51  ;;  %4998 = vmatprep.subr.bf16.mxu0 %v4997_v25  ;;  %v396_v22 = vld [vmem:[#allocation2 + $0x4c0] sm:$0xff]  ;;  %v382_v51 = vld [vmem:[#allocation2 + $0x450] sm:$0xff] }
 0x31d   :  { %v398_v25 = vld [vmem:[#allocation2 + $0x4d0] sm:$0xff]  ;;  %v5019_v30 = vpack.c.bf16 %v396_v22, %v380_v21  ;;  %v5069_v21 = vpack.c.bf16 %v305_v13, %v289_v12  ;;  %v5101_v22 = vpack.c.bf16 %v307_v16, %v291_v15  ;;  %v451_v12 = vld [vmem:[#allocation2 + $0x678] sm:$0xff] }
 0x31e   :  { %v5051_v31 = vpack.c.bf16 %v398_v25, %v382_v51  ;;  %v321_v51 = vld [vmem:[#allocation2 + $0x268] sm:$0xff]  ;;  %v467_v13 = vld [vmem:[#allocation2 + $0x6f8] sm:$0xff] }
 0x31f   :  { %4968 = vmatpush1.bf16.msra.mxu1 %v4967_v32  ;;  %5000 = vmatpush1.bf16.msra.mxu0 %v4999_v33  ;;  %v412_v32 = vld [vmem:[#allocation2 + $0x540] sm:$0xff]  ;;  %v337_v25 = vld [vmem:[#allocation2 + $0x2e8] sm:$0xff] }
 0x320   :  { %5002 = vmatprep.subr.bf16.mxu1 %v5001_v36  ;;  %5034 = vmatprep.subr.bf16.mxu0 %v5033_v37  ;;  %v428_v33 = vld [vmem:[#allocation2 + $0x5c0] sm:$0xff]  ;;  %v414_v36 = vld [vmem:[#allocation2 + $0x550] sm:$0xff] }
 0x321   :  { %v430_v37 = vld [vmem:[#allocation2 + $0x5d0] sm:$0xff]  ;;  %v5023_v42 = vpack.c.bf16 %v428_v33, %v412_v32  ;;  %v5073_v32 = vpack.c.bf16 %v337_v25, %v321_v51  ;;  %v5105_v33 = vpack.c.bf16 %v339_v27, %v323_v26  ;;  %v483_v51 = vld [vmem:[#allocation2 + $0x778] sm:$0xff] }
 0x322   :  { %1531 = vmatmul.mubr.f32.vlgmr.msra.gmra.mrb[2].mxu1 %v5960_v14  ;;  %1602 = vmatmul.mubr.f32.vlgmr.msra.gmra.mrb[6].mxu0 %v5960_v14  ;;  %v5055_v44 = vpack.c.bf16 %v430_v37, %v414_v36  ;;  %v353_v36 = vld [vmem:[#allocation2 + $0x368] sm:$0xff]  ;;  %v499_v25 = vld [vmem:[#allocation2 + $0x7f8] sm:$0xff] }
 0x323   :  { %5004 = vmatpush1.bf16.msra.mxu1 %v5003_v45  ;;  %5036 = vmatpush1.bf16.msra.mxu0 %v5035_v46  ;;  %v444_v45 = vld [vmem:[#allocation2 + $0x640] sm:$0xff]  ;;  %v369_v37 = vld [vmem:[#allocation2 + $0x3e8] sm:$0xff] }
 0x324   :  { %5006 = vmatprep.subr.bf16.mxu1 %v5005_v49  ;;  %5038 = vmatprep.subr.bf16.mxu0 %v5037_v50  ;;  %v460_v46 = vld [vmem:[#allocation2 + $0x6c0] sm:$0xff]  ;;  %v446_v49 = vld [vmem:[#allocation2 + $0x650] sm:$0xff] }
 0x325   :  { %1672 = vmatprep.mubr.f32.mxu1 %v5664_v43  ;;  %1743 = vmatprep.mubr.f32.mxu0 %v5664_v43  ;;  %v462_v50 = vld [vmem:[#allocation2 + $0x6d0] sm:$0xff]  ;;  %v5027_v57 = vpack.c.bf16 %v460_v46, %v444_v45  ;;  %v5077_v45 = vpack.c.bf16 %v369_v37, %v353_v36  ;;  %v5109_v46 = vpack.c.bf16 %v371_v39, %v355_v38  ;;  %v2529_v36 = vld [vmem:[#allocation6 + $0x80] sm:$0xff]  ;;  %v2530_v37 = vld [vmem:[#allocation6 + $0x88] sm:$0xff] }
 0x326   :  { %v5059_v58 = vpack.c.bf16 %v462_v50, %v446_v49  ;;  %v385_v49 = vld [vmem:[#allocation2 + $0x468] sm:$0xff]  ;;  %v2561_v38 = vld [vmem:[#allocation6 + $0x180] sm:$0xff]  ;;  %v5129_v39 = vpack.c.bf16 %v2530_v37, %v2529_v36  ;;  %v2572_v37 = vld [vmem:[#allocation6 + $0x1d8] sm:$0xff] }
 0x327   :  { %5008 = vmatpush1.bf16.msra.mxu1 %v5007_v59  ;;  %5040 = vmatpush1.bf16.msra.mxu0 %v5039_v62  ;;  %v476_v59 = vld [vmem:[#allocation2 + $0x740] sm:$0xff]  ;;  %v401_v50 = vld [vmem:[#allocation2 + $0x4e8] sm:$0xff] }
 0x328   :  { %5010 = vmatprep.subr.bf16.mxu1 %v5009_v61  ;;  %5042 = vmatprep.subr.bf16.mxu0 %v5041_v0  ;;  %v492_v62 = vld [vmem:[#allocation2 + $0x7c0] sm:$0xff]  ;;  %v478_v61 = vld [vmem:[#allocation2 + $0x750] sm:$0xff] }
 0x329   :  { %v494_v0 = vld [vmem:[#allocation2 + $0x7d0] sm:$0xff]  ;;  %v5031_v5 = vpack.c.bf16 %v492_v62, %v476_v59  ;;  %v5081_v59 = vpack.c.bf16 %v401_v50, %v385_v49  ;;  %v5113_v62 = vpack.c.bf16 %v403_v54, %v387_v53  ;;  %v2532_v50 = vld [vmem:[#allocation6 + $0x98] sm:$0xff] }
 0x32a   :  { %v5063_v6 = vpack.c.bf16 %v494_v0, %v478_v61  ;;  %v417_v61 = vld [vmem:[#allocation2 + $0x568] sm:$0xff]  ;;  %v2531_v49 = vld [vmem:[#allocation6 + $0x90] sm:$0xff]  ;;  %v2564_v54 = vld [vmem:[#allocation6 + $0x198] sm:$0xff] }
 0x32b   :  { %5012 = vmatpush1.bf16.msra.mxu1 %v5011_v7  ;;  %5044 = vmatpush1.bf16.msra.mxu0 %v5043_v8  ;;  %v256_v7 = vld [vmem:[#allocation2 + $0x60] sm:$0xff]  ;;  %v433_v0 = vld [vmem:[#allocation2 + $0x5e8] sm:$0xff]  ;;  %v2563_v53 = vld [vmem:[#allocation6 + $0x190] sm:$0xff] }
 0x32c   :  { %5014 = vmatprep.subr.bf16.mxu1 %v5013_v10  ;;  %5046 = vmatprep.subr.bf16.mxu0 %v5045_v11  ;;  %v272_v8 = vld [vmem:[#allocation2 + $0xe0] sm:$0xff]  ;;  %v258_v10 = vld [vmem:[#allocation2 + $0x70] sm:$0xff] }
 0x32d   :  { %v274_v11 = vld [vmem:[#allocation2 + $0xf0] sm:$0xff]  ;;  %v5067_v17 = vpack.c.bf16 %v272_v8, %v256_v7  ;;  %v5085_v7 = vpack.c.bf16 %v433_v0, %v417_v61  ;;  %v5117_v8 = vpack.c.bf16 %v435_v2, %v419_v1  ;;  %v2534_v61 = vld [vmem:[#allocation6 + $0xa8] sm:$0xff]  ;;  %v2565_v0 = vld [vmem:[#allocation6 + $0x1a0] sm:$0xff] }
 0x32e   :  { %v5099_v18 = vpack.c.bf16 %v274_v11, %v258_v10  ;;  %v449_v10 = vld [vmem:[#allocation2 + $0x668] sm:$0xff] }
 0x32f   :  { %5016 = vmatpush1.bf16.msra.mxu1 %v5015_v19  ;;  %5048 = vmatpush1.bf16.msra.mxu0 %v5047_v20  ;;  %v288_v19 = vld [vmem:[#allocation2 + $0x160] sm:$0xff]  ;;  %v465_v11 = vld [vmem:[#allocation2 + $0x6e8] sm:$0xff] }
 0x330   :  { %5018 = vmatprep.subr.bf16.mxu1 %v5017_v23  ;;  %5050 = vmatprep.subr.bf16.mxu0 %v5049_v24  ;;  %v304_v20 = vld [vmem:[#allocation2 + $0x1e0] sm:$0xff]  ;;  %v290_v23 = vld [vmem:[#allocation2 + $0x170] sm:$0xff]  ;;  %v2566_v2 = vld [vmem:[#allocation6 + $0x1a8] sm:$0xff] }
 0x331   :  { %v306_v24 = vld [vmem:[#allocation2 + $0x1f0] sm:$0xff]  ;;  %v5071_v28 = vpack.c.bf16 %v304_v20, %v288_v19  ;;  %v5089_v19 = vpack.c.bf16 %v465_v11, %v449_v10  ;;  %v5121_v20 = vpack.c.bf16 %v467_v13, %v451_v12  ;;  %v2536_v10 = vld [vmem:[#allocation6 + $0xb8] sm:$0xff] }
 0x332   :  { %v5103_v29 = vpack.c.bf16 %v306_v24, %v290_v23  ;;  %v481_v23 = vld [vmem:[#allocation2 + $0x768] sm:$0xff]  ;;  %v2567_v11 = vld [vmem:[#allocation6 + $0x1b0] sm:$0xff]  ;;  %v2568_v13 = vld [vmem:[#allocation6 + $0x1b8] sm:$0xff] }
 0x333   :  { %5020 = vmatpush1.bf16.msra.mxu1 %v5019_v30  ;;  %5052 = vmatpush1.bf16.msra.mxu0 %v5051_v31  ;;  %v320_v30 = vld [vmem:[#allocation2 + $0x260] sm:$0xff]  ;;  %v497_v24 = vld [vmem:[#allocation2 + $0x7e8] sm:$0xff] }
 0x334   :  { %5022 = vmatprep.subr.bf16.mxu1 %v5021_v34  ;;  %5054 = vmatprep.subr.bf16.mxu0 %v5053_v35  ;;  %v336_v31 = vld [vmem:[#allocation2 + $0x2e0] sm:$0xff]  ;;  %v322_v34 = vld [vmem:[#allocation2 + $0x270] sm:$0xff] }
 0x335   :  { %v338_v35 = vld [vmem:[#allocation2 + $0x2f0] sm:$0xff]  ;;  %v5075_v40 = vpack.c.bf16 %v336_v31, %v320_v30  ;;  %v5125_v30 = vpack.c.bf16 %v499_v25, %v483_v51  ;;  %v496_v31 = vld [vmem:[#allocation2 + $0x7e0] sm:$0xff]  ;;  %v2570_v25 = vld [vmem:[#allocation6 + $0x1c8] sm:$0xff] }
 0x336   :  { %v5107_v41 = vpack.c.bf16 %v338_v35, %v322_v34 }
 0x337   :  { %5024 = vmatpush1.bf16.msra.mxu1 %v5023_v42  ;;  %5056 = vmatpush1.bf16.msra.mxu0 %v5055_v44  ;;  %v352_v42 = vld [vmem:[#allocation2 + $0x360] sm:$0xff] }
 0x338   :  { %5026 = vmatprep.subr.bf16.mxu1 %v5025_v47  ;;  %5058 = vmatprep.subr.bf16.mxu0 %v5057_v48  ;;  %v368_v44 = vld [vmem:[#allocation2 + $0x3e0] sm:$0xff]  ;;  %v354_v47 = vld [vmem:[#allocation2 + $0x370] sm:$0xff] }
 0x339   :  { %v370_v48 = vld [vmem:[#allocation2 + $0x3f0] sm:$0xff]  ;;  %v5079_v55 = vpack.c.bf16 %v368_v44, %v352_v42  ;;  %v2514_v42 = vld [vmem:[#allocation6 + $0x8] sm:$0xff] }
 0x33a   :  { %v5111_v56 = vpack.c.bf16 %v370_v48, %v354_v47  ;;  %v2546_v47 = vld [vmem:[#allocation6 + $0x108] sm:$0xff] }
 0x33b   :  { %5028 = vmatpush1.bf16.msra.mxu1 %v5027_v57  ;;  %5060 = vmatpush1.bf16.msra.mxu0 %v5059_v58  ;;  %v384_v57 = vld [vmem:[#allocation2 + $0x460] sm:$0xff] }
 0x33c   :  { %5030 = vmatprep.subr.bf16.mxu1 %v5029_v60  ;;  %5062 = vmatprep.subr.bf16.mxu0 %v5061_v63  ;;  %v400_v58 = vld [vmem:[#allocation2 + $0x4e0] sm:$0xff]  ;;  %v386_v60 = vld [vmem:[#allocation2 + $0x470] sm:$0xff] }
 0x33d   :  { %v402_v63 = vld [vmem:[#allocation2 + $0x4f0] sm:$0xff]  ;;  %v5083_v3 = vpack.c.bf16 %v400_v58, %v384_v57  ;;  %v5165_v57 = vpack.c.bf16 %v2564_v54, %v2563_v53  ;;  %v2525_v53 = vld [vmem:[#allocation6 + $0x60] sm:$0xff] }
 0x33e   :  { %v5115_v4 = vpack.c.bf16 %v402_v63, %v386_v60  ;;  %v2533_v63 = vld [vmem:[#allocation6 + $0xa0] sm:$0xff] }
 0x33f   :  { %5032 = vmatpush1.bf16.msra.mxu1 %v5031_v5  ;;  %5064 = vmatpush1.bf16.msra.mxu0 %v5063_v6  ;;  %v416_v5 = vld [vmem:[#allocation2 + $0x560] sm:$0xff]  ;;  %v5137_v1 = vpack.c.bf16 %v2534_v61, %v2533_v63  ;;  %v2576_v61 = vld [vmem:[#allocation6 + $0x1f8] sm:$0xff] }
 0x340   :  { %5066 = vmatprep.subr.bf16.mxu1 %v5065_v52  ;;  %5098 = vmatprep.subr.bf16.mxu0 %v5097_v9  ;;  %v432_v6 = vld [vmem:[#allocation2 + $0x5e0] sm:$0xff]  ;;  %v418_v52 = vld [vmem:[#allocation2 + $0x570] sm:$0xff] }
 0x341   :  { %v434_v9 = vld [vmem:[#allocation2 + $0x5f0] sm:$0xff]  ;;  %v5087_v15 = vpack.c.bf16 %v432_v6, %v416_v5  ;;  %v5169_v5 = vpack.c.bf16 %v2566_v2, %v2565_v0 }
 0x342   :  { %1673 = vmatmul.mubr.f32.vlgmr.msra.gmra.mrb[4].mxu1 %v5960_v14  ;;  %1744 = vmatmul.mubr.f32.vlgmr.msra.gmra.mrb[8].mxu0 %v5960_v14  ;;  %v5119_v16 = vpack.c.bf16 %v434_v9, %v418_v52  ;;  %v2535_v9 = vld [vmem:[#allocation6 + $0xb0] sm:$0xff] }
 0x343   :  { %5068 = vmatpush1.bf16.msra.mxu1 %v5067_v17  ;;  %5100 = vmatpush1.bf16.msra.mxu0 %v5099_v18  ;;  %v448_v17 = vld [vmem:[#allocation2 + $0x660] sm:$0xff]  ;;  %v5141_v12 = vpack.c.bf16 %v2536_v10, %v2535_v9  ;;  %v2527_v0 = vld [vmem:[#allocation6 + $0x70] sm:$0xff]  ;;  %v1896_v9 = vlaneseq }
 0x344   :  { %5070 = vmatprep.subr.bf16.mxu1 %v5069_v21  ;;  %5102 = vmatprep.subr.bf16.mxu0 %v5101_v22  ;;  %v464_v18 = vld [vmem:[#allocation2 + $0x6e0] sm:$0xff]  ;;  %v450_v21 = vld [vmem:[#allocation2 + $0x670] sm:$0xff] }
 0x345   :  { %1814 = vmatprep.mubr.f32.mxu1 %v5664_v43  ;;  %1885 = vmatprep.mubr.f32.mxu0 %v5664_v43  ;;  %v466_v22 = vld [vmem:[#allocation2 + $0x6f0] sm:$0xff]  ;;  %v5091_v26 = vpack.c.bf16 %v464_v18, %v448_v17  ;;  %v5173_v17 = vpack.c.bf16 %v2568_v13, %v2567_v11  ;;  %v5976_v10 = vshrl.u32 %v1896_v9, 7  ;;  %v5987_v13 = vld [vmem:[%s6371_s5] sm:$0xff] }
 0x346   :  { %v5123_v27 = vpack.c.bf16 %v466_v22, %v450_v21  ;;  %v2537_v22 = vld [vmem:[#allocation6 + $0xc0] sm:$0xff] }
 0x347   :  { %5072 = vmatpush1.bf16.msra.mxu1 %v5071_v28  ;;  %5104 = vmatpush1.bf16.msra.mxu0 %v5103_v29  ;;  %v480_v28 = vld [vmem:[#allocation2 + $0x760] sm:$0xff]  ;;  %v5093_v29 = vpack.c.bf16 %v497_v24, %v481_v23  ;;  %v2538_v23 = vld [vmem:[#allocation6 + $0xc8] sm:$0xff]  ;;  %v5979_v11 = vsub.s32 0, %v5976_v10 }
 0x348   :  { %5074 = vmatprep.subr.bf16.mxu1 %v5073_v32  ;;  %5106 = vmatprep.subr.bf16.mxu0 %v5105_v33  ;;  %v482_v32 = vld [vmem:[#allocation2 + $0x770] sm:$0xff]  ;;  %v5095_v34 = vpack.c.bf16 %v496_v31, %v480_v28  ;;  %v2569_v24 = vld [vmem:[#allocation6 + $0x1c0] sm:$0xff]  ;;  %v5145_v51 = vpack.c.bf16 %v2538_v23, %v2537_v22  ;;  %v2554_v31 = vld [vmem:[#allocation6 + $0x148] sm:$0xff] }
 0x349   :  { %v498_v33 = vld [vmem:[#allocation2 + $0x7f0] sm:$0xff]  ;;  %v5177_v28 = vpack.c.bf16 %v2570_v25, %v2569_v24 }
 0x34a   :  { %v5127_v35 = vpack.c.bf16 %v498_v33, %v482_v32  ;;  %v2539_v33 = vld [vmem:[#allocation6 + $0xd0] sm:$0xff] }
 0x34b   :  { %5076 = vmatpush1.bf16.msra.mxu1 %v5075_v40  ;;  %5108 = vmatpush1.bf16.msra.mxu0 %v5107_v41  ;;  %v2562_v40 = vld [vmem:[#allocation6 + $0x188] sm:$0xff]  ;;  %v2513_v41 = vld [vmem:[#allocation6] sm:$0xff] }
 0x34c   :  { %5078 = vmatprep.subr.bf16.mxu1 %v5077_v45  ;;  %5110 = vmatprep.subr.bf16.mxu0 %v5109_v46  ;;  %v5161_v44 = vpack.c.bf16 %v2562_v40, %v2561_v38  ;;  %v5131_v45 = vpack.c.bf16 %v2514_v42, %v2513_v41  ;;  %v2545_v46 = vld [vmem:[#allocation6 + $0x100] sm:$0xff]  ;;  %v2523_v38 = vld [vmem:[#allocation6 + $0x50] sm:$0xff] }
 0x34d   :  { %v5163_v48 = vpack.c.bf16 %v2546_v47, %v2545_v46  ;;  %v2555_v42 = vld [vmem:[#allocation6 + $0x150] sm:$0xff]  ;;  %v2541_v46 = vld [vmem:[#allocation6 + $0xe0] sm:$0xff]  ;;  %v2542_v47 = vld [vmem:[#allocation6 + $0xe8] sm:$0xff] }
 0x34f   :  { %5080 = vmatpush1.bf16.msra.mxu1 %v5079_v55  ;;  %5112 = vmatpush1.bf16.msra.mxu0 %v5111_v56  ;;  %v2515_v55 = vld [vmem:[#allocation6 + $0x10] sm:$0xff]  ;;  %v2516_v56 = vld [vmem:[#allocation6 + $0x18] sm:$0xff] }
 0x350   :  { %5082 = vmatprep.subr.bf16.mxu1 %v5081_v59  ;;  %5114 = vmatprep.subr.bf16.mxu0 %v5113_v62  ;;  %v5135_v58 = vpack.c.bf16 %v2516_v56, %v2515_v55  ;;  %v2547_v59 = vld [vmem:[#allocation6 + $0x110] sm:$0xff]  ;;  %v2548_v62 = vld [vmem:[#allocation6 + $0x118] sm:$0xff]  ;;  %v2557_v56 = vld [vmem:[#allocation6 + $0x160] sm:$0xff] }
 0x351   :  { %v5167_v60 = vpack.c.bf16 %v2548_v62, %v2547_v59  ;;  %v2543_v59 = vld [vmem:[#allocation6 + $0xf0] sm:$0xff]  ;;  %v2544_v62 = vld [vmem:[#allocation6 + $0xf8] sm:$0xff] }
 0x352   :  { %v5157_v63 = vpack.c.bf16 %v2544_v62, %v2543_v59 }
 0x353   :  { %5084 = vmatpush1.bf16.msra.mxu1 %v5083_v3  ;;  %5116 = vmatpush1.bf16.msra.mxu0 %v5115_v4  ;;  %v2517_v3 = vld [vmem:[#allocation6 + $0x20] sm:$0xff]  ;;  %v2518_v4 = vld [vmem:[#allocation6 + $0x28] sm:$0xff] }
 0x354   :  { %5086 = vmatprep.subr.bf16.mxu1 %v5085_v7  ;;  %5118 = vmatprep.subr.bf16.mxu0 %v5117_v8  ;;  %v5139_v6 = vpack.c.bf16 %v2518_v4, %v2517_v3  ;;  %v2549_v7 = vld [vmem:[#allocation6 + $0x120] sm:$0xff]  ;;  %v2550_v8 = vld [vmem:[#allocation6 + $0x128] sm:$0xff]  ;;  %v2559_v4 = vld [vmem:[#allocation6 + $0x170] sm:$0xff] }
 0x355   :  { %v5171_v52 = vpack.c.bf16 %v2550_v8, %v2549_v7  ;;  %v2907_v7 = vld [vmem:[#allocation6 + $0x280] sm:$0xff]  ;;  %v2908_v8 = vld [vmem:[#allocation6 + $0x288] sm:$0xff] }
 0x357   :  { %5088 = vmatpush1.bf16.msra.mxu1 %v5087_v15  ;;  %5120 = vmatpush1.bf16.msra.mxu0 %v5119_v16  ;;  %v2519_v15 = vld [vmem:[#allocation6 + $0x30] sm:$0xff]  ;;  %v2520_v16 = vld [vmem:[#allocation6 + $0x38] sm:$0xff] }
 0x358   :  { %5090 = vmatprep.subr.bf16.mxu1 %v5089_v19  ;;  %5122 = vmatprep.subr.bf16.mxu0 %v5121_v20  ;;  %v5143_v18 = vpack.c.bf16 %v2520_v16, %v2519_v15  ;;  %v2551_v19 = vld [vmem:[#allocation6 + $0x130] sm:$0xff]  ;;  %v2552_v20 = vld [vmem:[#allocation6 + $0x138] sm:$0xff]  ;;  %v5990_v15 = vsub.s32 1, %v5976_v10  ;;  %v5993_v16 = vsub.s32 3, %v5976_v10 }
 0x359   :  { %v5175_v21 = vpack.c.bf16 %v2552_v20, %v2551_v19 }
 0x35a   :  { %v1903_v19 = vrot.slane %v5987_v13, %v5990_v15  ;;  %v1911_v20 = vrot.slane %v5987_v13, %v5993_v16 }
 0x35b   :  { %5092 = vmatpush1.bf16.msra.mxu1 %v5091_v26  ;;  %5124 = vmatpush1.bf16.msra.mxu0 %v5123_v27  ;;  %v2521_v26 = vld [vmem:[#allocation6 + $0x40] sm:$0xff]  ;;  %v2522_v27 = vld [vmem:[#allocation6 + $0x48] sm:$0xff] }
 0x35c   :  { %5094 = vmatprep.subr.bf16.mxu1 %v5093_v29  ;;  %5126 = vmatprep.subr.bf16.mxu0 %v5125_v30  ;;  %v5147_v29 = vpack.c.bf16 %v2522_v27, %v2521_v26  ;;  %v2553_v30 = vld [vmem:[#allocation6 + $0x140] sm:$0xff] }
 0x35d   :  { %v5179_v32 = vpack.c.bf16 %v2554_v31, %v2553_v30 }
 0x35f   :  { %5096 = vmatpush1.bf16.msra.mxu1 %v5095_v34  ;;  %5128 = vmatpush1.bf16.msra.mxu0 %v5127_v35  ;;  %v2540_v34 = vld [vmem:[#allocation6 + $0xd8] sm:$0xff]  ;;  %v2571_v35 = vld [vmem:[#allocation6 + $0x1d0] sm:$0xff] }
 0x360   :  { %5130 = vmatprep.subr.bf16.mxu1 %v5129_v39  ;;  %5162 = vmatprep.subr.bf16.mxu0 %v5161_v44  ;;  %v5149_v36 = vpack.c.bf16 %v2540_v34, %v2539_v33  ;;  %v2524_v39 = vld [vmem:[#allocation6 + $0x58] sm:$0xff]  ;;  %v5181_v40 = vpack.c.bf16 %v2572_v37, %v2571_v35 }
 0x361   :  { %v5151_v41 = vpack.c.bf16 %v2524_v39, %v2523_v38  ;;  %v2556_v44 = vld [vmem:[#allocation6 + $0x158] sm:$0xff] }
 0x362   :  { %1815 = vmatmul.mubr.f32.vlgmr.msra.gmra.mrb[6].mxu1 %v5960_v14  ;;  %1886 = vmatmul.mubr.f32.vlgmr.msra.gmra.mrb[10].mxu0 %v5960_v14  ;;  %v5133_v14 = vpack.c.bf16 %v2532_v50, %v2531_v49  ;;  %v5153_v49 = vpack.c.bf16 %v2542_v47, %v2541_v46  ;;  %v2574_v50 = vld [vmem:[#allocation6 + $0x1e8] sm:$0xff] }
 0x363   :  { %5132 = vmatpush3.bf16.msra.mxu1 %v5131_v45  ;;  %5164 = vmatpush3.bf16.msra.mxu0 %v5163_v48  ;;  %v5183_v45 = vpack.c.bf16 %v2556_v44, %v2555_v42  ;;  %v2573_v48 = vld [vmem:[#allocation6 + $0x1e0] sm:$0xff] }
 0x364   :  { %5134 = vmatprep.subr.bf16.mxu1 %v5133_v14  ;;  %5166 = vmatprep.subr.bf16.mxu0 %v5165_v57  ;;  %v2526_v14 = vld [vmem:[#allocation6 + $0x68] sm:$0xff]  ;;  %v5185_v54 = vpack.c.bf16 %v2574_v50, %v2573_v48 }
 0x365   :  { %v5155_v55 = vpack.c.bf16 %v2526_v14, %v2525_v53  ;;  %v2558_v57 = vld [vmem:[#allocation6 + $0x168] sm:$0xff] }
 0x367   :  { %5136 = vmatpush3.bf16.msra.mxu1 %v5135_v58  ;;  %5168 = vmatpush3.bf16.msra.mxu0 %v5167_v60  ;;  %v5187_v58 = vpack.c.bf16 %v2558_v57, %v2557_v56  ;;  %v2575_v60 = vld [vmem:[#allocation6 + $0x1f0] sm:$0xff] }
 0x368   :  { %5138 = vmatprep.subr.bf16.mxu1 %v5137_v1  ;;  %5170 = vmatprep.subr.bf16.mxu0 %v5169_v5  ;;  %v2528_v1 = vld [vmem:[#allocation6 + $0x78] sm:$0xff]  ;;  %v5189_v2 = vpack.c.bf16 %v2576_v61, %v2575_v60 }
 0x369   :  { %v5159_v3 = vpack.c.bf16 %v2528_v1, %v2527_v0  ;;  %v2560_v5 = vld [vmem:[#allocation6 + $0x178] sm:$0xff] }
 0x36b   :  { %5140 = vmatpush3.bf16.msra.mxu1 %v5139_v6  ;;  %5172 = vmatpush3.bf16.msra.mxu0 %v5171_v52  ;;  %v5191_v6 = vpack.c.bf16 %v2560_v5, %v2559_v4  ;;  %v5217_v52 = vpack.c.bf16 %v2908_v8, %v2907_v7 }
 0x36c   :  { %5142 = vmatprep.subr.bf16.mxu1 %v5141_v12  ;;  %5174 = vmatprep.subr.bf16.mxu0 %v5173_v17  ;;  %v5982_v12 = vsub.s32 2, %v5976_v10  ;;  %v1899_v17 = vrot.slane %v5987_v13, %v5979_v11 }
 0x36f   :  { %5144 = vmatpush3.bf16.msra.mxu1 %v5143_v18  ;;  %5176 = vmatpush3.bf16.msra.mxu0 %v5175_v21  ;;  %v1907_v18 = vrot.slane %v5987_v13, %v5982_v12 }
 0x370   :  { %5146 = vmatprep.subr.bf16.mxu1 %v5145_v51  ;;  %5178 = vmatprep.subr.bf16.mxu0 %v5177_v28 }
 0x373   :  { %5148 = vmatpush3.bf16.msra.mxu1 %v5147_v29  ;;  %5180 = vmatpush3.bf16.msra.mxu0 %v5179_v32 }
 0x374   :  { %5150 = vmatprep.subr.bf16.mxu1 %v5149_v36  ;;  %5182 = vmatprep.subr.bf16.mxu0 %v5181_v40 }
 0x377   :  { %5152 = vmatpush3.bf16.msra.mxu1 %v5151_v41  ;;  %5184 = vmatpush3.bf16.msra.mxu0 %v5183_v45 }
 0x378   :  { %5154 = vmatprep.subr.bf16.mxu1 %v5153_v49  ;;  %5186 = vmatprep.subr.bf16.mxu0 %v5185_v54 }
 0x37b   :  { %5156 = vmatpush3.bf16.msra.mxu1 %v5155_v55  ;;  %5188 = vmatpush3.bf16.msra.mxu0 %v5187_v58 }
 0x37c   :  { %5158 = vmatprep.subr.bf16.mxu1 %v5157_v63  ;;  %5190 = vmatprep.subr.bf16.mxu0 %v5189_v2 }
 0x37f   :  { %5160 = vmatpush3.bf16.msra.mxu1 %v5159_v3  ;;  %5192 = vmatpush3.bf16.msra.mxu0 %v5191_v6 }
 0x380   :  { %5218 = vmatprep.subr.bf16.mxu0 %v5217_v52 }
 0x3d5   :  { %v1390_v21 = vpop.f32.mrb[0].mxu1  ;;  %v1461_v22 = vpop.f32.mrb[4].mxu0 }
 0x3d6   :  { %v1976_v23 = vadd.f32 %v1899_v17, %v1390_v21  ;;  %v1978_v24 = vadd.f32 %v1907_v18, %v1461_v22  ;;  %v1392_v51 = vpop.f32.mrb[1].mxu1  ;;  %v1463_v25 = vpop.f32.mrb[5].mxu0  ;;  %v6020_v18 = vsub.s32 4, %v5976_v10  ;;  %v6026_v22 = vsub.s32 5, %v5976_v10 }
 0x3d7   :  { %v1977_v26 = vadd.f32 %v1903_v19, %v1392_v51  ;;  %v1979_v27 = vadd.f32 %v1911_v20, %v1463_v25  ;;  %v6023_v19 = vsub.s32 6, %v5976_v10 }
 0x3d8   :  { %v1996_v28 = vrot.slane %v1976_v23, 4  ;;  %v2008_v29 = vrot.slane %v1978_v24, 4 }
 0x3d9   :  { %v2002_v30 = vrot.slane %v1977_v26, 4  ;;  %v2014_v31 = vrot.slane %v1979_v27, 4 }
 0x3da   :  { %v1997_v32 = vadd.f32 %v1996_v28, %v1976_v23  ;;  %v2009_v33 = vadd.f32 %v2008_v29, %v1978_v24  ;;  %v1915_v29 = vrot.slane %v5987_v13, %v6020_v18 }
 0x3db   :  { %v2003_v34 = vadd.f32 %v2002_v30, %v1977_v26  ;;  %v2015_v35 = vadd.f32 %v2014_v31, %v1979_v27  ;;  %v1923_v30 = vrot.slane %v5987_v13, %v6023_v19 }
 0x3dc   :  { %v1998_v36 = vrot.slane %v1997_v32, 2  ;;  %v2010_v37 = vrot.slane %v2009_v33, 2 }
 0x3dd   :  { %v2004_v38 = vrot.slane %v2003_v34, 2  ;;  %v2016_v39 = vrot.slane %v2015_v35, 2 }
 0x3de   :  { %v1999_v40 = vadd.f32 %v1998_v36, %v1997_v32  ;;  %v2011_v41 = vadd.f32 %v2010_v37, %v2009_v33  ;;  %v1919_v33 = vrot.slane %v5987_v13, %v6026_v22 }
 0x3df   :  { %v2005_v42 = vadd.f32 %v2004_v38, %v2003_v34  ;;  %v2017_v44 = vadd.f32 %v2016_v39, %v2015_v35 }
 0x3e0   :  { %v2000_v45 = vrot.slane %v1999_v40, 1  ;;  %v2012_v46 = vrot.slane %v2011_v41, 1 }
 0x3e1   :  { %v2006_v47 = vrot.slane %v2005_v42, 1  ;;  %v2018_v48 = vrot.slane %v2017_v44, 1 }
 0x3e2   :  { %v2001_v49 = vadd.f32 %v2000_v45, %v1999_v40  ;;  %v2013_v50 = vadd.f32 %v2012_v46, %v2011_v41 }
 0x3e3   :  { %v2007_v53 = vadd.f32 %v2006_v47, %v2005_v42  ;;  %v2019_v14 = vadd.f32 %v2018_v48, %v2017_v44 }
 0x3e4   :  { %v2093_v54 = vmul.f32 0.125, %v2001_v49  ;;  %v2095_v55 = vmul.f32 0.125, %v2013_v50 }
 0x3e5   :  { %v2094_v56 = vmul.f32 0.125, %v2007_v53  ;;  %v2096_v57 = vmul.f32 0.125, %v2019_v14 }
 0x3e6   :  { %v6003_v58 = vsub.f32 %v1976_v23, %v2093_v54  ;;  %v6005_v59 = vsub.f32 %v1978_v24, %v2095_v55  ;;  %v6029_v23 = vsub.s32 7, %v5976_v10 }
 0x3e7   :  { %v6007_v62 = vsub.f32 %v1977_v26, %v2094_v56  ;;  %v6009_v60 = vsub.f32 %v1979_v27, %v2096_v57 }
 0x3e8   :  { %v2125_v63 = vmul.f32 %v6003_v58, %v6003_v58  ;;  %v2127_v61 = vmul.f32 %v6005_v59, %v6005_v59  ;;  %v1927_v10 = vrot.slane %v5987_v13, %v6029_v23 }
 0x3e9   :  { %v2126_v0 = vmul.f32 %v6007_v62, %v6007_v62  ;;  %v2128_v1 = vmul.f32 %v6009_v60, %v6009_v60 }
 0x3ea   :  { %v2141_v2 = vrot.slane %v2125_v63, 4  ;;  %v2153_v3 = vrot.slane %v2127_v61, 4 }
 0x3eb   :  { %v2147_v4 = vrot.slane %v2126_v0, 4  ;;  %v2159_v5 = vrot.slane %v2128_v1, 4 }
 0x3ec   :  { %v2142_v6 = vadd.f32 %v2141_v2, %v2125_v63  ;;  %v2154_v7 = vadd.f32 %v2153_v3, %v2127_v61 }
 0x3ed   :  { %v2148_v8 = vadd.f32 %v2147_v4, %v2126_v0  ;;  %v2160_v52 = vadd.f32 %v2159_v5, %v2128_v1 }
 0x3ee   :  { %v2143_v9 = vrot.slane %v2142_v6, 2  ;;  %v2155_v17 = vrot.slane %v2154_v7, 2 }
 0x3ef   :  { %v2149_v20 = vrot.slane %v2148_v8, 2  ;;  %v2161_v21 = vrot.slane %v2160_v52, 2 }
 0x3f0   :  { %v2144_v24 = vadd.f32 %v2143_v9, %v2142_v6  ;;  %v2156_v51 = vadd.f32 %v2155_v17, %v2154_v7 }
 0x3f1   :  { %v2150_v25 = vadd.f32 %v2149_v20, %v2148_v8  ;;  %v2162_v26 = vadd.f32 %v2161_v21, %v2160_v52  ;;  %v6042_v52 = vld [vmem:[%s6372_s6] sm:$0xff] }
 0x3f2   :  { %v2145_v27 = vrot.slane %v2144_v24, 1  ;;  %v2157_v28 = vrot.slane %v2156_v51, 1 }
 0x3f3   :  { %v2151_v31 = vrot.slane %v2150_v25, 1  ;;  %v2163_v32 = vrot.slane %v2162_v26, 1 }
 0x3f4   :  { %v2146_v34 = vadd.f32 %v2145_v27, %v2144_v24  ;;  %v2158_v35 = vadd.f32 %v2157_v28, %v2156_v51  ;;  %v2314_v27 = vrot.slane %v6042_v52, %v5982_v12 }
 0x3f5   :  { %v2152_v36 = vadd.f32 %v2151_v31, %v2150_v25  ;;  %v2164_v37 = vadd.f32 %v2163_v32, %v2162_v26  ;;  %v1532_v38 = vpop.f32.mrb[2].mxu1  ;;  %v1603_v39 = vpop.f32.mrb[6].mxu0  ;;  %v6047_v25 = vld [vmem:[%s6373_s7] sm:$0xff]  ;;  %v2306_v26 = vrot.slane %v6042_v52, %v5979_v11  ;;  %v2310_v32 = vrot.slane %v6042_v52, %v5990_v15 }
 0x3f6   :  { %v2237_v40 = vmul.f32 0.125, %v2146_v34  ;;  %v2239_v41 = vmul.f32 0.125, %v2158_v35  ;;  %v1980_v42 = vadd.f32 %v1915_v29, %v1532_v38  ;;  %v1982_v44 = vadd.f32 %v1923_v30, %v1603_v39  ;;  %v1534_v45 = vpop.f32.mrb[3].mxu1  ;;  %v1605_v46 = vpop.f32.mrb[7].mxu0 }
 0x3f7   :  { %v2238_v47 = vmul.f32 0.125, %v2152_v36  ;;  %v2240_v48 = vmul.f32 0.125, %v2164_v37  ;;  %v1981_v49 = vadd.f32 %v1919_v33, %v1534_v45  ;;  %v1983_v50 = vadd.f32 %v1927_v10, %v1605_v46 }
 0x3f8   :  { %v2253_v53 = vadd.f32 1e-05, %v2237_v40  ;;  %v2255_v14 = vadd.f32 1e-05, %v2239_v41  ;;  %v2020_v54 = vrot.slane %v1980_v42, 4  ;;  %v2032_v13 = vrot.slane %v1982_v44, 4 }
 0x3f9   :  { %v2254_v55 = vadd.f32 1e-05, %v2238_v47  ;;  %v2256_v56 = vadd.f32 1e-05, %v2240_v48  ;;  %v2026_v57 = vrot.slane %v1981_v49, 4  ;;  %v2038_v63 = vrot.slane %v1983_v50, 4 }
 0x3fa   :  { %5515 = vrsqrt.f32 %v2253_v53  ;;  %v2021_v61 = vadd.f32 %v2020_v54, %v1980_v42  ;;  %v2033_v0 = vadd.f32 %v2032_v13, %v1982_v44  ;;  %v2318_v33 = vrot.slane %v6042_v52, %v5993_v16 }
 0x3fb   :  { %5517 = vrsqrt.f32 %v2255_v14  ;;  %v2027_v1 = vadd.f32 %v2026_v57, %v1981_v49  ;;  %v2039_v2 = vadd.f32 %v2038_v63, %v1983_v50  ;;  %v2404_v36 = vrot.slane %v6047_v25, %v5979_v11 }
 0x3fc   :  { %5519 = vrsqrt.f32 %v2254_v55  ;;  %v2022_v3 = vrot.slane %v2021_v61, 2  ;;  %v2034_v4 = vrot.slane %v2033_v0, 2  ;;  %v2412_v37 = vrot.slane %v6047_v25, %v5982_v12 }
 0x3fd   :  { %5521 = vrsqrt.f32 %v2256_v56  ;;  %v2028_v5 = vrot.slane %v2027_v1, 2  ;;  %v2040_v6 = vrot.slane %v2039_v2, 2  ;;  %v2408_v45 = vrot.slane %v6047_v25, %v5990_v15 }
 0x3fe   :  { %v2023_v7 = vadd.f32 %v2022_v3, %v2021_v61  ;;  %v2035_v8 = vadd.f32 %v2034_v4, %v2033_v0  ;;  %v2416_v14 = vrot.slane %v6047_v25, %v5993_v16  ;;  %v2892_v3 = vld [vmem:[#allocation6 + $0x208] sm:$0xff] }
 0x3ff   :  { %v2029_v9 = vadd.f32 %v2028_v5, %v2027_v1  ;;  %v2041_v17 = vadd.f32 %v2040_v6, %v2039_v2  ;;  %v2891_v2 = vld [vmem:[#allocation6 + $0x200] sm:$0xff] }
 0x400   :  { %v2024_v20 = vrot.slane %v2023_v7, 1  ;;  %v2036_v21 = vrot.slane %v2035_v8, 1 }
 0x401   :  { %v2030_v24 = vrot.slane %v2029_v9, 1  ;;  %v2042_v51 = vrot.slane %v2041_v17, 1 }
 0x402   :  { %v2025_v28 = vadd.f32 %v2024_v20, %v2023_v7  ;;  %v2037_v29 = vadd.f32 %v2036_v21, %v2035_v8  ;;  %v2910_v20 = vld [vmem:[#allocation6 + $0x298] sm:$0xff] }
 0x403   :  { %v2031_v30 = vadd.f32 %v2030_v24, %v2029_v9  ;;  %v2043_v31 = vadd.f32 %v2042_v51, %v2041_v17  ;;  %v2909_v17 = vld [vmem:[#allocation6 + $0x290] sm:$0xff] }
 0x404   :  { %v5516_v10 = vpop.eup %5515  ;;  %v2097_v34 = vmul.f32 0.125, %v2025_v28  ;;  %v2099_v35 = vmul.f32 0.125, %v2037_v29 }
 0x405   :  { %v5518_v38 = vpop.eup %5517  ;;  %v2285_v39 = vmul.f32 %v5516_v10, %v6003_v58  ;;  %v2098_v40 = vmul.f32 0.125, %v2031_v30  ;;  %v2100_v41 = vmul.f32 0.125, %v2043_v31  ;;  %v5221_v10 = vpack.c.bf16 %v2910_v20, %v2909_v17 }
 0x406   :  { %v5520_v46 = vpop.eup %5519  ;;  %v2287_v47 = vmul.f32 %v5518_v38, %v6005_v59  ;;  %v6065_v48 = vsub.f32 %v1980_v42, %v2097_v34  ;;  %v6067_v53 = vsub.f32 %v1982_v44, %v2099_v35  ;;  %v2893_v34 = vld [vmem:[#allocation6 + $0x210] sm:$0xff]  ;;  %v2894_v35 = vld [vmem:[#allocation6 + $0x218] sm:$0xff] }
 0x407   :  { %v5522_v54 = vpop.eup %5521  ;;  %v2383_v13 = vmul.f32 %v2306_v26, %v2285_v39  ;;  %v2286_v55 = vmul.f32 %v5520_v46, %v6007_v62  ;;  %v6072_v58 = vsub.f32 %v1981_v49, %v2098_v40  ;;  %v6074_v56 = vsub.f32 %v1983_v50, %v2100_v41  ;;  %v2911_v39 = vld [vmem:[#allocation6 + $0x2a0] sm:$0xff]  ;;  %v2912_v40 = vld [vmem:[#allocation6 + $0x2a8] sm:$0xff] }
 0x408   :  { %v2385_v57 = vmul.f32 %v2314_v27, %v2287_v47  ;;  %v2288_v63 = vmul.f32 %v5522_v54, %v6009_v60  ;;  %v2129_v59 = vmul.f32 %v6065_v48, %v6065_v48  ;;  %v2131_v42 = vmul.f32 %v6067_v53, %v6067_v53 }
 0x409   :  { %v2130_v44 = vmul.f32 %v6072_v58, %v6072_v58  ;;  %v2132_v61 = vmul.f32 %v6074_v56, %v6074_v56  ;;  %v2384_v62 = vmul.f32 %v2310_v32, %v2286_v55  ;;  %v2481_v1 = vadd.f32 %v2404_v36, %v2383_v13  ;;  %v6088_v36 = vld [vmem:[%s6371_s5 + $0x8] sm:$0xff] }
 0x40a   :  { %v2165_v49 = vrot.slane %v2129_v59, 4  ;;  %v2177_v0 = vrot.slane %v2131_v42, 4  ;;  %v2386_v50 = vmul.f32 %v2318_v33, %v2288_v63  ;;  %v2483_v6 = vadd.f32 %v2412_v37, %v2385_v57 }
 0x40b   :  { %v2171_v60 = vrot.slane %v2130_v44, 4  ;;  %v2183_v4 = vrot.slane %v2132_v61, 4  ;;  %v2482_v5 = vadd.f32 %v2408_v45, %v2384_v62  ;;  %v5219_v26 = vpack.c.bf16 %v2892_v3, %v2891_v2  ;;  %v2913_v62 = vld [vmem:[#allocation6 + $0x2b0] sm:$0xff] }
 0x40c   :  { %v2166_v7 = vadd.f32 %v2165_v49, %v2129_v59  ;;  %v2178_v8 = vadd.f32 %v2177_v0, %v2131_v42  ;;  %v2484_v9 = vadd.f32 %v2416_v14, %v2386_v50  ;;  %v2497_v30 = vmax.f32 %v2481_v1, 0.0  ;;  %v2895_v59 = vld [vmem:[#allocation6 + $0x220] sm:$0xff]  ;;  %v2896_v42 = vld [vmem:[#allocation6 + $0x228] sm:$0xff]  ;;  %v2914_v49 = vld [vmem:[#allocation6 + $0x2b8] sm:$0xff] }
 0x40d   :  { %v2172_v21 = vadd.f32 %v2171_v60, %v2130_v44  ;;  %v2184_v24 = vadd.f32 %v2183_v4, %v2132_v61  ;;  %v2498_v51 = vmax.f32 %v2482_v5, 0.0  ;;  %v2499_v33 = vmax.f32 %v2483_v6, 0.0 }
 0x40e   :  { %v2167_v27 = vrot.slane %v2166_v7, 2  ;;  %v2179_v28 = vrot.slane %v2178_v8, 2  ;;  %v2500_v29 = vmax.f32 %v2484_v9, 0.0  ;;  %v5223_v14 = vpack.c.bf16 %v2894_v35, %v2893_v34 }
 0x40f   :  { %v2173_v31 = vrot.slane %v2172_v21, 2  ;;  %v2185_v32 = vrot.slane %v2184_v24, 2  ;;  %2648 = vmatprep.mubr.f32.mxu1 %v2498_v51  ;;  %v1939_v54 = vrot.slane %v6088_v36, %v5982_v12  ;;  %v1943_v57 = vrot.slane %v6088_v36, %v5993_v16  ;;  %v2915_v51 = vld [vmem:[#allocation6 + $0x2c0] sm:$0xff] }
 0x410   :  { %v2168_v37 = vadd.f32 %v2167_v27, %v2166_v7  ;;  %v2180_v38 = vadd.f32 %v2179_v28, %v2178_v8  ;;  %2718 = vmatprep.mubr.f32.mxu0 %v2500_v29  ;;  %2649 = vmatmul.mubr.f32.vlgmr.msra.gmra.mrb[8].mxu1 %v2497_v30  ;;  %v5225_v63 = vpack.c.bf16 %v2912_v40, %v2911_v39  ;;  %v2916_v29 = vld [vmem:[#allocation6 + $0x2c8] sm:$0xff]  ;;  %v2917_v40 = vld [vmem:[#allocation6 + $0x2d0] sm:$0xff] }
 0x411   :  { %v2174_v41 = vadd.f32 %v2173_v31, %v2172_v21  ;;  %v2186_v45 = vadd.f32 %v2185_v32, %v2184_v24  ;;  %2719 = vmatmul.mubr.f32.vlgmr.msra.gmra.mrb[12].mxu0 %v2499_v33  ;;  %v5227_v7 = vpack.c.bf16 %v2896_v42, %v2895_v59  ;;  %v5229_v20 = vpack.c.bf16 %v2914_v49, %v2913_v62  ;;  %v2897_v21 = vld [vmem:[#allocation6 + $0x230] sm:$0xff]  ;;  %v2898_v24 = vld [vmem:[#allocation6 + $0x238] sm:$0xff]  ;;  %v2920_v59 = vld [vmem:[#allocation6 + $0x2e8] sm:$0xff] }
 0x412   :  { %v2169_v46 = vrot.slane %v2168_v37, 1  ;;  %v2181_v47 = vrot.slane %v2180_v38, 1  ;;  %5220 = vmatpush3.bf16.msra.mxu0 %v5219_v26  ;;  %v5233_v35 = vpack.c.bf16 %v2916_v29, %v2915_v51  ;;  %4477 = vmatprep.mubr.msk.f32.mxu1 %vm5666_vm0, %v5664_v43 }
 0x413   :  { %v2175_v13 = vrot.slane %v2174_v41, 1  ;;  %v2187_v55 = vrot.slane %v2186_v45, 1  ;;  %5222 = vmatprep.subr.bf16.mxu0 %v5221_v10  ;;  %v5231_v10 = vpack.c.bf16 %v2898_v24, %v2897_v21 }
 0x414   :  { %v2170_v44 = vadd.f32 %v2169_v46, %v2168_v37  ;;  %v2182_v61 = vadd.f32 %v2181_v47, %v2180_v38  ;;  %v2899_v37 = vld [vmem:[#allocation6 + $0x240] sm:$0xff]  ;;  %v2900_v38 = vld [vmem:[#allocation6 + $0x248] sm:$0xff] }
 0x415   :  { %v2176_v0 = vadd.f32 %v2175_v13, %v2174_v41  ;;  %v2188_v50 = vadd.f32 %v2187_v55, %v2186_v45  ;;  %v6094_v1 = vpop.f32.mrb[4].mxu1  ;;  %v1745_v2 = vpop.f32.mrb[8].mxu0  ;;  %v2918_v41 = vld [vmem:[#allocation6 + $0x2d8] sm:$0xff]  ;;  %v5235_v47 = vpack.c.bf16 %v2900_v38, %v2899_v37  ;;  %v2901_v13 = vld [vmem:[#allocation6 + $0x250] sm:$0xff] }
 0x416   :  { %v2241_v3 = vmul.f32 0.125, %v2170_v44  ;;  %v2243_v60 = vmul.f32 0.125, %v2182_v61  ;;  %5224 = vmatpush3.bf16.msra.mxu0 %v5223_v14  ;;  %v6096_v4 = vadd.f32 %v1939_v54, %v1745_v2  ;;  %v6098_v5 = vpop.f32.mrb[5].mxu1  ;;  %v1747_v6 = vpop.f32.mrb[9].mxu0  ;;  %v5237_v54 = vpack.c.bf16 %v2918_v41, %v2917_v40  ;;  %v2902_v55 = vld [vmem:[#allocation6 + $0x258] sm:$0xff]  ;;  %v2903_v44 = vld [vmem:[#allocation6 + $0x260] sm:$0xff] }
 0x417   :  { %v2242_v8 = vmul.f32 0.125, %v2176_v0  ;;  %v2244_v9 = vmul.f32 0.125, %v2188_v50  ;;  %v6100_v17 = vadd.f32 %v1943_v57, %v1747_v6  ;;  %5226 = vmatprep.subr.bf16.mxu0 %v5225_v63  ;;  %v2919_v63 = vld [vmem:[#allocation6 + $0x2e0] sm:$0xff]  ;;  %v2904_v61 = vld [vmem:[#allocation6 + $0x268] sm:$0xff]  ;;  %v5239_v49 = vpack.c.bf16 %v2902_v55, %v2901_v13 }
 0x418   :  { %v2257_v26 = vadd.f32 1e-05, %v2241_v3  ;;  %v2259_v27 = vadd.f32 1e-05, %v2243_v60  ;;  %v2056_v28 = vrot.slane %v6096_v4, 4  ;;  %v2322_v0 = vrot.slane %v6042_v52, %v6020_v18 }
 0x419   :  { %v2258_v30 = vadd.f32 1e-05, %v2242_v8  ;;  %v2260_v31 = vadd.f32 1e-05, %v2244_v9  ;;  %v2062_v32 = vrot.slane %v6100_v17, 4  ;;  %v5241_v2 = vpack.c.bf16 %v2920_v59, %v2919_v63  ;;  %v2921_v8 = vld [vmem:[#allocation6 + $0x2f0] sm:$0xff] }
 0x41a   :  { %5523 = vrsqrt.f32 %v2257_v26  ;;  %v2057_v33 = vadd.f32 %v2056_v28, %v6096_v4  ;;  %5228 = vmatpush3.bf16.msra.mxu0 %v5227_v7  ;;  %v2330_v60 = vrot.slane %v6042_v52, %v6023_v19  ;;  %v5243_v7 = vpack.c.bf16 %v2904_v61, %v2903_v44  ;;  %v2922_v9 = vld [vmem:[#allocation6 + $0x2f8] sm:$0xff] }
 0x41b   :  { %5525 = vrsqrt.f32 %v2259_v27  ;;  %v2063_v34 = vadd.f32 %v2062_v32, %v6100_v17  ;;  %5230 = vmatprep.subr.bf16.mxu0 %v5229_v20  ;;  %v2326_v20 = vrot.slane %v6042_v52, %v6026_v22  ;;  %v2420_v26 = vrot.slane %v6047_v25, %v6020_v18 }
 0x41c   :  { %5527 = vrsqrt.f32 %v2258_v30  ;;  %v2058_v39 = vrot.slane %v2057_v33, 2  ;;  %v2334_v27 = vrot.slane %v6042_v52, %v6029_v23  ;;  %v5245_v52 = vpack.c.bf16 %v2922_v9, %v2921_v8 }
 0x41d   :  { %5529 = vrsqrt.f32 %v2260_v31  ;;  %v2064_v45 = vrot.slane %v2063_v34, 2  ;;  %v2424_v31 = vrot.slane %v6047_v25, %v6026_v22 }
 0x41e   :  { %v2059_v46 = vadd.f32 %v2058_v39, %v2057_v33  ;;  %5232 = vmatpush3.bf16.msra.mxu0 %v5231_v10  ;;  %v2432_v39 = vrot.slane %v6047_v25, %v6029_v23 }
 0x41f   :  { %v2065_v14 = vadd.f32 %v2064_v45, %v2063_v34  ;;  %5234 = vmatprep.subr.bf16.mxu0 %v5233_v35  ;;  %v2906_v35 = vld [vmem:[#allocation6 + $0x278] sm:$0xff] }
 0x420   :  { %v2060_v57 = vrot.slane %v2059_v46, 1 }
 0x421   :  { %v2066_v42 = vrot.slane %v2065_v14, 1 }
 0x422   :  { %v2061_v62 = vadd.f32 %v2060_v57, %v2059_v46  ;;  %5236 = vmatpush3.bf16.msra.mxu0 %v5235_v47 }
 0x423   :  { %v2067_v50 = vadd.f32 %v2066_v42, %v2065_v14  ;;  %5238 = vmatprep.subr.bf16.mxu0 %v5237_v54 }
 0x424   :  { %v5524_v3 = vpop.eup %5523  ;;  %v2103_v6 = vmul.f32 0.125, %v2061_v62  ;;  %v1947_v62 = vrot.slane %v6088_v36, %v6020_v18 }
 0x425   :  { %v5526_v21 = vpop.eup %5525  ;;  %v2289_v24 = vmul.f32 %v5524_v3, %v6065_v48  ;;  %v2104_v51 = vmul.f32 0.125, %v2067_v50  ;;  %v2428_v48 = vrot.slane %v6047_v25, %v6023_v19  ;;  %v1951_v50 = vrot.slane %v6088_v36, %v6026_v22 }
 0x426   :  { %v5528_v28 = vpop.eup %5527  ;;  %v2291_v29 = vmul.f32 %v5526_v21, %v6067_v53  ;;  %v6119_v30 = vsub.f32 %v6096_v4, %v2103_v6  ;;  %5240 = vmatpush3.bf16.msra.mxu0 %v5239_v49  ;;  %v2905_v53 = vld [vmem:[#allocation6 + $0x270] sm:$0xff]  ;;  %v1955_v49 = vrot.slane %v6088_v36, %v6023_v19 }
 0x427   :  { %v5530_v32 = vpop.eup %5529  ;;  %v2387_v33 = vmul.f32 %v2322_v0, %v2289_v24  ;;  %v2290_v10 = vmul.f32 %v5528_v28, %v6072_v58  ;;  %v6127_v34 = vsub.f32 %v6100_v17, %v2104_v51  ;;  %5242 = vmatprep.subr.bf16.mxu0 %v5241_v2  ;;  %v5247_v17 = vpack.c.bf16 %v2906_v35, %v2905_v53 }
 0x428   :  { %v2389_v4 = vmul.f32 %v2330_v60, %v2291_v29  ;;  %v2292_v37 = vmul.f32 %v5530_v32, %v6074_v56  ;;  %v2135_v38 = vmul.f32 %v6119_v30, %v6119_v30  ;;  %v1959_v2 = vrot.slane %v6088_v36, %v6029_v23 }
 0x429   :  { %v2136_v40 = vmul.f32 %v6127_v34, %v6127_v34  ;;  %v2388_v58 = vmul.f32 %v2326_v20, %v2290_v10  ;;  %v2485_v56 = vadd.f32 %v2420_v26, %v2387_v33 }
 0x42a   :  { %v2201_v41 = vrot.slane %v2135_v38, 4  ;;  %5244 = vmatpush3.bf16.msra.mxu0 %v5243_v7  ;;  %v2390_v45 = vmul.f32 %v2334_v27, %v2292_v37  ;;  %v6136_v46 = vadd.f32 %v2428_v48, %v2389_v4 }
 0x42b   :  { %v2207_v47 = vrot.slane %v2136_v40, 4  ;;  %5246 = vmatprep.subr.bf16.mxu0 %v5245_v52  ;;  %v2486_v14 = vadd.f32 %v2424_v31, %v2388_v58  ;;  %v2501_v59 = vmax.f32 %v2485_v56, 0.0 }
 0x42c   :  { %v2202_v54 = vadd.f32 %v2201_v41, %v2135_v38  ;;  %v6138_v13 = vadd.f32 %v2432_v39, %v2390_v45 }
 0x42d   :  { %v2208_v55 = vadd.f32 %v2207_v47, %v2136_v40  ;;  %v2502_v57 = vmax.f32 %v2486_v14, 0.0  ;;  %v6151_v14 = vld [vmem:[%s6372_s6 + $0x8] sm:$0xff] }
 0x42e   :  { %v2203_v25 = vrot.slane %v2202_v54, 2  ;;  %5248 = vmatpush3.bf16.msra.mxu0 %v5247_v17 }
 0x42f   :  { %v2209_v63 = vrot.slane %v2208_v55, 2  ;;  %3026 = vmatprep.mubr.f32.mxu0 %v2502_v57 }
 0x430   :  { %v2204_v42 = vadd.f32 %v2203_v25, %v2202_v54 }
 0x431   :  { %v2210_v44 = vadd.f32 %v2209_v63, %v2208_v55  ;;  %3027 = vmatmul.mubr.f32.vlgmr.msra.gmra.mrb[14].mxu0 %v2501_v59  ;;  %v6156_v59 = vld [vmem:[%s6373_s7 + $0x8] sm:$0xff] }
 0x432   :  { %v2205_v61 = vrot.slane %v2204_v42, 1  ;;  %4512 = vmatprep.mubr.msk.f32.mxu0 %vm5666_vm0, %v5664_v43 }
 0x433   :  { %v2211_v0 = vrot.slane %v2210_v44, 1 }
 0x434   :  { %v2206_v3 = vadd.f32 %v2205_v61, %v2204_v42  ;;  %v2346_v42 = vrot.slane %v6151_v14, %v5982_v12 }
 0x435   :  { %v2212_v60 = vadd.f32 %v2211_v0, %v2210_v44  ;;  %v1816_v6 = vpop.f32.mrb[6].mxu1  ;;  %v1887_v7 = vpop.f32.mrb[10].mxu0 }
 0x436   :  { %v2247_v8 = vmul.f32 0.125, %v2206_v3  ;;  %v1988_v9 = vadd.f32 %v1947_v62, %v1816_v6  ;;  %v1990_v20 = vadd.f32 %v1955_v49, %v1887_v7  ;;  %v1818_v21 = vpop.f32.mrb[7].mxu1  ;;  %v1889_v24 = vpop.f32.mrb[11].mxu0  ;;  %v2444_v6 = vrot.slane %v6156_v59, %v5982_v12 }
 0x437   :  { %v2248_v51 = vmul.f32 0.125, %v2212_v60  ;;  %v1989_v26 = vadd.f32 %v1951_v50, %v1818_v21  ;;  %v1991_v27 = vadd.f32 %v1959_v2, %v1889_v24  ;;  %v2350_v50 = vrot.slane %v6151_v14, %v5993_v16 }
 0x438   :  { %v2263_v28 = vadd.f32 1e-05, %v2247_v8  ;;  %v2068_v29 = vrot.slane %v1988_v9, 4  ;;  %v2080_v31 = vrot.slane %v1990_v20, 4  ;;  %v2448_v24 = vrot.slane %v6156_v59, %v5993_v16 }
 0x439   :  { %v2264_v48 = vadd.f32 1e-05, %v2248_v51  ;;  %v2074_v32 = vrot.slane %v1989_v26, 4  ;;  %v2086_v33 = vrot.slane %v1991_v27, 4 }
 0x43a   :  { %v2069_v10 = vadd.f32 %v2068_v29, %v1988_v9  ;;  %v2081_v52 = vadd.f32 %v2080_v31, %v1990_v20  ;;  %5531 = vrsqrt.f32 %v2263_v28 }
 0x43b   :  { %v2075_v53 = vadd.f32 %v2074_v32, %v1989_v26  ;;  %v2087_v35 = vadd.f32 %v2086_v33, %v1991_v27  ;;  %5533 = vrsqrt.f32 %v2264_v48 }
 0x43c   :  { %v2070_v4 = vrot.slane %v2069_v10, 2  ;;  %v2082_v37 = vrot.slane %v2081_v52, 2 }
 0x43d   :  { %v2076_v38 = vrot.slane %v2075_v53, 2  ;;  %v2088_v39 = vrot.slane %v2087_v35, 2 }
 0x43e   :  { %v2071_v40 = vadd.f32 %v2070_v4, %v2069_v10  ;;  %v2083_v58 = vadd.f32 %v2082_v37, %v2081_v52 }
 0x43f   :  { %v2077_v41 = vadd.f32 %v2076_v38, %v2075_v53  ;;  %v2089_v17 = vadd.f32 %v2088_v39, %v2087_v35 }
 0x440   :  { %v2072_v45 = vrot.slane %v2071_v40, 1  ;;  %v2084_v47 = vrot.slane %v2083_v58, 1 }
 0x441   :  { %v2078_v56 = vrot.slane %v2077_v41, 1  ;;  %v2090_v54 = vrot.slane %v2089_v17, 1 }
 0x442   :  { %v2073_v55 = vadd.f32 %v2072_v45, %v2071_v40  ;;  %v2085_v57 = vadd.f32 %v2084_v47, %v2083_v58 }
 0x443   :  { %v2079_v25 = vadd.f32 %v2078_v56, %v2077_v41  ;;  %v2091_v63 = vadd.f32 %v2090_v54, %v2089_v17 }
 0x444   :  { %v2105_v44 = vmul.f32 0.125, %v2073_v55  ;;  %v2107_v61 = vmul.f32 0.125, %v2085_v57  ;;  %v5532_v62 = vpop.eup %5531 }
 0x445   :  { %v2106_v49 = vmul.f32 0.125, %v2079_v25  ;;  %v2108_v0 = vmul.f32 0.125, %v2091_v63  ;;  %v2295_v2 = vmul.f32 %v5532_v62, %v6119_v30  ;;  %v5534_v7 = vpop.eup %5533 }
 0x446   :  { %v2121_v3 = vsub.f32 %v1988_v9, %v2105_v44  ;;  %v2123_v60 = vsub.f32 %v1990_v20, %v2107_v61  ;;  %v2296_v28 = vmul.f32 %v5534_v7, %v6127_v34 }
 0x447   :  { %v2122_v8 = vsub.f32 %v1989_v26, %v2106_v49  ;;  %v6165_v21 = vsub.f32 %v1991_v27, %v2108_v0  ;;  %v2393_v51 = vmul.f32 %v2346_v42, %v2295_v2 }
 0x448   :  { %v2137_v29 = vmul.f32 %v2121_v3, %v2121_v3  ;;  %v2139_v31 = vmul.f32 %v2123_v60, %v2123_v60  ;;  %v2394_v32 = vmul.f32 %v2350_v50, %v2296_v28  ;;  %v2354_v50 = vrot.slane %v6151_v14, %v6020_v18 }
 0x449   :  { %v2138_v48 = vmul.f32 %v2122_v8, %v2122_v8  ;;  %v2140_v30 = vmul.f32 %v6165_v21, %v6165_v21  ;;  %v6172_v12 = vadd.f32 %v2444_v6, %v2393_v51  ;;  %v2362_v6 = vrot.slane %v6151_v14, %v6023_v19 }
 0x44a   :  { %v2213_v9 = vrot.slane %v2137_v29, 4  ;;  %v2225_v20 = vrot.slane %v2139_v31, 4  ;;  %v6174_v52 = vadd.f32 %v2448_v24, %v2394_v32  ;;  %v2358_v51 = vrot.slane %v6151_v14, %v6026_v22 }
 0x44b   :  { %v2219_v26 = vrot.slane %v2138_v48, 4  ;;  %v2231_v27 = vrot.slane %v2140_v30, 4  ;;  %v2452_v28 = vrot.slane %v6156_v59, %v6020_v18  ;;  %v2464_v18 = vrot.slane %v6156_v59, %v6029_v23 }
 0x44c   :  { %v2214_v33 = vadd.f32 %v2213_v9, %v2137_v29  ;;  %v2226_v10 = vadd.f32 %v2225_v20, %v2139_v31 }
 0x44d   :  { %v2220_v16 = vadd.f32 %v2219_v26, %v2138_v48  ;;  %v2232_v53 = vadd.f32 %v2231_v27, %v2140_v30  ;;  %v2366_v48 = vrot.slane %v6151_v14, %v6029_v23  ;;  %v2460_v30 = vrot.slane %v6156_v59, %v6023_v19  ;;  %v2762_v23 = vld [vmem:[#allocation7 + $0x10] sm:$0xff] }
 0x44e   :  { %v2215_v34 = vrot.slane %v2214_v33, 2  ;;  %v2227_v35 = vrot.slane %v2226_v10, 2 }
 0x44f   :  { %v2221_v4 = vrot.slane %v2220_v16, 2  ;;  %v2233_v37 = vrot.slane %v2232_v53, 2 }
 0x450   :  { %v2216_v38 = vadd.f32 %v2215_v34, %v2214_v33  ;;  %v2228_v39 = vadd.f32 %v2227_v35, %v2226_v10  ;;  %v2761_v34 = vld [vmem:[#allocation7 + $0x8] sm:$0xff] }
 0x451   :  { %v2222_v40 = vadd.f32 %v2221_v4, %v2220_v16  ;;  %v2234_v58 = vadd.f32 %v2233_v37, %v2232_v53  ;;  %v2764_v37 = vld [vmem:[#allocation7 + $0x20] sm:$0xff] }
 0x452   :  { %v2217_v41 = vrot.slane %v2216_v38, 1  ;;  %v2229_v17 = vrot.slane %v2228_v39, 1 }
 0x453   :  { %v2223_v45 = vrot.slane %v2222_v40, 1  ;;  %v2235_v47 = vrot.slane %v2234_v58, 1 }
 0x454   :  { %v2218_v56 = vadd.f32 %v2217_v41, %v2216_v38  ;;  %v2230_v54 = vadd.f32 %v2229_v17, %v2228_v39  ;;  %v2765_v38 = vld [vmem:[#allocation7 + $0x28] sm:$0xff]  ;;  %v2768_v17 = vld [vmem:[#allocation7 + $0x40] sm:$0xff] }
 0x455   :  { %v2224_v55 = vadd.f32 %v2223_v45, %v2222_v40  ;;  %v2236_v57 = vadd.f32 %v2235_v47, %v2234_v58  ;;  %v5200_v39 = vpack.c.bf16 %v2765_v38, %v2764_v37  ;;  %v2766_v40 = vld [vmem:[#allocation7 + $0x30] sm:$0xff]  ;;  %v2767_v58 = vld [vmem:[#allocation7 + $0x38] sm:$0xff]  ;;  %v2769_v45 = vld [vmem:[#allocation7 + $0x48] sm:$0xff] }
 0x456   :  { %v2249_v25 = vmul.f32 0.125, %v2218_v56  ;;  %v2251_v63 = vmul.f32 0.125, %v2230_v54  ;;  %v5203_v41 = vpack.c.bf16 %v2767_v58, %v2766_v40  ;;  %v5206_v47 = vpack.c.bf16 %v2769_v45, %v2768_v17  ;;  %v2770_v56 = vld [vmem:[#allocation7 + $0x50] sm:$0xff]  ;;  %v2771_v54 = vld [vmem:[#allocation7 + $0x58] sm:$0xff] }
 0x457   :  { %v2250_v42 = vmul.f32 0.125, %v2224_v55  ;;  %v2252_v44 = vmul.f32 0.125, %v2236_v57  ;;  %v5209_v55 = vpack.c.bf16 %v2771_v54, %v2770_v56  ;;  %v2772_v57 = vld [vmem:[#allocation7 + $0x60] sm:$0xff] }
 0x458   :  { %v2265_v61 = vadd.f32 1e-05, %v2249_v25  ;;  %v2267_v62 = vadd.f32 1e-05, %v2251_v63  ;;  %v2773_v25 = vld [vmem:[#allocation7 + $0x68] sm:$0xff] }
 0x459   :  { %v2266_v49 = vadd.f32 1e-05, %v2250_v42  ;;  %v2268_v0 = vadd.f32 1e-05, %v2252_v44  ;;  %v5212_v63 = vpack.c.bf16 %v2773_v25, %v2772_v57  ;;  %v2774_v42 = vld [vmem:[#allocation7 + $0x70] sm:$0xff]  ;;  %v2775_v44 = vld [vmem:[#allocation7 + $0x78] sm:$0xff] }
 0x45a   :  { %5535 = vrsqrt.f32 %v2265_v61  ;;  %v2939_v61 = vld [vmem:[#allocation6 + $0x380] sm:$0xff] }
 0x45b   :  { %5537 = vrsqrt.f32 %v2267_v62  ;;  %v5215_v62 = vpack.c.bf16 %v2775_v44, %v2774_v42 }
 0x45c   :  { %5539 = vrsqrt.f32 %v2266_v49  ;;  %v2940_v49 = vld [vmem:[#allocation6 + $0x388] sm:$0xff] }
 0x45d   :  { %5541 = vrsqrt.f32 %v2268_v0  ;;  %v5249_v0 = vpack.c.bf16 %v2940_v49, %v2939_v61 }
 0x464   :  { %v5536_v2 = vpop.eup %5535 }
 0x465   :  { %v5538_v7 = vpop.eup %5537  ;;  %v2297_v24 = vmul.f32 %v5536_v2, %v2121_v3  ;;  %v2456_v3 = vrot.slane %v6156_v59, %v6026_v22  ;;  %v5665_v22 = vmov 0.0|0.0  }
 0x466   :  { %v5540_v29 = vpop.eup %5539  ;;  %v2299_v31 = vmul.f32 %v5538_v7, %v2123_v60  ;;  %5193 = vmatprep.subr.bf16.mxu1 %v5665_v22  ;;  %5281 = vmatprep.subr.bf16.mxu0 %v5665_v22 }
 0x467   :  { %v5542_v9 = vpop.eup %5541  ;;  %v2395_v20 = vmul.f32 %v2354_v50, %v2297_v24  ;;  %v2298_v32 = vmul.f32 %v5540_v29, %v2122_v8  ;;  %v2760_v8 = vld [vmem:[#allocation7] sm:$0xff]  ;;  %v1935_v50 = vrot.slane %v6088_v36, %v5990_v15 }
 0x468   :  { %v2397_v26 = vmul.f32 %v2362_v6, %v2299_v31  ;;  %v2300_v27 = vmul.f32 %v5542_v9, %v6165_v21  ;;  %v5194_v35 = vpack.c.bf16 %v2761_v34, %v2760_v8  ;;  %v2763_v21 = vld [vmem:[#allocation7 + $0x18] sm:$0xff] }
 0x469   :  { %v2396_v33 = vmul.f32 %v2358_v51, %v2298_v32  ;;  %v6193_v60 = vadd.f32 %v2452_v28, %v2395_v20  ;;  %v5197_v4 = vpack.c.bf16 %v2763_v21, %v2762_v23  ;;  %v1985_v2 = vadd.f32 %v1935_v50, %v6098_v5  ;;  %v4035_v51 = vld [vmem:[%s6375_s9] ss:$0 sm:$0xff] }
 0x46a   :  { %v2398_v10 = vmul.f32 %v2366_v48, %v2300_v27  ;;  %v6195_v16 = vadd.f32 %v2460_v30, %v2397_v26  ;;  %5195 = vmatpush3.bf16.msra.mxu1 %v5194_v35  ;;  %v1931_v23 = vrot.slane %v6088_v36, %v5979_v11 }
 0x46b   :  { %v6197_v53 = vadd.f32 %v2456_v3, %v2396_v33  ;;  %5196 = vmatprep.subr.bf16.mxu1 %v5665_v22  ;;  %v2050_v6 = vrot.slane %v1985_v2, 4 }
 0x46c   :  { %v6199_v19 = vadd.f32 %v2464_v18, %v2398_v10  ;;  %v1984_v38 = vadd.f32 %v1931_v23, %v6094_v1  ;;  %v2944_v23 = vld [vmem:[#allocation6 + $0x3a8] sm:$0xff] }
 0x46d   :  { %v2051_v48 = vadd.f32 %v2050_v6, %v1985_v2 }
 0x46e   :  { %5198 = vmatpush3.bf16.msra.mxu1 %v5197_v4 }
 0x46f   :  { %5199 = vmatprep.subr.bf16.mxu1 %v5665_v22  ;;  %v2052_v32 = vrot.slane %v2051_v48, 2 }
 0x471   :  { %v2053_v27 = vadd.f32 %v2052_v32, %v2051_v48  ;;  %v2942_v32 = vld [vmem:[#allocation6 + $0x398] sm:$0xff] }
 0x472   :  { %5201 = vmatpush3.bf16.msra.mxu1 %v5200_v39 }
 0x473   :  { %5202 = vmatprep.subr.bf16.mxu1 %v5665_v22  ;;  %v2054_v33 = vrot.slane %v2053_v27, 1 }
 0x475   :  { %v2055_v34 = vadd.f32 %v2054_v33, %v2053_v27 }
 0x476   :  { %5204 = vmatpush3.bf16.msra.mxu1 %v5203_v41  ;;  %v2044_v41 = vrot.slane %v1984_v38, 4 }
 0x477   :  { %5205 = vmatprep.subr.bf16.mxu1 %v5665_v22  ;;  %v2102_v4 = vmul.f32 0.125, %v2055_v34  ;;  %v2504_v34 = vmax.f32 %v6138_v13, 0.0 }
 0x478   :  { %v2045_v54 = vadd.f32 %v2044_v41, %v1984_v38  ;;  %v2945_v41 = vld [vmem:[#allocation6 + $0x3b0] sm:$0xff] }
 0x479   :  { %v6223_v40 = vsub.f32 %v1985_v2, %v2102_v4 }
 0x47a   :  { %5207 = vmatpush3.bf16.msra.mxu1 %v5206_v47  ;;  %v2046_v42 = vrot.slane %v2045_v54, 2 }
 0x47b   :  { %5208 = vmatprep.subr.bf16.mxu1 %v5665_v22  ;;  %v2134_v45 = vmul.f32 %v6223_v40, %v6223_v40 }
 0x47d   :  { %v2195_v36 = vrot.slane %v2134_v45, 4 }
 0x47e   :  { %5210 = vmatpush3.bf16.msra.mxu1 %v5209_v55 }
 0x47f   :  { %5211 = vmatprep.subr.bf16.mxu1 %v5665_v22  ;;  %v2196_v44 = vadd.f32 %v2195_v36, %v2134_v45 }
 0x481   :  { %v2197_v49 = vrot.slane %v2196_v44, 2 }
 0x482   :  { %5213 = vmatpush3.bf16.msra.mxu1 %v5212_v63 }
 0x483   :  { %5214 = vmatprep.subr.bf16.mxu1 %v5665_v22  ;;  %v2198_v50 = vadd.f32 %v2197_v49, %v2196_v44  ;;  %v2932_v44 = vld [vmem:[#allocation6 + $0x348] sm:$0xff] }
 0x485   :  { %v2199_v6 = vrot.slane %v2198_v50, 1 }
 0x486   :  { %5216 = vmatpush3.bf16.msra.mxu1 %v5215_v62  ;;  %v2047_v62 = vadd.f32 %v2046_v42, %v2045_v54  ;;  %v2930_v54 = vld [vmem:[#allocation6 + $0x338] sm:$0xff] }
 0x487   :  { %5250 = vmatprep.subr.bf16.mxu1 %v5249_v0 }
 0x488   :  { %v2048_v0 = vrot.slane %v2047_v62, 1 }
 0x48a   :  { %v2049_v2 = vadd.f32 %v2048_v0, %v2047_v62  ;;  %v2950_v62 = vld [vmem:[#allocation6 + $0x3d8] sm:$0xff] }
 0x4e3   :  { %v4129_v7 = vpop.f32.mrb[8].mxu1 }
 0x4e4   :  { %v4164_v24 = vpop.f32.mrb[12].mxu0  ;;  %v4130_v28 = vpop.f32.mrb[9].mxu1 }
 0x4e5   :  { %v4131_v29 = vadd.f32 %v4130_v28, %v4129_v7  ;;  %v4165_v31 = vpop.f32.mrb[13].mxu0  ;;  %v2101_v28 = vmul.f32 0.125, %v2049_v2  ;;  %v2933_v2 = vld [vmem:[#allocation6 + $0x350] sm:$0xff] }
 0x4e6   :  { %v4166_v30 = vadd.f32 %v4165_v31, %v4164_v24  ;;  %v4036_v24 = vld [vmem:[%s6376_s10] ss:$0 sm:$0xff]  ;;  %v2200_v31 = vadd.f32 %v2199_v6, %v2198_v50  ;;  %v2934_v6 = vld [vmem:[#allocation6 + $0x358] sm:$0xff] }
 0x4e7   :  { %v2651_v9 = vadd.f32 %v4131_v29, %v4035_v51  ;;  %v4037_v29 = vld [vmem:[%s6377_s11] ss:$0 sm:$0xff] }
 0x4e9   :  { %v2721_v20 = vadd.f32 %v4166_v30, %v2651_v9  ;;  %v2923_v30 = vld [vmem:[#allocation6 + $0x300] sm:$0xff]  ;;  %v2924_v9 = vld [vmem:[#allocation6 + $0x308] sm:$0xff] }
 0x4ea   :  { %v5251_v27 = vpack.c.bf16 %v2924_v9, %v2923_v30  ;;  %v2936_v30 = vld [vmem:[#allocation6 + $0x368] sm:$0xff] }
 0x4eb   :  { %v2726_v3 = vrot.slane %v2721_v20, 4 }
 0x4ed   :  { %v2727_v26 = vadd.f32 %v2726_v3, %v2721_v20 }
 0x4ef   :  { %v2728_v18 = vrot.slane %v2727_v26, 2 }
 0x4f1   :  { %v2729_v5 = vadd.f32 %v2728_v18, %v2727_v26  ;;  %v6235_v26 = vsub.f32 %v1984_v38, %v2101_v28  ;;  %v2246_v18 = vmul.f32 0.125, %v2200_v31 }
 0x4f3   :  { %v2730_v10 = vrot.slane %v2729_v5, 1 }
 0x4f5   :  { %v2731_v8 = vadd.f32 %v2730_v10, %v2729_v5  ;;  %v2925_v10 = vld [vmem:[#allocation6 + $0x310] sm:$0xff] }
 0x4f7   :  { %v2732_v35 = vmul.f32 0.125, %v2731_v8  ;;  %v2926_v8 = vld [vmem:[#allocation6 + $0x318] sm:$0xff] }
 0x4f8   :  { %v5255_v4 = vpack.c.bf16 %v2926_v8, %v2925_v10  ;;  %v2938_v10 = vld [vmem:[#allocation6 + $0x378] sm:$0xff]  ;;  %v3286_v8 = vld [vmem:[#allocation6 + $0x480] sm:$0xff] }
 0x4f9   :  { %v2733_v21 = vsub.f32 %v2721_v20, %v2732_v35  ;;  %v2941_v20 = vld [vmem:[#allocation6 + $0x390] sm:$0xff]  ;;  %v2943_v35 = vld [vmem:[#allocation6 + $0x3a0] sm:$0xff] }
 0x4fa   :  { %v5253_v33 = vpack.c.bf16 %v2942_v32, %v2941_v20  ;;  %v5257_v38 = vpack.c.bf16 %v2944_v23, %v2943_v35  ;;  %v2953_v20 = vld [vmem:[#allocation6 + $0x3f0] sm:$0xff]  ;;  %v2954_v32 = vld [vmem:[#allocation6 + $0x3f8] sm:$0xff]  ;;  %v2440_v23 = vrot.slane %v6156_v59, %v5990_v15 }
 0x4fb   :  { %v2734_v37 = vmul.f32 %v2733_v21, %v2733_v21 }
 0x4fd   :  { %v2735_v39 = vrot.slane %v2734_v37, 4 }
 0x4ff   :  { %v2736_v58 = vadd.f32 %v2735_v39, %v2734_v37  ;;  %v2262_v37 = vadd.f32 1e-05, %v2246_v18  ;;  %v2927_v39 = vld [vmem:[#allocation6 + $0x320] sm:$0xff] }
 0x501   :  { %v2737_v17 = vrot.slane %v2736_v58, 2 }
 0x503   :  { %v2738_v47 = vadd.f32 %v2737_v17, %v2736_v58  ;;  %v2928_v58 = vld [vmem:[#allocation6 + $0x328] sm:$0xff]  ;;  %v2946_v17 = vld [vmem:[#allocation6 + $0x3b8] sm:$0xff] }
 0x504   :  { %v4216_v56 = vpop.f32.mrb[14].mxu0  ;;  %v5261_v13 = vpack.c.bf16 %v2946_v17, %v2945_v41  ;;  %v3289_v41 = vld [vmem:[#allocation6 + $0x498] sm:$0xff] }
 0x505   :  { %v2739_v55 = vrot.slane %v2738_v47, 1  ;;  %v4217_v57 = vpop.f32.mrb[15].mxu0 }
 0x506   :  { %v6227_v25 = vadd.f32 %v4217_v57, %v4216_v56  ;;  %v2929_v56 = vld [vmem:[#allocation6 + $0x330] sm:$0xff]  ;;  %v2948_v57 = vld [vmem:[#allocation6 + $0x3c8] sm:$0xff] }
 0x507   :  { %v2740_v63 = vadd.f32 %v2739_v55, %v2738_v47  ;;  %v5259_v47 = vpack.c.bf16 %v2928_v58, %v2927_v39  ;;  %v2947_v55 = vld [vmem:[#allocation6 + $0x3c0] sm:$0xff]  ;;  %v3288_v58 = vld [vmem:[#allocation6 + $0x490] sm:$0xff] }
 0x508   :  { %v5265_v42 = vpack.c.bf16 %v2948_v57, %v2947_v55  ;;  %v3290_v55 = vld [vmem:[#allocation6 + $0x4a0] sm:$0xff]  ;;  %v3291_v57 = vld [vmem:[#allocation6 + $0x4a8] sm:$0xff] }
 0x509   :  { %v2741_v1 = vmul.f32 0.125, %v2740_v63  ;;  %v5263_v63 = vpack.c.bf16 %v2930_v54, %v2929_v56  ;;  %v3272_v56 = vld [vmem:[#allocation6 + $0x410] sm:$0xff]  ;;  %v3273_v54 = vld [vmem:[#allocation6 + $0x418] sm:$0xff] }
 0x50b   :  { %v2742_v61 = vadd.f32 1e-05, %v2741_v1  ;;  %v2931_v1 = vld [vmem:[#allocation6 + $0x340] sm:$0xff] }
 0x50c   :  { %v5267_v0 = vpack.c.bf16 %v2932_v44, %v2931_v1  ;;  %v3274_v1 = vld [vmem:[#allocation6 + $0x420] sm:$0xff]  ;;  %v3275_v44 = vld [vmem:[#allocation6 + $0x428] sm:$0xff] }
 0x50d   :  { %5543 = vrsqrt.f32 %v2742_v61  ;;  %v2949_v61 = vld [vmem:[#allocation6 + $0x3d0] sm:$0xff] }
 0x50e   :  { %5545 = vrsqrt.f32 %v2262_v37  ;;  %v5269_v50 = vpack.c.bf16 %v2950_v62, %v2949_v61  ;;  %v3270_v37 = vld [vmem:[#allocation6 + $0x400] sm:$0xff]  ;;  %v3292_v61 = vld [vmem:[#allocation6 + $0x4b0] sm:$0xff]  ;;  %v3293_v62 = vld [vmem:[#allocation6 + $0x4b8] sm:$0xff] }
 0x517   :  { %v5544_v7 = vpop.eup %5543 }
 0x518   :  { %v2744_v51 = vmul.f32 %v5544_v7, %v2733_v21  ;;  %v2133_v21 = vmul.f32 %v6235_v26, %v6235_v26  ;;  %v2951_v7 = vld [vmem:[#allocation6 + $0x3e0] sm:$0xff] }
 0x51a   :  { %v2751_v48 = vmul.f32 %v4036_v24, %v2744_v51  ;;  %v2189_v45 = vrot.slane %v2133_v21, 4  ;;  %v2952_v24 = vld [vmem:[#allocation6 + $0x3e8] sm:$0xff]  ;;  %v5546_v51 = vpop.eup %5545 }
 0x51b   :  { %v5273_v31 = vpack.c.bf16 %v2952_v24, %v2951_v7  ;;  %v2294_v9 = vmul.f32 %v5546_v51, %v6223_v40  ;;  %v3278_v51 = vld [vmem:[#allocation6 + $0x440] sm:$0xff] }
 0x51c   :  { %v2758_v3 = vadd.f32 %v4037_v29, %v2751_v48  ;;  %v2190_v36 = vadd.f32 %v2189_v45, %v2133_v21  ;;  %v5271_v29 = vpack.c.bf16 %v2934_v6, %v2933_v2  ;;  %v2935_v48 = vld [vmem:[#allocation6 + $0x360] sm:$0xff]  ;;  %v3295_v6 = vld [vmem:[#allocation6 + $0x4c8] sm:$0xff] }
 0x51d   :  { %v5275_v18 = vpack.c.bf16 %v2936_v30, %v2935_v48  ;;  %v3294_v2 = vld [vmem:[#allocation6 + $0x4c0] sm:$0xff] }
 0x51e   :  { %v2759_v5 = vmax.f32 %v2758_v3, 0.0  ;;  %v2191_v49 = vrot.slane %v2190_v36, 2  ;;  %v2342_v3 = vrot.slane %v6151_v14, %v5990_v15  ;;  %v5321_v24 = vpack.c.bf16 %v3295_v6, %v3294_v2  ;;  %v3318_v2 = vld [vmem:[#allocation6 + $0x580] sm:$0xff] }
 0x520   :  { %4478 = vmatmul.mubr.f32.vlgmr.msra.gmra.mrb[10].mxu1 %v2759_v5  ;;  %v2192_v28 = vadd.f32 %v2191_v49, %v2190_v36  ;;  %v5277_v5 = vpack.c.bf16 %v2954_v32, %v2953_v20  ;;  %v2392_v35 = vmul.f32 %v2342_v3, %v2294_v9  ;;  %v5317_v49 = vpack.c.bf16 %v3293_v62, %v3292_v61  ;;  %v3280_v9 = vld [vmem:[#allocation6 + $0x450] sm:$0xff]  ;;  %v3281_v20 = vld [vmem:[#allocation6 + $0x458] sm:$0xff]  ;;  %v3298_v3 = vld [vmem:[#allocation6 + $0x4e0] sm:$0xff] }
 0x521   :  { %5252 = vmatpush3.bf16.msra.mxu1 %v5251_v27  ;;  %3096 = vmatprep.mubr.f32.mxu1 %v2504_v34  ;;  %v3287_v34 = vld [vmem:[#allocation6 + $0x488] sm:$0xff]  ;;  %v3151_v62 = vld [vmem:[#allocation7 + $0xe0] sm:$0xff] }
 0x522   :  { %5254 = vmatprep.subr.bf16.mxu1 %v5253_v33  ;;  %v2193_v27 = vrot.slane %v2192_v28, 1  ;;  %v2937_v33 = vld [vmem:[#allocation6 + $0x370] sm:$0xff]  ;;  %v2490_v39 = vadd.f32 %v2440_v23, %v2392_v35  ;;  %v3301_v23 = vld [vmem:[#allocation6 + $0x4f8] sm:$0xff] }
 0x523   :  { %v5279_v40 = vpack.c.bf16 %v2938_v10, %v2937_v33  ;;  %v2338_v33 = vrot.slane %v6151_v14, %v5979_v11  ;;  %v3300_v35 = vld [vmem:[#allocation6 + $0x4f0] sm:$0xff] }
 0x524   :  { %v2194_v21 = vadd.f32 %v2193_v27, %v2192_v28  ;;  %v2506_v15 = vmax.f32 %v2490_v39, 0.0  ;;  %v3279_v28 = vld [vmem:[#allocation6 + $0x448] sm:$0xff]  ;;  %v2436_v39 = vrot.slane %v6156_v59, %v5979_v11  ;;  %v3142_v11 = vld [vmem:[#allocation7 + $0x98] sm:$0xff] }
 0x525   :  { %5256 = vmatpush3.bf16.msra.mxu1 %v5255_v4  ;;  %v5305_v4 = vpack.c.bf16 %v3287_v34, %v3286_v8  ;;  %v5323_v48 = vpack.c.bf16 %v3279_v28, %v3278_v51  ;;  %v3299_v27 = vld [vmem:[#allocation6 + $0x4e8] sm:$0xff]  ;;  %v3282_v8 = vld [vmem:[#allocation6 + $0x460] sm:$0xff] }
 0x526   :  { %5258 = vmatprep.subr.bf16.mxu1 %v5257_v38  ;;  %v3271_v38 = vld [vmem:[#allocation6 + $0x408] sm:$0xff]  ;;  %v2245_v17 = vmul.f32 0.125, %v2194_v21  ;;  %v5329_v10 = vpack.c.bf16 %v3299_v27, %v3298_v3  ;;  %v4038_v51 = vld [vmem:[%s6379_s13] ss:$0 sm:$0xff] }
 0x527   :  { %v5307_v45 = vpack.c.bf16 %v3271_v38, %v3270_v37  ;;  %v3283_v34 = vld [vmem:[#allocation6 + $0x468] sm:$0xff]  ;;  %v3284_v37 = vld [vmem:[#allocation6 + $0x470] sm:$0xff]  ;;  %v3285_v38 = vld [vmem:[#allocation6 + $0x478] sm:$0xff] }
 0x528   :  { %v2261_v36 = vadd.f32 1e-05, %v2245_v17  ;;  %v5331_v21 = vpack.c.bf16 %v3283_v34, %v3282_v8  ;;  %v3140_v17 = vld [vmem:[#allocation7 + $0x88] sm:$0xff] }
 0x529   :  { %5260 = vmatpush3.bf16.msra.mxu1 %v5259_v47  ;;  %v2503_v47 = vmax.f32 %v6136_v46, 0.0  ;;  %v5315_v46 = vpack.c.bf16 %v3275_v44, %v3274_v1  ;;  %v3149_v1 = vld [vmem:[#allocation7 + $0xd0] sm:$0xff]  ;;  %v3150_v44 = vld [vmem:[#allocation7 + $0xd8] sm:$0xff] }
 0x52a   :  { %5262 = vmatprep.subr.bf16.mxu1 %v5261_v13  ;;  %v5309_v13 = vpack.c.bf16 %v3289_v41, %v3288_v58  ;;  %5547 = vrsqrt.f32 %v2261_v36  ;;  %v3139_v41 = vld [vmem:[#allocation7 + $0x80] sm:$0xff]  ;;  %v5297_v61 = vpack.c.bf16 %v3150_v44, %v3149_v1 }
 0x52b   :  { %v3147_v36 = vld [vmem:[#allocation7 + $0xc0] sm:$0xff] }
 0x52d   :  { %5264 = vmatpush3.bf16.msra.mxu1 %v5263_v63  ;;  %v5311_v63 = vpack.c.bf16 %v3273_v54, %v3272_v56  ;;  %v3144_v56 = vld [vmem:[#allocation7 + $0xa8] sm:$0xff] }
 0x52e   :  { %5266 = vmatprep.subr.bf16.mxu1 %v5265_v42  ;;  %v5313_v42 = vpack.c.bf16 %v3291_v57, %v3290_v55  ;;  %v3146_v55 = vld [vmem:[#allocation7 + $0xb8] sm:$0xff] }
 0x531   :  { %5268 = vmatpush3.bf16.msra.mxu1 %v5267_v0  ;;  %v3276_v0 = vld [vmem:[#allocation6 + $0x430] sm:$0xff] }
 0x532   :  { %5270 = vmatprep.subr.bf16.mxu1 %v5269_v50  ;;  %v3277_v50 = vld [vmem:[#allocation6 + $0x438] sm:$0xff] }
 0x533   :  { %v5319_v7 = vpack.c.bf16 %v3277_v50, %v3276_v0  ;;  %v3153_v0 = vld [vmem:[#allocation7 + $0xf0] sm:$0xff]  ;;  %v3154_v50 = vld [vmem:[#allocation7 + $0xf8] sm:$0xff] }
 0x534   :  { %v5548_v32 = vpop.eup %5547  ;;  %v5303_v6 = vpack.c.bf16 %v3154_v50, %v3153_v0 }
 0x535   :  { %5272 = vmatpush3.bf16.msra.mxu1 %v5271_v29  ;;  %v3296_v29 = vld [vmem:[#allocation6 + $0x4d0] sm:$0xff] }
 0x536   :  { %5274 = vmatprep.subr.bf16.mxu1 %v5273_v31  ;;  %v3297_v31 = vld [vmem:[#allocation6 + $0x4d8] sm:$0xff] }
 0x537   :  { %v5325_v30 = vpack.c.bf16 %v3297_v31, %v3296_v29 }
 0x539   :  { %5276 = vmatpush3.bf16.msra.mxu1 %v5275_v18  ;;  %v5327_v18 = vpack.c.bf16 %v3281_v20, %v3280_v9 }
 0x53a   :  { %5278 = vmatprep.subr.bf16.mxu1 %v5277_v5  ;;  %v2293_v5 = vmul.f32 %v5548_v32, %v6235_v26  ;;  %v5335_v26 = vpack.c.bf16 %v3285_v38, %v3284_v37 }
 0x53d   :  { %5280 = vmatpush3.bf16.msra.mxu1 %v5279_v40  ;;  %v2391_v40 = vmul.f32 %v2338_v33, %v2293_v5 }
 0x53e   :  { %5306 = vmatprep.subr.bf16.mxu1 %v5305_v4  ;;  %v5333_v4 = vpack.c.bf16 %v3301_v23, %v3300_v35  ;;  %v4041_v23 = vld [vmem:[%s6375_s9 + $0x1] ss:$0 sm:$0xff] }
 0x53f   :  { %v2489_v14 = vadd.f32 %v2436_v39, %v2391_v40  ;;  %v3029_v38 = vadd.f32 %v6227_v25, %v4041_v23  ;;  %v4040_v25 = vld [vmem:[%s6381_s15] ss:$0 sm:$0xff] }
 0x540   :  { %3097 = vmatmul.mubr.f32.vlgmr.msra.gmra.mrb[12].mxu1 %v2503_v47  ;;  %v3141_v47 = vld [vmem:[#allocation7 + $0x90] sm:$0xff]  ;;  %v3306_v23 = vld [vmem:[#allocation6 + $0x520] sm:$0xff] }
 0x541   :  { %5308 = vmatpush3.bf16.msra.mxu1 %v5307_v45  ;;  %3405 = vmatprep.mubr.f32.mxu1 %v2506_v15  ;;  %v2505_v58 = vmax.f32 %v2489_v14, 0.0  ;;  %v5282_v45 = vpack.c.bf16 %v3140_v17, %v3139_v41  ;;  %v5285_v59 = vpack.c.bf16 %v3142_v11, %v3141_v47  ;;  %v3145_v15 = vld [vmem:[#allocation7 + $0xb0] sm:$0xff] }
 0x542   :  { %5310 = vmatprep.subr.bf16.mxu1 %v5309_v13  ;;  %v3143_v13 = vld [vmem:[#allocation7 + $0xa0] sm:$0xff]  ;;  %v5291_v57 = vpack.c.bf16 %v3146_v55, %v3145_v15 }
 0x543   :  { %5283 = vmatpush3.bf16.msra.mxu0 %v5282_v45  ;;  %v5288_v54 = vpack.c.bf16 %v3144_v56, %v3143_v13 }
 0x544   :  { %5284 = vmatprep.subr.bf16.mxu0 %v5665_v22 }
 0x545   :  { %5312 = vmatpush3.bf16.msra.mxu1 %v5311_v63  ;;  %v3148_v63 = vld [vmem:[#allocation7 + $0xc8] sm:$0xff] }
 0x546   :  { %5314 = vmatprep.subr.bf16.mxu1 %v5313_v42  ;;  %v5294_v42 = vpack.c.bf16 %v3148_v63, %v3147_v36 }
 0x547   :  { %5286 = vmatpush3.bf16.msra.mxu0 %v5285_v59  ;;  %v4039_v59 = vld [vmem:[%s6380_s14] ss:$0 sm:$0xff] }
 0x548   :  { %5287 = vmatprep.subr.bf16.mxu0 %v5665_v22 }
 0x549   :  { %5316 = vmatpush3.bf16.msra.mxu1 %v5315_v46  ;;  %v3152_v46 = vld [vmem:[#allocation7 + $0xe8] sm:$0xff] }
 0x54a   :  { %5318 = vmatprep.subr.bf16.mxu1 %v5317_v49  ;;  %v5300_v49 = vpack.c.bf16 %v3152_v46, %v3151_v62 }
 0x54b   :  { %5289 = vmatpush3.bf16.msra.mxu0 %v5288_v54 }
 0x54c   :  { %5290 = vmatprep.subr.bf16.mxu0 %v5665_v22 }
 0x54d   :  { %5320 = vmatpush3.bf16.msra.mxu1 %v5319_v7  ;;  %v3319_v7 = vld [vmem:[#allocation6 + $0x588] sm:$0xff] }
 0x54e   :  { %5322 = vmatprep.subr.bf16.mxu1 %v5321_v24  ;;  %v5337_v24 = vpack.c.bf16 %v3319_v7, %v3318_v2 }
 0x54f   :  { %5292 = vmatpush3.bf16.msra.mxu0 %v5291_v57 }
 0x550   :  { %5293 = vmatprep.subr.bf16.mxu0 %v5665_v22 }
 0x551   :  { %5324 = vmatpush3.bf16.msra.mxu1 %v5323_v48 }
 0x552   :  { %5326 = vmatprep.subr.bf16.mxu1 %v5325_v30 }
 0x553   :  { %5295 = vmatpush3.bf16.msra.mxu0 %v5294_v42 }
 0x554   :  { %5296 = vmatprep.subr.bf16.mxu0 %v5665_v22 }
 0x555   :  { %5328 = vmatpush3.bf16.msra.mxu1 %v5327_v18 }
 0x556   :  { %5330 = vmatprep.subr.bf16.mxu1 %v5329_v10 }
 0x557   :  { %5298 = vmatpush3.bf16.msra.mxu0 %v5297_v61 }
 0x558   :  { %5299 = vmatprep.subr.bf16.mxu0 %v5665_v22 }
 0x559   :  { %5332 = vmatpush3.bf16.msra.mxu1 %v5331_v21 }
 0x55a   :  { %5334 = vmatprep.subr.bf16.mxu1 %v5333_v4 }
 0x55b   :  { %5301 = vmatpush3.bf16.msra.mxu0 %v5300_v49 }
 0x55c   :  { %5302 = vmatprep.subr.bf16.mxu0 %v5665_v22 }
 0x55d   :  { %5336 = vmatpush3.bf16.msra.mxu1 %v5335_v26 }
 0x55e   :  { %5369 = vmatprep.subr.bf16.mxu1 %v5665_v22 }
 0x55f   :  { %5304 = vmatpush3.bf16.msra.mxu0 %v5303_v6 }
 0x560   :  { %3406 = vmatmul.mubr.f32.vlgmr.msra.gmra.mrb[14].mxu1 %v2505_v58  ;;  %5338 = vmatprep.subr.bf16.mxu0 %v5337_v24  ;;  %v4042_v24 = vld [vmem:[%s6376_s10 + $0x1] ss:$0 sm:$0xff] }
 0x561   :  { %4547 = vmatprep.mubr.msk.f32.mxu1 %vm5666_vm0, %v5664_v43 }
 0x5f3   :  { %v2849_v28 = vpop.f32.mrb[10].mxu1 }
 0x5f4   :  { %v2850_v29 = vadd.f32 %v4038_v51, %v2849_v28  ;;  %v4479_v31 = vpop.f32.mrb[11].mxu1  ;;  %v4043_v28 = vld [vmem:[%s6377_s11 + $0x1] ss:$0 sm:$0xff] }
 0x5f5   :  { %v3302_v31 = vld [vmem:[#allocation6 + $0x500] sm:$0xff] }
 0x5f6   :  { %v2855_v48 = vrot.slane %v2850_v29, 4 }
 0x5f8   :  { %v2856_v30 = vadd.f32 %v2855_v48, %v2850_v29  ;;  %v3303_v48 = vld [vmem:[#allocation6 + $0x508] sm:$0xff] }
 0x5fa   :  { %v2857_v9 = vrot.slane %v2856_v30, 2 }
 0x5fc   :  { %v2858_v20 = vadd.f32 %v2857_v9, %v2856_v30  ;;  %v3320_v30 = vld [vmem:[#allocation6 + $0x590] sm:$0xff]  ;;  %v3321_v9 = vld [vmem:[#allocation6 + $0x598] sm:$0xff] }
 0x5fe   :  { %v2859_v32 = vrot.slane %v2858_v20, 1 }
 0x600   :  { %v2860_v3 = vadd.f32 %v2859_v32, %v2858_v20  ;;  %v5339_v32 = vpack.c.bf16 %v3303_v48, %v3302_v31  ;;  %v2507_v31 = vmax.f32 %v6172_v12, 0.0 }
 0x602   :  { %v2861_v27 = vmul.f32 0.125, %v2860_v3 }
 0x604   :  { %v2862_v18 = vsub.f32 %v2850_v29, %v2861_v27  ;;  %v5341_v27 = vpack.c.bf16 %v3321_v9, %v3320_v30  ;;  %v3651_v30 = vld [vmem:[#allocation6 + $0x610] sm:$0xff]  ;;  %v3652_v9 = vld [vmem:[#allocation6 + $0x618] sm:$0xff] }
 0x606   :  { %v2863_v5 = vmul.f32 %v2862_v18, %v2862_v18 }
 0x608   :  { %v2864_v33 = vrot.slane %v2863_v5, 4 }
 0x60a   :  { %v2865_v10 = vadd.f32 %v2864_v33, %v2863_v5  ;;  %v3305_v5 = vld [vmem:[#allocation6 + $0x518] sm:$0xff]  ;;  %v2508_v33 = vmax.f32 %v6174_v52, 0.0  ;;  %v3327_v52 = vld [vmem:[#allocation6 + $0x5c8] sm:$0xff] }
 0x60c   :  { %v2866_v8 = vrot.slane %v2865_v10, 2 }
 0x60e   :  { %v2867_v34 = vadd.f32 %v2866_v8, %v2865_v10  ;;  %v3322_v10 = vld [vmem:[#allocation6 + $0x5a0] sm:$0xff]  ;;  %v3323_v8 = vld [vmem:[#allocation6 + $0x5a8] sm:$0xff] }
 0x610   :  { %v2868_v35 = vrot.slane %v2867_v34, 1 }
 0x612   :  { %v2869_v21 = vadd.f32 %v2868_v35, %v2867_v34  ;;  %v5345_v35 = vpack.c.bf16 %v3323_v8, %v3322_v10  ;;  %v3671_v10 = vld [vmem:[#allocation6 + $0x6b0] sm:$0xff]  ;;  %v3672_v8 = vld [vmem:[#allocation6 + $0x6b8] sm:$0xff] }
 0x613   :  { %v4251_v40 = vpop.f32.mrb[12].mxu1 }
 0x614   :  { %v2870_v4 = vmul.f32 0.125, %v2869_v21  ;;  %v4252_v37 = vpop.f32.mrb[13].mxu1  ;;  %v3307_v21 = vld [vmem:[#allocation6 + $0x528] sm:$0xff] }
 0x615   :  { %v4253_v39 = vadd.f32 %v4252_v37, %v4251_v40  ;;  %v3324_v40 = vld [vmem:[#allocation6 + $0x5b0] sm:$0xff]  ;;  %v5347_v37 = vpack.c.bf16 %v3307_v21, %v3306_v23  ;;  %v3656_v23 = vld [vmem:[#allocation6 + $0x638] sm:$0xff]  ;;  %v3673_v21 = vld [vmem:[#allocation6 + $0x6c0] sm:$0xff] }
 0x616   :  { %v2871_v26 = vadd.f32 1e-05, %v2870_v4  ;;  %v3325_v4 = vld [vmem:[#allocation6 + $0x5b8] sm:$0xff] }
 0x617   :  { %v3099_v14 = vadd.f32 %v4253_v39, %v3029_v38  ;;  %v5349_v38 = vpack.c.bf16 %v3325_v4, %v3324_v40  ;;  %v3308_v39 = vld [vmem:[#allocation6 + $0x530] sm:$0xff] }
 0x618   :  { %5549 = vrsqrt.f32 %v2871_v26  ;;  %v3309_v26 = vld [vmem:[#allocation6 + $0x538] sm:$0xff] }
 0x619   :  { %v3104_v58 = vrot.slane %v3099_v14, 4 }
 0x61b   :  { %v3105_v41 = vadd.f32 %v3104_v58, %v3099_v14  ;;  %v5351_v58 = vpack.c.bf16 %v3309_v26, %v3308_v39  ;;  %v3675_v39 = vld [vmem:[#allocation6 + $0x6d0] sm:$0xff]  ;;  %v3676_v26 = vld [vmem:[#allocation6 + $0x6d8] sm:$0xff] }
 0x61d   :  { %v3106_v17 = vrot.slane %v3105_v41, 2 }
 0x61f   :  { %v3107_v45 = vadd.f32 %v3106_v17, %v3105_v41  ;;  %v3310_v17 = vld [vmem:[#allocation6 + $0x540] sm:$0xff] }
 0x621   :  { %v3108_v47 = vrot.slane %v3107_v45, 1 }
 0x622   :  { %v5550_v11 = vpop.eup %5549 }
 0x623   :  { %v2873_v13 = vmul.f32 %v5550_v11, %v2862_v18  ;;  %v3109_v56 = vadd.f32 %v3108_v47, %v3107_v45  ;;  %v3304_v18 = vld [vmem:[#allocation6 + $0x510] sm:$0xff]  ;;  %v3311_v45 = vld [vmem:[#allocation6 + $0x548] sm:$0xff]  ;;  %v3329_v11 = vld [vmem:[#allocation6 + $0x5d8] sm:$0xff] }
 0x624   :  { %v5343_v34 = vpack.c.bf16 %v3305_v5, %v3304_v18  ;;  %v3328_v47 = vld [vmem:[#allocation6 + $0x5d0] sm:$0xff]  ;;  %v3653_v5 = vld [vmem:[#allocation6 + $0x620] sm:$0xff] }
 0x625   :  { %v2880_v54 = vmul.f32 %v4039_v59, %v2873_v13  ;;  %v3110_v15 = vmul.f32 0.125, %v3109_v56  ;;  %v5355_v59 = vpack.c.bf16 %v3311_v45, %v3310_v17  ;;  %v5357_v13 = vpack.c.bf16 %v3329_v11, %v3328_v47  ;;  %v3312_v56 = vld [vmem:[#allocation6 + $0x550] sm:$0xff]  ;;  %v3677_v17 = vld [vmem:[#allocation6 + $0x6e0] sm:$0xff]  ;;  %v3678_v45 = vld [vmem:[#allocation6 + $0x6e8] sm:$0xff] }
 0x626   :  { %v5417_v11 = vpack.c.bf16 %v3678_v45, %v3677_v17 }
 0x627   :  { %v2887_v55 = vadd.f32 %v4040_v25, %v2880_v54  ;;  %v3111_v57 = vsub.f32 %v3099_v14, %v3110_v15  ;;  %v3326_v14 = vld [vmem:[#allocation6 + $0x5c0] sm:$0xff]  ;;  %v3313_v25 = vld [vmem:[#allocation6 + $0x558] sm:$0xff]  ;;  %v3331_v15 = vld [vmem:[#allocation6 + $0x5e8] sm:$0xff] }
 0x628   :  { %v5353_v41 = vpack.c.bf16 %v3327_v52, %v3326_v14  ;;  %v3330_v54 = vld [vmem:[#allocation6 + $0x5e0] sm:$0xff]  ;;  %v5413_v52 = vpack.c.bf16 %v3676_v26, %v3675_v39 }
 0x629   :  { %v2888_v36 = vmax.f32 %v2887_v55, 0.0  ;;  %v3112_v63 = vmul.f32 %v3111_v57, %v3111_v57  ;;  %v5359_v55 = vpack.c.bf16 %v3313_v25, %v3312_v56  ;;  %v3679_v56 = vld [vmem:[#allocation6 + $0x6f0] sm:$0xff]  ;;  %v3680_v25 = vld [vmem:[#allocation6 + $0x6f8] sm:$0xff] }
 0x62b   :  { %2889 = vst [vmem:[%s6382_s16] sm:$0xff] %v2888_v36  ;;  %v3113_v42 = vrot.slane %v3112_v63, 4  ;;  %v3314_v36 = vld [vmem:[#allocation6 + $0x560] sm:$0xff] }
 0x62d   :  { %v3114_v1 = vadd.f32 %v3113_v42, %v3112_v63  ;;  %v3315_v63 = vld [vmem:[#allocation6 + $0x568] sm:$0xff]  ;;  %v3332_v42 = vld [vmem:[#allocation6 + $0x5f0] sm:$0xff] }
 0x62f   :  { %v3115_v44 = vrot.slane %v3114_v1, 2 }
 0x631   :  { %v3116_v61 = vadd.f32 %v3115_v44, %v3114_v1  ;;  %v3333_v1 = vld [vmem:[#allocation6 + $0x5f8] sm:$0xff]  ;;  %v5363_v44 = vpack.c.bf16 %v3315_v63, %v3314_v36  ;;  %v2509_v63 = vmax.f32 %v6193_v60, 0.0  ;;  %v3523_v60 = vld [vmem:[#allocation7 + $0x128] sm:$0xff] }
 0x633   :  { %v3117_v62 = vrot.slane %v3116_v61, 1  ;;  %v4303_v46 = vpop.f32.mrb[14].mxu1 }
 0x634   :  { %v4304_v49 = vpop.f32.mrb[15].mxu1 }
 0x635   :  { %v3118_v0 = vadd.f32 %v3117_v62, %v3116_v61  ;;  %v6277_v50 = vadd.f32 %v4304_v49, %v4303_v46  ;;  %v5365_v61 = vpack.c.bf16 %v3333_v1, %v3332_v42  ;;  %v3316_v62 = vld [vmem:[#allocation6 + $0x570] sm:$0xff]  ;;  %v3317_v46 = vld [vmem:[#allocation6 + $0x578] sm:$0xff]  ;;  %v3665_v49 = vld [vmem:[#allocation6 + $0x680] sm:$0xff] }
 0x636   :  { %v3518_v42 = vld [vmem:[#allocation7 + $0x100] sm:$0xff]  ;;  %v3519_v1 = vld [vmem:[#allocation7 + $0x108] sm:$0xff] }
 0x637   :  { %v3119_v2 = vmul.f32 0.125, %v3118_v0  ;;  %v3666_v0 = vld [vmem:[#allocation6 + $0x688] sm:$0xff] }
 0x639   :  { %v3120_v6 = vadd.f32 1e-05, %v3119_v2  ;;  %v5367_v2 = vpack.c.bf16 %v3317_v46, %v3316_v62  ;;  %v3521_v62 = vld [vmem:[#allocation7 + $0x118] sm:$0xff] }
 0x63b   :  { %5551 = vrsqrt.f32 %v3120_v6  ;;  %v5393_v6 = vpack.c.bf16 %v3666_v0, %v3665_v49  ;;  %v3522_v49 = vld [vmem:[#allocation7 + $0x120] sm:$0xff] }
 0x63c   :  { %v5376_v0 = vpack.c.bf16 %v3523_v60, %v3522_v49 }
 0x645   :  { %v5552_v7 = vpop.eup %5551 }
 0x646   :  { %v3122_v51 = vmul.f32 %v5552_v7, %v3111_v57  ;;  %v5361_v57 = vpack.c.bf16 %v3331_v15, %v3330_v54  ;;  %v3649_v7 = vld [vmem:[#allocation6 + $0x600] sm:$0xff]  ;;  %v5421_v15 = vpack.c.bf16 %v3680_v25, %v3679_v56 }
 0x648   :  { %v3129_v29 = vmul.f32 %v4042_v24, %v3122_v51  ;;  %v3650_v24 = vld [vmem:[#allocation6 + $0x608] sm:$0xff]  ;;  %v3667_v51 = vld [vmem:[#allocation6 + $0x690] sm:$0xff] }
 0x64a   :  { %v3136_v20 = vadd.f32 %v4043_v28, %v3129_v29  ;;  %v3668_v28 = vld [vmem:[#allocation6 + $0x698] sm:$0xff]  ;;  %v5395_v29 = vpack.c.bf16 %v3650_v24, %v3649_v7  ;;  %v3526_v7 = vld [vmem:[#allocation7 + $0x140] sm:$0xff]  ;;  %v3527_v24 = vld [vmem:[#allocation7 + $0x148] sm:$0xff] }
 0x64b   :  { %v5397_v48 = vpack.c.bf16 %v3668_v28, %v3667_v51  ;;  %v5382_v51 = vpack.c.bf16 %v3527_v24, %v3526_v7  ;;  %v3528_v28 = vld [vmem:[#allocation7 + $0x150] sm:$0xff] }
 0x64c   :  { %v3137_v3 = vmax.f32 %v3136_v20, 0.0  ;;  %v2510_v20 = vmax.f32 %v6197_v53, 0.0  ;;  %v3674_v53 = vld [vmem:[#allocation6 + $0x6c8] sm:$0xff] }
 0x64d   :  { %v5409_v4 = vpack.c.bf16 %v3674_v53, %v3673_v21 }
 0x64e   :  { %4513 = vmatmul.mubr.f32.vlgmr.msra.gmra.mrb[16].mxu0 %v3137_v3  ;;  %v3670_v3 = vld [vmem:[#allocation6 + $0x6a8] sm:$0xff] }
 0x64f   :  { %5340 = vmatpush3.bf16.msra.mxu0 %v5339_v32  ;;  %3475 = vmatprep.mubr.f32.mxu0 %v2508_v33  ;;  %v3669_v32 = vld [vmem:[#allocation6 + $0x6a0] sm:$0xff]  ;;  %v3654_v33 = vld [vmem:[#allocation6 + $0x628] sm:$0xff] }
 0x650   :  { %5342 = vmatprep.subr.bf16.mxu0 %v5341_v27  ;;  %v5399_v27 = vpack.c.bf16 %v3652_v9, %v3651_v30  ;;  %v5401_v18 = vpack.c.bf16 %v3670_v3, %v3669_v32  ;;  %v5403_v12 = vpack.c.bf16 %v3654_v33, %v3653_v5  ;;  %v3531_v30 = vld [vmem:[#allocation7 + $0x168] sm:$0xff]  ;;  %v3533_v32 = vld [vmem:[#allocation7 + $0x178] sm:$0xff]  ;;  %v3697_v3 = vld [vmem:[#allocation6 + $0x780] sm:$0xff] }
 0x651   :  { %v4044_v33 = vld [vmem:[%s6379_s13 + $0x1] ss:$0 sm:$0xff] }
 0x653   :  { %5344 = vmatpush3.bf16.msra.mxu0 %v5343_v34  ;;  %v5405_v34 = vpack.c.bf16 %v3672_v8, %v3671_v10 }
 0x654   :  { %5346 = vmatprep.subr.bf16.mxu0 %v5345_v35  ;;  %v3655_v35 = vld [vmem:[#allocation6 + $0x630] sm:$0xff] }
 0x655   :  { %v5407_v40 = vpack.c.bf16 %v3656_v23, %v3655_v35 }
 0x657   :  { %5348 = vmatpush3.bf16.msra.mxu0 %v5347_v37  ;;  %v3657_v37 = vld [vmem:[#allocation6 + $0x640] sm:$0xff] }
 0x658   :  { %5350 = vmatprep.subr.bf16.mxu0 %v5349_v38  ;;  %v3658_v38 = vld [vmem:[#allocation6 + $0x648] sm:$0xff] }
 0x659   :  { %v5411_v14 = vpack.c.bf16 %v3658_v38, %v3657_v37 }
 0x65b   :  { %5352 = vmatpush3.bf16.msra.mxu0 %v5351_v58  ;;  %v3659_v58 = vld [vmem:[#allocation6 + $0x650] sm:$0xff] }
 0x65c   :  { %5354 = vmatprep.subr.bf16.mxu0 %v5353_v41  ;;  %v3660_v41 = vld [vmem:[#allocation6 + $0x658] sm:$0xff] }
 0x65d   :  { %v5415_v47 = vpack.c.bf16 %v3660_v41, %v3659_v58  ;;  %v4047_v41 = vld [vmem:[%s6375_s9 + $0x2] ss:$0 sm:$0xff] }
 0x65f   :  { %5356 = vmatpush3.bf16.msra.mxu0 %v5355_v59  ;;  %v3661_v59 = vld [vmem:[#allocation6 + $0x660] sm:$0xff] }
 0x660   :  { %5358 = vmatprep.subr.bf16.mxu0 %v5357_v13  ;;  %v3662_v13 = vld [vmem:[#allocation6 + $0x668] sm:$0xff] }
 0x661   :  { %v5419_v54 = vpack.c.bf16 %v3662_v13, %v3661_v59  ;;  %v3408_v59 = vadd.f32 %v6277_v50, %v4047_v41  ;;  %v4046_v50 = vld [vmem:[%s6381_s15 + $0x1] ss:$0 sm:$0xff] }
 0x663   :  { %5360 = vmatpush3.bf16.msra.mxu0 %v5359_v55  ;;  %v3663_v55 = vld [vmem:[#allocation6 + $0x670] sm:$0xff] }
 0x664   :  { %5362 = vmatprep.subr.bf16.mxu0 %v5361_v57  ;;  %v3664_v57 = vld [vmem:[#allocation6 + $0x678] sm:$0xff] }
 0x665   :  { %v5423_v36 = vpack.c.bf16 %v3664_v57, %v3663_v55 }
 0x667   :  { %5364 = vmatpush3.bf16.msra.mxu0 %v5363_v44  ;;  %v5370_v44 = vpack.c.bf16 %v3519_v1, %v3518_v42  ;;  %v4045_v42 = vld [vmem:[%s6380_s14 + $0x1] ss:$0 sm:$0xff] }
 0x668   :  { %5366 = vmatprep.subr.bf16.mxu0 %v5365_v61  ;;  %v3520_v61 = vld [vmem:[#allocation7 + $0x110] sm:$0xff] }
 0x669   :  { %5371 = vmatpush3.bf16.msra.mxu1 %v5370_v44  ;;  %v5373_v46 = vpack.c.bf16 %v3521_v62, %v3520_v61 }
 0x66a   :  { %5372 = vmatprep.subr.bf16.mxu1 %v5665_v22 }
 0x66b   :  { %5368 = vmatpush3.bf16.msra.mxu0 %v5367_v2  ;;  %v3524_v2 = vld [vmem:[#allocation7 + $0x130] sm:$0xff] }
 0x66c   :  { %5394 = vmatprep.subr.bf16.mxu0 %v5393_v6 }
 0x66d   :  { %5374 = vmatpush3.bf16.msra.mxu1 %v5373_v46 }
 0x66e   :  { %3476 = vmatmul.mubr.f32.vlgmr.msra.gmra.mrb[18].mxu0 %v2507_v31  ;;  %5375 = vmatprep.subr.bf16.mxu1 %v5665_v22 }
 0x66f   :  { %5396 = vmatpush3.bf16.msra.mxu0 %v5395_v29  ;;  %3784 = vmatprep.mubr.f32.mxu0 %v2510_v20  ;;  %v3529_v29 = vld [vmem:[#allocation7 + $0x158] sm:$0xff]  ;;  %v3532_v20 = vld [vmem:[#allocation7 + $0x170] sm:$0xff] }
 0x670   :  { %5398 = vmatprep.subr.bf16.mxu0 %v5397_v48  ;;  %v5385_v31 = vpack.c.bf16 %v3529_v29, %v3528_v28  ;;  %v3530_v48 = vld [vmem:[#allocation7 + $0x160] sm:$0xff] }
 0x671   :  { %5377 = vmatpush3.bf16.msra.mxu1 %v5376_v0  ;;  %v5388_v9 = vpack.c.bf16 %v3531_v30, %v3530_v48 }
 0x672   :  { %5378 = vmatprep.subr.bf16.mxu1 %v5665_v22 }
 0x673   :  { %5400 = vmatpush3.bf16.msra.mxu0 %v5399_v27  ;;  %v5391_v27 = vpack.c.bf16 %v3533_v32, %v3532_v20  ;;  %v4048_v20 = vld [vmem:[%s6376_s10 + $0x2] ss:$0 sm:$0xff] }
 0x674   :  { %5402 = vmatprep.subr.bf16.mxu0 %v5401_v18  ;;  %v3698_v18 = vld [vmem:[#allocation6 + $0x788] sm:$0xff] }
 0x675   :  { %v5425_v5 = vpack.c.bf16 %v3698_v18, %v3697_v3  ;;  %v4049_v3 = vld [vmem:[%s6377_s11 + $0x2] ss:$0 sm:$0xff] }
 0x676   :  { %v3681_v18 = vld [vmem:[#allocation6 + $0x700] sm:$0xff] }
 0x677   :  { %5404 = vmatpush3.bf16.msra.mxu0 %v5403_v12 }
 0x678   :  { %5406 = vmatprep.subr.bf16.mxu0 %v5405_v34 }
 0x67b   :  { %5408 = vmatpush3.bf16.msra.mxu0 %v5407_v40 }
 0x67c   :  { %5410 = vmatprep.subr.bf16.mxu0 %v5409_v4 }
 0x67f   :  { %5412 = vmatpush3.bf16.msra.mxu0 %v5411_v14 }
 0x680   :  { %5414 = vmatprep.subr.bf16.mxu0 %v5413_v52 }
 0x683   :  { %5416 = vmatpush3.bf16.msra.mxu0 %v5415_v47 }
 0x684   :  { %5418 = vmatprep.subr.bf16.mxu0 %v5417_v11 }
 0x687   :  { %5420 = vmatpush3.bf16.msra.mxu0 %v5419_v54 }
 0x688   :  { %5422 = vmatprep.subr.bf16.mxu0 %v5421_v15 }
 0x68b   :  { %5424 = vmatpush3.bf16.msra.mxu0 %v5423_v36 }
 0x68c   :  { %5457 = vmatprep.subr.bf16.mxu0 %v5665_v22 }
 0x68e   :  { %3785 = vmatmul.mubr.f32.vlgmr.msra.gmra.mrb[20].mxu0 %v2509_v63 }
 0x68f   :  { %4582 = vmatprep.mubr.msk.f32.mxu0 %vm5666_vm0, %v5664_v43  ;;  %v3525_v43 = vld [vmem:[#allocation7 + $0x138] sm:$0xff] }
 0x690   :  { %v5379_v6 = vpack.c.bf16 %v3525_v43, %v3524_v2 }
 0x692   :  { %5380 = vmatpush3.bf16.msra.mxu1 %v5379_v6 }
 0x693   :  { %5381 = vmatprep.subr.bf16.mxu1 %v5665_v22 }
 0x696   :  { %5383 = vmatpush3.bf16.msra.mxu1 %v5382_v51 }
 0x697   :  { %5384 = vmatprep.subr.bf16.mxu1 %v5665_v22 }
 0x69a   :  { %5386 = vmatpush3.bf16.msra.mxu1 %v5385_v31 }
 0x69b   :  { %5387 = vmatprep.subr.bf16.mxu1 %v5665_v22 }
 0x69e   :  { %5389 = vmatpush3.bf16.msra.mxu1 %v5388_v9 }
 0x69f   :  { %5390 = vmatprep.subr.bf16.mxu1 %v5665_v22 }
 0x6a2   :  { %5392 = vmatpush3.bf16.msra.mxu1 %v5391_v27 }
 0x6a3   :  { %5426 = vmatprep.subr.bf16.mxu1 %v5425_v5  ;;  %v3682_v5 = vld [vmem:[#allocation6 + $0x708] sm:$0xff] }
 0x721   :  { %v3228_v10 = vpop.f32.mrb[16].mxu0 }
 0x722   :  { %v3229_v8 = vadd.f32 %v4044_v33, %v3228_v10  ;;  %v4514_v12 = vpop.f32.mrb[17].mxu0  ;;  %v3699_v33 = vld [vmem:[#allocation6 + $0x790] sm:$0xff]  ;;  %v3700_v10 = vld [vmem:[#allocation6 + $0x798] sm:$0xff] }
 0x723   :  { %v5427_v12 = vpack.c.bf16 %v3682_v5, %v3681_v18  ;;  %v3906_v18 = vld [vmem:[#allocation7 + $0x1c8] sm:$0xff] }
 0x724   :  { %v3234_v34 = vrot.slane %v3229_v8, 4 }
 0x726   :  { %v3235_v35 = vadd.f32 %v3234_v34, %v3229_v8 }
 0x728   :  { %v3236_v23 = vrot.slane %v3235_v35, 2 }
 0x72a   :  { %v3237_v21 = vadd.f32 %v3236_v23, %v3235_v35  ;;  %v5429_v35 = vpack.c.bf16 %v3700_v10, %v3699_v33  ;;  %v3683_v23 = vld [vmem:[#allocation6 + $0x710] sm:$0xff]  ;;  %v3908_v10 = vld [vmem:[#allocation7 + $0x1d8] sm:$0xff] }
 0x72b   :  { %v3907_v33 = vld [vmem:[#allocation7 + $0x1d0] sm:$0xff] }
 0x72c   :  { %v3238_v53 = vrot.slane %v3237_v21, 1 }
 0x72e   :  { %v3239_v40 = vadd.f32 %v3238_v53, %v3237_v21  ;;  %v3684_v21 = vld [vmem:[#allocation6 + $0x718] sm:$0xff]  ;;  %v2512_v53 = vmax.f32 %v6199_v19, 0.0  ;;  %v3706_v19 = vld [vmem:[#allocation6 + $0x7c8] sm:$0xff] }
 0x730   :  { %v3240_v4 = vmul.f32 0.125, %v3239_v40  ;;  %v3701_v40 = vld [vmem:[#allocation6 + $0x7a0] sm:$0xff] }
 0x732   :  { %v3241_v37 = vsub.f32 %v3229_v8, %v3240_v4  ;;  %v3702_v4 = vld [vmem:[#allocation6 + $0x7a8] sm:$0xff] }
 0x734   :  { %v3242_v38 = vmul.f32 %v3241_v37, %v3241_v37 }
 0x736   :  { %v3243_v39 = vrot.slane %v3242_v38, 4 }
 0x738   :  { %v3244_v26 = vadd.f32 %v3243_v39, %v3242_v38  ;;  %v5433_v38 = vpack.c.bf16 %v3702_v4, %v3701_v40  ;;  %v3685_v39 = vld [vmem:[#allocation6 + $0x720] sm:$0xff] }
 0x739   :  { %v4050_v40 = vld [vmem:[%s6379_s13 + $0x2] ss:$0 sm:$0xff] }
 0x73a   :  { %v3245_v14 = vrot.slane %v3244_v26, 2 }
 0x73c   :  { %v3246_v52 = vadd.f32 %v3245_v14, %v3244_v26  ;;  %v3686_v26 = vld [vmem:[#allocation6 + $0x728] sm:$0xff]  ;;  %v3703_v14 = vld [vmem:[#allocation6 + $0x7b0] sm:$0xff] }
 0x73e   :  { %v3247_v58 = vrot.slane %v3246_v52, 1 }
 0x740   :  { %v3248_v17 = vadd.f32 %v3247_v58, %v3246_v52  ;;  %v3704_v52 = vld [vmem:[#allocation6 + $0x7b8] sm:$0xff]  ;;  %v5435_v58 = vpack.c.bf16 %v3686_v26, %v3685_v39 }
 0x741   :  { %v4338_v45 = vpop.f32.mrb[18].mxu0  ;;  %v5437_v41 = vpack.c.bf16 %v3704_v52, %v3703_v14 }
 0x742   :  { %v3249_v47 = vmul.f32 0.125, %v3248_v17  ;;  %v4339_v11 = vpop.f32.mrb[19].mxu0  ;;  %v3687_v17 = vld [vmem:[#allocation6 + $0x730] sm:$0xff] }
 0x743   :  { %v4340_v13 = vadd.f32 %v4339_v11, %v4338_v45  ;;  %v3688_v45 = vld [vmem:[#allocation6 + $0x738] sm:$0xff] }
 0x744   :  { %v3250_v56 = vadd.f32 1e-05, %v3249_v47  ;;  %v3705_v47 = vld [vmem:[#allocation6 + $0x7c0] sm:$0xff]  ;;  %v5439_v11 = vpack.c.bf16 %v3688_v45, %v3687_v17 }
 0x745   :  { %v3478_v25 = vadd.f32 %v4340_v13, %v3408_v59  ;;  %v5441_v59 = vpack.c.bf16 %v3706_v19, %v3705_v47  ;;  %v3689_v13 = vld [vmem:[#allocation6 + $0x740] sm:$0xff] }
 0x746   :  { %5553 = vrsqrt.f32 %v3250_v56  ;;  %v3690_v56 = vld [vmem:[#allocation6 + $0x748] sm:$0xff] }
 0x747   :  { %v3483_v54 = vrot.slane %v3478_v25, 4 }
 0x749   :  { %v3484_v15 = vadd.f32 %v3483_v54, %v3478_v25  ;;  %v3708_v54 = vld [vmem:[#allocation6 + $0x7d8] sm:$0xff] }
 0x74b   :  { %v3485_v55 = vrot.slane %v3484_v15, 2 }
 0x74d   :  { %v3486_v57 = vadd.f32 %v3485_v55, %v3484_v15  ;;  %v5443_v15 = vpack.c.bf16 %v3690_v56, %v3689_v13  ;;  %v4053_v56 = vld [vmem:[%s6375_s9 + $0x3] ss:$0 sm:$0xff] }
 0x74f   :  { %v3487_v36 = vrot.slane %v3486_v57, 1 }
 0x750   :  { %v5554_v63 = vpop.eup %5553 }
 0x751   :  { %v3252_v1 = vmul.f32 %v5554_v63, %v3241_v37  ;;  %v3488_v44 = vadd.f32 %v3487_v36, %v3486_v57  ;;  %v5431_v37 = vpack.c.bf16 %v3684_v21, %v3683_v23  ;;  %v3691_v57 = vld [vmem:[#allocation6 + $0x750] sm:$0xff]  ;;  %v3692_v36 = vld [vmem:[#allocation6 + $0x758] sm:$0xff]  ;;  %v3709_v63 = vld [vmem:[#allocation6 + $0x7e0] sm:$0xff] }
 0x752   :  { %v3911_v23 = vld [vmem:[#allocation7 + $0x1f0] sm:$0xff]  ;;  %v3912_v21 = vld [vmem:[#allocation7 + $0x1f8] sm:$0xff] }
 0x753   :  { %v3259_v61 = vmul.f32 %v4045_v42, %v3252_v1  ;;  %v3489_v62 = vmul.f32 0.125, %v3488_v44  ;;  %v3710_v42 = vld [vmem:[#allocation6 + $0x7e8] sm:$0xff]  ;;  %v5447_v1 = vpack.c.bf16 %v3692_v36, %v3691_v57 }
 0x754   :  { %v5449_v44 = vpack.c.bf16 %v3710_v42, %v3709_v63 }
 0x755   :  { %v3266_v46 = vadd.f32 %v4046_v50, %v3259_v61  ;;  %v3490_v49 = vsub.f32 %v3478_v25, %v3489_v62  ;;  %v3707_v25 = vld [vmem:[#allocation6 + $0x7d0] sm:$0xff]  ;;  %v3693_v50 = vld [vmem:[#allocation6 + $0x760] sm:$0xff]  ;;  %v3694_v61 = vld [vmem:[#allocation6 + $0x768] sm:$0xff] }
 0x756   :  { %v5445_v55 = vpack.c.bf16 %v3708_v54, %v3707_v25  ;;  %v3711_v62 = vld [vmem:[#allocation6 + $0x7f0] sm:$0xff] }
 0x757   :  { %v3267_v60 = vmax.f32 %v3266_v46, 0.0  ;;  %v3491_v0 = vmul.f32 %v3490_v49, %v3490_v49  ;;  %v3712_v46 = vld [vmem:[#allocation6 + $0x7f8] sm:$0xff] }
 0x759   :  { %3268 = vst [vmem:[%s6382_s16 + $0x8] sm:$0xff] %v3267_v60  ;;  %v3492_v2 = vrot.slane %v3491_v0, 4  ;;  %v5453_v60 = vpack.c.bf16 %v3712_v46, %v3711_v62 }
 0x75b   :  { %v3493_v43 = vadd.f32 %v3492_v2, %v3491_v0  ;;  %v3695_v0 = vld [vmem:[#allocation6 + $0x770] sm:$0xff]  ;;  %v3696_v2 = vld [vmem:[#allocation6 + $0x778] sm:$0xff] }
 0x75d   :  { %v3494_v6 = vrot.slane %v3493_v43, 2 }
 0x75f   :  { %v3495_v7 = vadd.f32 %v3494_v6, %v3493_v43  ;;  %v5455_v43 = vpack.c.bf16 %v3696_v2, %v3695_v0  ;;  %v2511_v6 = vmax.f32 %v6195_v16, 0.0  ;;  %v3903_v16 = vld [vmem:[#allocation7 + $0x1b0] sm:$0xff] }
 0x761   :  { %v3496_v24 = vrot.slane %v3495_v7, 1  ;;  %v4390_v51 = vpop.f32.mrb[20].mxu0 }
 0x762   :  { %v4391_v28 = vpop.f32.mrb[21].mxu0 }
 0x763   :  { %v3497_v29 = vadd.f32 %v3496_v24, %v3495_v7  ;;  %v6315_v31 = vadd.f32 %v4391_v28, %v4390_v51  ;;  %v3897_v7 = vld [vmem:[#allocation7 + $0x180] sm:$0xff]  ;;  %v3898_v24 = vld [vmem:[#allocation7 + $0x188] sm:$0xff]  ;;  %v3899_v28 = vld [vmem:[#allocation7 + $0x190] sm:$0xff] }
 0x764   :  { %v5458_v51 = vpack.c.bf16 %v3898_v24, %v3897_v7 }
 0x765   :  { %v3498_v48 = vmul.f32 0.125, %v3497_v29  ;;  %v3900_v29 = vld [vmem:[#allocation7 + $0x198] sm:$0xff]  ;;  %v3787_v57 = vadd.f32 %v6315_v31, %v4053_v56  ;;  %v4052_v31 = vld [vmem:[%s6381_s15 + $0x2] ss:$0 sm:$0xff]  ;;  %v4058_v56 = vld [vmem:[%s6381_s15 + $0x3] ss:$0 sm:$0xff] }
 0x766   :  { %5459 = vmatpush3.bf16.msra.mxu0 %v5458_v51 }
 0x767   :  { %v3499_v30 = vadd.f32 1e-05, %v3498_v48  ;;  %5460 = vmatprep.subr.bf16.mxu0 %v5665_v22  ;;  %v5461_v48 = vpack.c.bf16 %v3900_v29, %v3899_v28 }
 0x769   :  { %5555 = vrsqrt.f32 %v3499_v30  ;;  %v3901_v30 = vld [vmem:[#allocation7 + $0x1a0] sm:$0xff] }
 0x76a   :  { %5462 = vmatpush3.bf16.msra.mxu0 %v5461_v48 }
 0x76b   :  { %5463 = vmatprep.subr.bf16.mxu0 %v5665_v22 }
 0x773   :  { %v5556_v9 = vpop.eup %5555 }
 0x774   :  { %v3501_v32 = vmul.f32 %v5556_v9, %v3490_v49  ;;  %v5451_v49 = vpack.c.bf16 %v3694_v61, %v3693_v50  ;;  %v3902_v9 = vld [vmem:[#allocation7 + $0x1a8] sm:$0xff] }
 0x776   :  { %v3508_v27 = vmul.f32 %v4048_v20, %v3501_v32  ;;  %v5464_v20 = vpack.c.bf16 %v3902_v9, %v3901_v30  ;;  %v3904_v32 = vld [vmem:[#allocation7 + $0x1b8] sm:$0xff] }
 0x778   :  { %v3515_v8 = vadd.f32 %v4049_v3, %v3508_v27  ;;  %5465 = vmatpush3.bf16.msra.mxu0 %v5464_v20  ;;  %v5467_v3 = vpack.c.bf16 %v3904_v32, %v3903_v16  ;;  %v3905_v27 = vld [vmem:[#allocation7 + $0x1c0] sm:$0xff] }
 0x779   :  { %5466 = vmatprep.subr.bf16.mxu0 %v5665_v22  ;;  %v5470_v5 = vpack.c.bf16 %v3906_v18, %v3905_v27  ;;  %v4054_v27 = vld [vmem:[%s6376_s10 + $0x3] ss:$0 sm:$0xff] }
 0x77a   :  { %v3516_v34 = vmax.f32 %v3515_v8, 0.0  ;;  %v5473_v8 = vpack.c.bf16 %v3908_v10, %v3907_v33 }
 0x77c   :  { %4548 = vmatmul.mubr.f32.vlgmr.msra.gmra.mrb[16].mxu1 %v3516_v34  ;;  %5468 = vmatpush3.bf16.msra.mxu0 %v5467_v3  ;;  %v3910_v34 = vld [vmem:[#allocation7 + $0x1e8] sm:$0xff] }
 0x77d   :  { %5428 = vmatpush3.bf16.msra.mxu1 %v5427_v12  ;;  %3854 = vmatprep.mubr.f32.mxu1 %v2512_v53  ;;  %v3909_v12 = vld [vmem:[#allocation7 + $0x1e0] sm:$0xff]  ;;  %v5479_v53 = vpack.c.bf16 %v3912_v21, %v3911_v23 }
 0x77e   :  { %5430 = vmatprep.subr.bf16.mxu1 %v5429_v35  ;;  %5469 = vmatprep.subr.bf16.mxu0 %v5665_v22  ;;  %v5476_v35 = vpack.c.bf16 %v3910_v34, %v3909_v12  ;;  %v4056_v12 = vld [vmem:[%s6379_s13 + $0x3] ss:$0 sm:$0xff] }
 0x780   :  { %5471 = vmatpush3.bf16.msra.mxu0 %v5470_v5  ;;  %v4055_v5 = vld [vmem:[%s6377_s11 + $0x3] ss:$0 sm:$0xff] }
 0x781   :  { %5432 = vmatpush3.bf16.msra.mxu1 %v5431_v37  ;;  %5472 = vmatprep.subr.bf16.mxu0 %v5665_v22 }
 0x782   :  { %5434 = vmatprep.subr.bf16.mxu1 %v5433_v38 }
 0x784   :  { %5474 = vmatpush3.bf16.msra.mxu0 %v5473_v8 }
 0x785   :  { %5436 = vmatpush3.bf16.msra.mxu1 %v5435_v58  ;;  %5475 = vmatprep.subr.bf16.mxu0 %v5665_v22 }
 0x786   :  { %5438 = vmatprep.subr.bf16.mxu1 %v5437_v41 }
 0x788   :  { %5477 = vmatpush3.bf16.msra.mxu0 %v5476_v35 }
 0x789   :  { %5440 = vmatpush3.bf16.msra.mxu1 %v5439_v11  ;;  %5478 = vmatprep.subr.bf16.mxu0 %v5665_v22 }
 0x78a   :  { %5442 = vmatprep.subr.bf16.mxu1 %v5441_v59 }
 0x78c   :  { %5480 = vmatpush3.bf16.msra.mxu0 %v5479_v53 }
 0x78d   :  { %5444 = vmatpush3.bf16.msra.mxu1 %v5443_v15 }
 0x78e   :  { %5446 = vmatprep.subr.bf16.mxu1 %v5445_v55 }
 0x791   :  { %5448 = vmatpush3.bf16.msra.mxu1 %v5447_v1 }
 0x792   :  { %5450 = vmatprep.subr.bf16.mxu1 %v5449_v44 }
 0x795   :  { %5452 = vmatpush3.bf16.msra.mxu1 %v5451_v49  ;;  %v4051_v49 = vld [vmem:[%s6380_s14 + $0x2] ss:$0 sm:$0xff] }
 0x796   :  { %5454 = vmatprep.subr.bf16.mxu1 %v5453_v60 }
 0x799   :  { %5456 = vmatpush3.bf16.msra.mxu1 %v5455_v43 }
 0x79c   :  { %3855 = vmatmul.mubr.f32.vlgmr.msra.gmra.mrb[18].mxu1 %v2511_v6 }
 0x84f   :  { %v3607_v4 = vpop.f32.mrb[16].mxu1 }
 0x850   :  { %v3608_v37 = vadd.f32 %v4050_v40, %v3607_v4  ;;  %v4549_v38 = vpop.f32.mrb[17].mxu1 }
 0x852   :  { %v3613_v39 = vrot.slane %v3608_v37, 4 }
 0x854   :  { %v3614_v26 = vadd.f32 %v3613_v39, %v3608_v37 }
 0x856   :  { %v3615_v14 = vrot.slane %v3614_v26, 2 }
 0x858   :  { %v3616_v52 = vadd.f32 %v3615_v14, %v3614_v26 }
 0x85a   :  { %v3617_v58 = vrot.slane %v3616_v52, 1 }
 0x85c   :  { %v3618_v41 = vadd.f32 %v3617_v58, %v3616_v52 }
 0x85e   :  { %v3619_v17 = vmul.f32 0.125, %v3618_v41 }
 0x860   :  { %v3620_v45 = vsub.f32 %v3608_v37, %v3619_v17 }
 0x862   :  { %v3621_v47 = vmul.f32 %v3620_v45, %v3620_v45 }
 0x864   :  { %v3622_v19 = vrot.slane %v3621_v47, 4 }
 0x866   :  { %v3623_v11 = vadd.f32 %v3622_v19, %v3621_v47 }
 0x868   :  { %v3624_v22 = vrot.slane %v3623_v11, 2 }
 0x86a   :  { %v3625_v59 = vadd.f32 %v3624_v22, %v3623_v11 }
 0x86c   :  { %v3626_v13 = vrot.slane %v3625_v59, 1 }
 0x86e   :  { %v3627_v25 = vadd.f32 %v3626_v13, %v3625_v59  ;;  %v4057_v59 = vld [vmem:[%s6380_s14 + $0x3] ss:$0 sm:$0xff] }
 0x86f   :  { %v4425_v54 = vpop.f32.mrb[18].mxu1 }
 0x870   :  { %v3628_v15 = vmul.f32 0.125, %v3627_v25  ;;  %v4426_v55 = vpop.f32.mrb[19].mxu1 }
 0x871   :  { %v4427_v36 = vadd.f32 %v4426_v55, %v4425_v54 }
 0x872   :  { %v3629_v63 = vadd.f32 1e-05, %v3628_v15 }
 0x873   :  { %v3857_v42 = vadd.f32 %v4427_v36, %v3787_v57 }
 0x874   :  { %5557 = vrsqrt.f32 %v3629_v63 }
 0x875   :  { %v3862_v1 = vrot.slane %v3857_v42, 4 }
 0x877   :  { %v3863_v44 = vadd.f32 %v3862_v1, %v3857_v42 }
 0x879   :  { %v3864_v50 = vrot.slane %v3863_v44, 2 }
 0x87b   :  { %v3865_v61 = vadd.f32 %v3864_v50, %v3863_v44 }
 0x87d   :  { %v3866_v62 = vrot.slane %v3865_v61, 1 }
 0x87e   :  { %v5558_v46 = vpop.eup %5557 }
 0x87f   :  { %v3631_v60 = vmul.f32 %v5558_v46, %v3620_v45  ;;  %v3867_v0 = vadd.f32 %v3866_v62, %v3865_v61 }
 0x881   :  { %v3638_v2 = vmul.f32 %v4051_v49, %v3631_v60  ;;  %v3868_v43 = vmul.f32 0.125, %v3867_v0 }
 0x883   :  { %v3645_v6 = vadd.f32 %v4052_v31, %v3638_v2  ;;  %v3869_v7 = vsub.f32 %v3857_v42, %v3868_v43 }
 0x885   :  { %v3646_v24 = vmax.f32 %v3645_v6, 0.0  ;;  %v3870_v51 = vmul.f32 %v3869_v7, %v3869_v7 }
 0x887   :  { %3647 = vst [vmem:[%s6382_s16 + $0x10] sm:$0xff] %v3646_v24  ;;  %v3871_v28 = vrot.slane %v3870_v51, 4 }
 0x889   :  { %v3872_v29 = vadd.f32 %v3871_v28, %v3870_v51 }
 0x88b   :  { %v3873_v48 = vrot.slane %v3872_v29, 2 }
 0x88d   :  { %v3874_v30 = vadd.f32 %v3873_v48, %v3872_v29 }
 0x88f   :  { %v3875_v9 = vrot.slane %v3874_v30, 1 }
 0x891   :  { %v3876_v20 = vadd.f32 %v3875_v9, %v3874_v30 }
 0x893   :  { %v3877_v16 = vmul.f32 0.125, %v3876_v20 }
 0x895   :  { %v3878_v32 = vadd.f32 1e-05, %v3877_v16 }
 0x897   :  { %5559 = vrsqrt.f32 %v3878_v32 }
 0x8a1   :  { %v5560_v3 = vpop.eup %5559 }
 0x8a2   :  { %v3880_v18 = vmul.f32 %v5560_v3, %v3869_v7 }
 0x8a4   :  { %v3887_v33 = vmul.f32 %v4054_v27, %v3880_v18 }
 0x8a6   :  { %v3894_v10 = vadd.f32 %v4055_v5, %v3887_v33 }
 0x8a8   :  { %v3895_v8 = vmax.f32 %v3894_v10, 0.0 }
 0x8aa   :  { %4583 = vmatmul.mubr.f32.vlgmr.msra.gmra.mrb[22].mxu0 %v3895_v8 }
 0x97d   :  { %v3986_v34 = vpop.f32.mrb[22].mxu0 }
 0x97e   :  { %v3987_v35 = vadd.f32 %v4056_v12, %v3986_v34  ;;  %v4584_v23 = vpop.f32.mrb[23].mxu0 }
 0x980   :  { %v3992_v21 = vrot.slane %v3987_v35, 4 }
 0x982   :  { %v3993_v53 = vadd.f32 %v3992_v21, %v3987_v35 }
 0x984   :  { %v3994_v40 = vrot.slane %v3993_v53, 2 }
 0x986   :  { %v3995_v4 = vadd.f32 %v3994_v40, %v3993_v53 }
 0x988   :  { %v3996_v37 = vrot.slane %v3995_v4, 1 }
 0x98a   :  { %v3997_v38 = vadd.f32 %v3996_v37, %v3995_v4 }
 0x98c   :  { %v3998_v39 = vmul.f32 0.125, %v3997_v38 }
 0x98e   :  { %v3999_v26 = vsub.f32 %v3987_v35, %v3998_v39 }
 0x990   :  { %v4000_v14 = vmul.f32 %v3999_v26, %v3999_v26 }
 0x992   :  { %v4001_v52 = vrot.slane %v4000_v14, 4 }
 0x994   :  { %v4002_v58 = vadd.f32 %v4001_v52, %v4000_v14 }
 0x996   :  { %v4003_v41 = vrot.slane %v4002_v58, 2 }
 0x998   :  { %v4004_v17 = vadd.f32 %v4003_v41, %v4002_v58 }
 0x99a   :  { %v4005_v45 = vrot.slane %v4004_v17, 1 }
 0x99c   :  { %v4006_v47 = vadd.f32 %v4005_v45, %v4004_v17 }
 0x99e   :  { %v4007_v19 = vmul.f32 0.125, %v4006_v47 }
 0x9a0   :  { %v4008_v11 = vadd.f32 1e-05, %v4007_v19 }
 0x9a2   :  { %5561 = vrsqrt.f32 %v4008_v11 }
 0x9ac   :  { %v5562_v22 = vpop.eup %5561 }
 0x9ad   :  { %v4010_v13 = vmul.f32 %v5562_v22, %v3999_v26 }
 0x9af   :  { %v4017_v25 = vmul.f32 %v4057_v59, %v4010_v13 }
 0x9b1   :  { %v4024_v54 = vadd.f32 %v4058_v56, %v4017_v25 }
 0x9b3   :  { %v4025_v15 = vmax.f32 %v4024_v54, 0.0 }
 0x9b5   :  { %4026 = vst [vmem:[%s6382_s16 + $0x18] sm:$0xff] %v4025_v15 }
 0x9b6   :  { %4031 = vsyncpa [#allocation3], 1 }
 0x9b7   :  { %4032 = vsyncpa [#allocation5], 1 }
 0x9b8   :  { %4033 = vsyncpa [#allocation8], 1 }

</bundles_post_ra>
